<compile_context>
chip_gen: v7x
topology: tpu7x:2x2x1
jax: 0.10.0
libtpu: 0.0.40
codegen_flags: <defaults>
</compile_context>

<pallas_src>
import jax
import jax.numpy as jnp
from jax import lax
from jax.experimental import pallas as pl
from jax.experimental.pallas import tpu as pltpu  # noqa: F401  (TPU backend)

LEAKY = 0.2
BN_EPS = 1e-5


# ----------------------------- Pallas kernels ------------------------------

def _full_spec(shape):
    """Single-block BlockSpec covering the whole array (grid=(1,))."""
    return pl.BlockSpec(shape, lambda i: (0,) * len(shape))


def _conv_bn_lrelu_kernel(cols_ref, w_ref, b_ref, gamma_ref, beta_ref, o_ref):
    """Fused: (im2col GEMM + bias) -> BatchNorm(batch stats) -> LeakyReLU."""
    # MXU GEMM, bf16 operands, f32 accumulation.
    y = jnp.dot(cols_ref[...], w_ref[...], preferred_element_type=jnp.float32)
    y = y + b_ref[...]                                   # (M, C) + (1, C)
    # Train-mode BatchNorm2d statistics over the M = N*H*W rows (per channel).
    mean = jnp.mean(y, axis=0, keepdims=True)            # (1, C)
    d = y - mean
    var = jnp.mean(d * d, axis=0, keepdims=True)         # biased variance
    scale = gamma_ref[...] * lax.rsqrt(var + BN_EPS)     # EUP rsqrt
    shift = beta_ref[...] - mean * scale
    z = y * scale + shift
    o_ref[...] = jnp.where(z >= 0, z, LEAKY * z)


def conv_bn_lrelu(cols, w_mat, bias, gamma, beta):
    """cols:(M,K) bf16, w:(K,C) bf16, bias/gamma/beta:(1,C) f32 -> (M,C) f32."""
    M, K = cols.shape
    _, C = w_mat.shape
    return pl.pallas_call(
        _conv_bn_lrelu_kernel,
        out_shape=jax.ShapeDtypeStruct((M, C), jnp.float32),
        grid=(1,),
        in_specs=[_full_spec((M, K)), _full_spec((K, C)), _full_spec((1, C)),
                  _full_spec((1, C)), _full_spec((1, C))],
        out_specs=_full_spec((M, C)),
    )(cols, w_mat, bias, gamma, beta)


def _tail_kernel(cols_ref, w_ref, b_ref, pool_ref, fcw_ref, fcb_ref,
                 l8_ref, pfc_ref, out_ref):
    """Fused: conv8 GEMM + bias -> global avg pool (pool-matrix matmul) -> fc."""
    l8 = jnp.dot(cols_ref[...], w_ref[...], preferred_element_type=jnp.float32)
    l8 = l8 + b_ref[...]
    l8_ref[...] = l8                                       # (M, C) feature map
    pfc = jnp.dot(pool_ref[...], l8, preferred_element_type=jnp.float32)
    pfc_ref[...] = pfc                                     # (N, C) avg-pooled
    out_ref[...] = (jnp.dot(pfc, fcw_ref[...], preferred_element_type=jnp.float32)
                    + fcb_ref[...])


def conv8_pool_fc(cols, w_mat, bias, pool, fc_w, fc_b):
    M, K = cols.shape
    _, C = w_mat.shape
    N = pool.shape[0]
    return pl.pallas_call(
        _tail_kernel,
        out_shape=(jax.ShapeDtypeStruct((M, C), jnp.float32),
                   jax.ShapeDtypeStruct((N, C), jnp.float32),
                   jax.ShapeDtypeStruct((N, C), jnp.float32)),
        grid=(1,),
        in_specs=[_full_spec((M, K)), _full_spec((K, C)), _full_spec((1, C)),
                  _full_spec((N, M)), _full_spec((C, C)), _full_spec((1, C))],
        out_specs=(_full_spec((M, C)), _full_spec((N, C)), _full_spec((N, C))),
    )(cols, w_mat, bias, pool, fc_w, fc_b)


# ------------------------------ XLA-side glue -------------------------------

def im2col_3x3(x_nhwc, stride):
    """3x3 / pad=1 im2col. Returns cols:(N*Ho*Wo, 9*C) (same dtype), Ho, Wo."""
    N, H, W, C = x_nhwc.shape
    xp = jnp.pad(x_nhwc, ((0, 0), (1, 1), (1, 1), (0, 0)))
    Ho = (H + 2 - 3) // stride + 1
    Wo = (W + 2 - 3) // stride + 1
    patches = []
    for di in range(3):
        for dj in range(3):
            patches.append(
                xp[:, di:di + (Ho - 1) * stride + 1:stride,
                      dj:dj + (Wo - 1) * stride + 1:stride, :])
    cols = jnp.concatenate(patches, axis=-1).reshape(N * Ho * Wo, 9 * C)
    return cols, Ho, Wo


# ------------------------------- parameters ---------------------------------

def init_params(key, in_features=3, conv_dim=16):
    """Weights are stored pre-transformed for the kernels:
       conv i : w_mat (9*C_in, C_out) bf16  == torch_w.permute(2,3,1,0).reshape
                b     (1, C_out)      f32
       gn i   : gamma/beta (1, C) f32 (BatchNorm2d default init)
       fc     : fc_w (in, out) f32  (pre-transposed vs. nn.Linear's (out, in))
    """
    cd = conv_dim
    specs = [(in_features, cd), (cd, 2 * cd), (2 * cd, 2 * cd), (2 * cd, 4 * cd),
             (4 * cd, 4 * cd), (4 * cd, 8 * cd), (8 * cd, 8 * cd), (8 * cd, 16 * cd)]
    params = {}
    keys = jax.random.split(key, len(specs) + 1)
    for i, (cin, cout) in enumerate(specs):
        wk, bk = jax.random.split(keys[i])
        w = jax.random.normal(wk, (cout, cin, 3, 3), jnp.float32) / jnp.sqrt(9.0 * cin)
        w_mat = jnp.transpose(w, (2, 3, 1, 0)).reshape(9 * cin, cout)   # (kh,kw,cin)->cout
        b = 0.01 * jax.random.normal(bk, (cout,), jnp.float32)
        params[f"conv{i + 1}"] = (w_mat.astype(jnp.bfloat16), b.reshape(1, cout))
        if i < 7:  # gn1..gn7 (BatchNorm2d affine params, default init)
            params[f"gn{i + 1}"] = (jnp.ones((1, cout), jnp.float32),
                                    jnp.zeros((1, cout), jnp.float32))
    fk, _ = jax.random.split(keys[-1])
    fc_dim = 16 * cd
    fc_w = jax.random.normal(fk, (fc_dim, fc_dim), jnp.float32) / jnp.sqrt(fc_dim)
    fc_b = jnp.zeros((1, fc_dim), jnp.float32)
    params["fc"] = (fc_w, fc_b)          # stored as (in, out): pre-transposed
    return params


# -------------------------------- forward -----------------------------------

def convnet_aae_forward(x_nchw, params):
    x = jnp.transpose(x_nchw, (0, 2, 3, 1)).astype(jnp.float32)   # NCHW -> NHWC
    strides = [1, 2, 1, 2, 1, 2, 1, 1]
    N = x.shape[0]
    fms_nhwc = []
    h = x
    for i in range(7):                                   # conv1..conv7 (+BN+LReLU)
        w_mat, b = params[f"conv{i + 1}"]
        gamma, beta = params[f"gn{i + 1}"]
        cols, Ho, Wo = im2col_3x3(h.astype(jnp.bfloat16), strides[i])
        out = conv_bn_lrelu(cols, w_mat, b, gamma, beta)
        h = out.reshape(N, Ho, Wo, w_mat.shape[1])
        fms_nhwc.append(h)

    # conv8 + global average pool + fc, fused in one kernel.
    w_mat, b = params["conv8"]
    cols, Ho, Wo = im2col_3x3(h.astype(jnp.bfloat16), strides[7])
    HW = Ho * Wo
    pool = jnp.kron(jnp.eye(N, dtype=jnp.float32),
                    jnp.full((1, HW), 1.0 / HW, jnp.float32))      # (N, N*HW)
    fc_w, fc_b = params["fc"]
    l8_flat, prev_fc, out_features = conv8_pool_fc(cols, w_mat, b, pool, fc_w, fc_b)
    l8 = l8_flat.reshape(N, Ho, Wo, w_mat.shape[1])
    fms_nhwc.append(l8)

    # Match the PyTorch module's NCHW feature-map layout.
    fms_nchw = [jnp.transpose(f, (0, 3, 1, 2)) for f in fms_nhwc]
    return fms_nchw, prev_fc, out_features


forward_jit = jax.jit(convnet_aae_forward)


# --------------------------------- driver -----------------------------------

if __name__ == "__main__":
    IN_FEATURES, CONV_DIM = 3, 16
    key = jax.random.PRNGKey(0)
    pkey, xkey = jax.random.split(key)
    params = init_params(pkey, in_features=IN_FEATURES, conv_dim=CONV_DIM)

    x = jax.random.normal(xkey, (2, IN_FEATURES, 16, 16), jnp.float32)

    fms, prev_fc, out_features = forward_jit(x, params)
    jax.block_until_ready(out_features)
    jax.block_until_ready(prev_fc)
    for f in fms:
        jax.block_until_ready(f)

    expected_fm_shapes = [
        (2, CONV_DIM, 16, 16), (2, 2 * CONV_DIM, 8, 8), (2, 2 * CONV_DIM, 8, 8),
        (2, 4 * CONV_DIM, 4, 4), (2, 4 * CONV_DIM, 4, 4), (2, 8 * CONV_DIM, 2, 2),
        (2, 8 * CONV_DIM, 2, 2), (2, 16 * CONV_DIM, 2, 2),
    ]
    assert [tuple(f.shape) for f in fms] == expected_fm_shapes
    assert prev_fc.shape == (2, 16 * CONV_DIM)
    assert out_features.shape == (2, 16 * CONV_DIM)
    assert bool(jnp.all(jnp.isfinite(out_features)))
    assert bool(jnp.all(jnp.isfinite(prev_fc)))

    print("KERNEL_OK")
</pallas_src>

<mosaic_0001>
module attributes {stable_mosaic.version = 11 : i64} {
  func.func @_conv_bn_lrelu_kernel(%arg0: i32, %arg1: memref<512x27xbf16, #tpu.memory_space<vmem>>, %arg2: memref<27x16xbf16, #tpu.memory_space<vmem>>, %arg3: memref<1x16xf32, #tpu.memory_space<vmem>>, %arg4: memref<1x16xf32, #tpu.memory_space<vmem>>, %arg5: memref<1x16xf32, #tpu.memory_space<vmem>>, %arg6: memref<512x16xf32, #tpu.memory_space<vmem>>) attributes {dimension_semantics = [#tpu.dimension_semantics<arbitrary>], iteration_bounds = array<i64: 1>, scalar_prefetch = 0 : i64, scratch_operands = 0 : i64, tpu.core_type = #tpu.core_type<tc>, window_params = [{pipeline_mode = #tpu.pipeline_mode<synchronous>, transform_indices = @transform_0, window_bounds = array<i64: 512, 27>}, {pipeline_mode = #tpu.pipeline_mode<synchronous>, transform_indices = @transform_1, window_bounds = array<i64: 27, 16>}, {pipeline_mode = #tpu.pipeline_mode<synchronous>, transform_indices = @transform_2, window_bounds = array<i64: 1, 16>}, {pipeline_mode = #tpu.pipeline_mode<synchronous>, transform_indices = @transform_3, window_bounds = array<i64: 1, 16>}, {pipeline_mode = #tpu.pipeline_mode<synchronous>, transform_indices = @transform_4, window_bounds = array<i64: 1, 16>}, {pipeline_mode = #tpu.pipeline_mode<synchronous>, transform_indices = @transform_5, window_bounds = array<i64: 512, 16>}]} {
    %c0 = arith.constant 0 : index
    %c0_0 = arith.constant 0 : index
    %0 = vector.load %arg1[%c0, %c0_0] : memref<512x27xbf16, #tpu.memory_space<vmem>>, vector<512x27xbf16>
    %c0_1 = arith.constant 0 : index
    %c0_2 = arith.constant 0 : index
    %1 = vector.load %arg2[%c0_1, %c0_2] : memref<27x16xbf16, #tpu.memory_space<vmem>>, vector<27x16xbf16>
    %cst = arith.constant dense<0.000000e+00> : vector<512x16xf32>
    %2 = tpu.matmul %0, %1, %cst {dimension_numbers = #tpu.dot_dimension_numbers<[1], [0], [0], [1], [0, 0, 1, 1], [], []>} : vector<512x27xbf16>, vector<27x16xbf16>, vector<512x16xf32> -> vector<512x16xf32>
    %c0_3 = arith.constant 0 : index
    %c0_4 = arith.constant 0 : index
    %3 = vector.load %arg3[%c0_3, %c0_4] : memref<1x16xf32, #tpu.memory_space<vmem>>, vector<1x16xf32>
    %4 = vector.broadcast %3 : vector<1x16xf32> to vector<512x16xf32>
    %5 = arith.addf %2, %4 : vector<512x16xf32>
    %cst_5 = arith.constant dense<0.000000e+00> : vector<16xf32>
    %6 = vector.multi_reduction <add>, %5, %cst_5 [0] : vector<512x16xf32> to vector<16xf32>
    %7 = vector.shape_cast %6 : vector<16xf32> to vector<1x16xf32>
    %cst_6 = arith.constant 5.120000e+02 : f32
    %8 = vector.broadcast %cst_6 : f32 to vector<1x16xf32>
    %9 = arith.divf %7, %8 : vector<1x16xf32>
    %10 = vector.broadcast %9 : vector<1x16xf32> to vector<512x16xf32>
    %11 = arith.subf %5, %10 : vector<512x16xf32>
    %12 = arith.mulf %11, %11 : vector<512x16xf32>
    %cst_7 = arith.constant dense<0.000000e+00> : vector<16xf32>
    %13 = vector.multi_reduction <add>, %12, %cst_7 [0] : vector<512x16xf32> to vector<16xf32>
    %14 = vector.shape_cast %13 : vector<16xf32> to vector<1x16xf32>
    %cst_8 = arith.constant 5.120000e+02 : f32
    %15 = vector.broadcast %cst_8 : f32 to vector<1x16xf32>
    %16 = arith.divf %14, %15 : vector<1x16xf32>
    %c0_9 = arith.constant 0 : index
    %c0_10 = arith.constant 0 : index
    %17 = vector.load %arg4[%c0_9, %c0_10] : memref<1x16xf32, #tpu.memory_space<vmem>>, vector<1x16xf32>
    %cst_11 = arith.constant 9.99999974E-6 : f32
    %18 = vector.broadcast %cst_11 : f32 to vector<1x16xf32>
    %19 = arith.addf %16, %18 : vector<1x16xf32>
    %20 = math.rsqrt %19 : vector<1x16xf32>
    %21 = arith.mulf %17, %20 : vector<1x16xf32>
    %c0_12 = arith.constant 0 : index
    %c0_13 = arith.constant 0 : index
    %22 = vector.load %arg5[%c0_12, %c0_13] : memref<1x16xf32, #tpu.memory_space<vmem>>, vector<1x16xf32>
    %23 = arith.mulf %9, %21 : vector<1x16xf32>
    %24 = arith.subf %22, %23 : vector<1x16xf32>
    %25 = vector.broadcast %21 : vector<1x16xf32> to vector<512x16xf32>
    %26 = arith.mulf %5, %25 : vector<512x16xf32>
    %27 = vector.broadcast %24 : vector<1x16xf32> to vector<512x16xf32>
    %28 = arith.addf %26, %27 : vector<512x16xf32>
    %cst_14 = arith.constant 0.000000e+00 : f32
    %29 = vector.broadcast %cst_14 : f32 to vector<512x16xf32>
    %30 = arith.cmpf oge, %28, %29 : vector<512x16xf32>
    %cst_15 = arith.constant 2.000000e-01 : f32
    %31 = vector.broadcast %cst_15 : f32 to vector<512x16xf32>
    %32 = arith.mulf %31, %28 : vector<512x16xf32>
    %33 = arith.select %30, %28, %32 : vector<512x16xi1>, vector<512x16xf32>
    %c0_16 = arith.constant 0 : index
    %c0_17 = arith.constant 0 : index
    %34 = vector.load %arg6[%c0_16, %c0_17] : memref<512x16xf32, #tpu.memory_space<vmem>>, vector<512x16xf32>
    tpu.vector_store %arg6[%c0_16, %c0_17], %33 {strides = array<i32>} : memref<512x16xf32, #tpu.memory_space<vmem>>, vector<512x16xf32>,
    return
  }
  func.func @transform_0(%arg0: i32) -> (i32, i32) {
    %c0_i32 = arith.constant 0 : i32
    %c0_i32_0 = arith.constant 0 : i32
    %c0_i32_1 = arith.constant 0 : i32
    return %c0_i32, %c0_i32_0 : i32, i32
  }
  func.func @transform_1(%arg0: i32) -> (i32, i32) {
    %c0_i32 = arith.constant 0 : i32
    %c0_i32_0 = arith.constant 0 : i32
    %c0_i32_1 = arith.constant 0 : i32
    return %c0_i32, %c0_i32_0 : i32, i32
  }
  func.func @transform_2(%arg0: i32) -> (i32, i32) {
    %c0_i32 = arith.constant 0 : i32
    %c0_i32_0 = arith.constant 0 : i32
    %c0_i32_1 = arith.constant 0 : i32
    return %c0_i32, %c0_i32_0 : i32, i32
  }
  func.func @transform_3(%arg0: i32) -> (i32, i32) {
    %c0_i32 = arith.constant 0 : i32
    %c0_i32_0 = arith.constant 0 : i32
    %c0_i32_1 = arith.constant 0 : i32
    return %c0_i32, %c0_i32_0 : i32, i32
  }
  func.func @transform_4(%arg0: i32) -> (i32, i32) {
    %c0_i32 = arith.constant 0 : i32
    %c0_i32_0 = arith.constant 0 : i32
    %c0_i32_1 = arith.constant 0 : i32
    return %c0_i32, %c0_i32_0 : i32, i32
  }
  func.func @transform_5(%arg0: i32) -> (i32, i32) {
    %c0_i32 = arith.constant 0 : i32
    %c0_i32_0 = arith.constant 0 : i32
    %c0_i32_1 = arith.constant 0 : i32
    return %c0_i32, %c0_i32_0 : i32, i32
  }
}

module attributes {stable_mosaic.version = 11 : i64} {
  func.func @_conv_bn_lrelu_kernel(%arg0: i32, %arg1: memref<128x144xbf16, #tpu.memory_space<vmem>>, %arg2: memref<144x32xbf16, #tpu.memory_space<vmem>>, %arg3: memref<1x32xf32, #tpu.memory_space<vmem>>, %arg4: memref<1x32xf32, #tpu.memory_space<vmem>>, %arg5: memref<1x32xf32, #tpu.memory_space<vmem>>, %arg6: memref<128x32xf32, #tpu.memory_space<vmem>>) attributes {dimension_semantics = [#tpu.dimension_semantics<arbitrary>], iteration_bounds = array<i64: 1>, scalar_prefetch = 0 : i64, scratch_operands = 0 : i64, tpu.core_type = #tpu.core_type<tc>, window_params = [{pipeline_mode = #tpu.pipeline_mode<synchronous>, transform_indices = @transform_0, window_bounds = array<i64: 128, 144>}, {pipeline_mode = #tpu.pipeline_mode<synchronous>, transform_indices = @transform_1, window_bounds = array<i64: 144, 32>}, {pipeline_mode = #tpu.pipeline_mode<synchronous>, transform_indices = @transform_2, window_bounds = array<i64: 1, 32>}, {pipeline_mode = #tpu.pipeline_mode<synchronous>, transform_indices = @transform_3, window_bounds = array<i64: 1, 32>}, {pipeline_mode = #tpu.pipeline_mode<synchronous>, transform_indices = @transform_4, window_bounds = array<i64: 1, 32>}, {pipeline_mode = #tpu.pipeline_mode<synchronous>, transform_indices = @transform_5, window_bounds = array<i64: 128, 32>}]} {
    %c0 = arith.constant 0 : index
    %c0_0 = arith.constant 0 : index
    %0 = vector.load %arg1[%c0, %c0_0] : memref<128x144xbf16, #tpu.memory_space<vmem>>, vector<128x144xbf16>
    %c0_1 = arith.constant 0 : index
    %c0_2 = arith.constant 0 : index
    %1 = vector.load %arg2[%c0_1, %c0_2] : memref<144x32xbf16, #tpu.memory_space<vmem>>, vector<144x32xbf16>
    %cst = arith.constant dense<0.000000e+00> : vector<128x32xf32>
    %2 = tpu.matmul %0, %1, %cst {dimension_numbers = #tpu.dot_dimension_numbers<[1], [0], [0], [1], [0, 0, 1, 1], [], []>} : vector<128x144xbf16>, vector<144x32xbf16>, vector<128x32xf32> -> vector<128x32xf32>
    %c0_3 = arith.constant 0 : index
    %c0_4 = arith.constant 0 : index
    %3 = vector.load %arg3[%c0_3, %c0_4] : memref<1x32xf32, #tpu.memory_space<vmem>>, vector<1x32xf32>
    %4 = vector.broadcast %3 : vector<1x32xf32> to vector<128x32xf32>
    %5 = arith.addf %2, %4 : vector<128x32xf32>
    %cst_5 = arith.constant dense<0.000000e+00> : vector<32xf32>
    %6 = vector.multi_reduction <add>, %5, %cst_5 [0] : vector<128x32xf32> to vector<32xf32>
    %7 = vector.shape_cast %6 : vector<32xf32> to vector<1x32xf32>
    %cst_6 = arith.constant 1.280000e+02 : f32
    %8 = vector.broadcast %cst_6 : f32 to vector<1x32xf32>
    %9 = arith.divf %7, %8 : vector<1x32xf32>
    %10 = vector.broadcast %9 : vector<1x32xf32> to vector<128x32xf32>
    %11 = arith.subf %5, %10 : vector<128x32xf32>
    %12 = arith.mulf %11, %11 : vector<128x32xf32>
    %cst_7 = arith.constant dense<0.000000e+00> : vector<32xf32>
    %13 = vector.multi_reduction <add>, %12, %cst_7 [0] : vector<128x32xf32> to vector<32xf32>
    %14 = vector.shape_cast %13 : vector<32xf32> to vector<1x32xf32>
    %cst_8 = arith.constant 1.280000e+02 : f32
    %15 = vector.broadcast %cst_8 : f32 to vector<1x32xf32>
    %16 = arith.divf %14, %15 : vector<1x32xf32>
    %c0_9 = arith.constant 0 : index
    %c0_10 = arith.constant 0 : index
    %17 = vector.load %arg4[%c0_9, %c0_10] : memref<1x32xf32, #tpu.memory_space<vmem>>, vector<1x32xf32>
    %cst_11 = arith.constant 9.99999974E-6 : f32
    %18 = vector.broadcast %cst_11 : f32 to vector<1x32xf32>
    %19 = arith.addf %16, %18 : vector<1x32xf32>
    %20 = math.rsqrt %19 : vector<1x32xf32>
    %21 = arith.mulf %17, %20 : vector<1x32xf32>
    %c0_12 = arith.constant 0 : index
    %c0_13 = arith.constant 0 : index
    %22 = vector.load %arg5[%c0_12, %c0_13] : memref<1x32xf32, #tpu.memory_space<vmem>>, vector<1x32xf32>
    %23 = arith.mulf %9, %21 : vector<1x32xf32>
    %24 = arith.subf %22, %23 : vector<1x32xf32>
    %25 = vector.broadcast %21 : vector<1x32xf32> to vector<128x32xf32>
    %26 = arith.mulf %5, %25 : vector<128x32xf32>
    %27 = vector.broadcast %24 : vector<1x32xf32> to vector<128x32xf32>
    %28 = arith.addf %26, %27 : vector<128x32xf32>
    %cst_14 = arith.constant 0.000000e+00 : f32
    %29 = vector.broadcast %cst_14 : f32 to vector<128x32xf32>
    %30 = arith.cmpf oge, %28, %29 : vector<128x32xf32>
    %cst_15 = arith.constant 2.000000e-01 : f32
    %31 = vector.broadcast %cst_15 : f32 to vector<128x32xf32>
    %32 = arith.mulf %31, %28 : vector<128x32xf32>
    %33 = arith.select %30, %28, %32 : vector<128x32xi1>, vector<128x32xf32>
    %c0_16 = arith.constant 0 : index
    %c0_17 = arith.constant 0 : index
    %34 = vector.load %arg6[%c0_16, %c0_17] : memref<128x32xf32, #tpu.memory_space<vmem>>, vector<128x32xf32>
    tpu.vector_store %arg6[%c0_16, %c0_17], %33 {strides = array<i32>} : memref<128x32xf32, #tpu.memory_space<vmem>>, vector<128x32xf32>,
    return
  }
  func.func @transform_0(%arg0: i32) -> (i32, i32) {
    %c0_i32 = arith.constant 0 : i32
    %c0_i32_0 = arith.constant 0 : i32
    %c0_i32_1 = arith.constant 0 : i32
    return %c0_i32, %c0_i32_0 : i32, i32
  }
  func.func @transform_1(%arg0: i32) -> (i32, i32) {
    %c0_i32 = arith.constant 0 : i32
    %c0_i32_0 = arith.constant 0 : i32
    %c0_i32_1 = arith.constant 0 : i32
    return %c0_i32, %c0_i32_0 : i32, i32
  }
  func.func @transform_2(%arg0: i32) -> (i32, i32) {
    %c0_i32 = arith.constant 0 : i32
    %c0_i32_0 = arith.constant 0 : i32
    %c0_i32_1 = arith.constant 0 : i32
    return %c0_i32, %c0_i32_0 : i32, i32
  }
  func.func @transform_3(%arg0: i32) -> (i32, i32) {
    %c0_i32 = arith.constant 0 : i32
    %c0_i32_0 = arith.constant 0 : i32
    %c0_i32_1 = arith.constant 0 : i32
    return %c0_i32, %c0_i32_0 : i32, i32
  }
  func.func @transform_4(%arg0: i32) -> (i32, i32) {
    %c0_i32 = arith.constant 0 : i32
    %c0_i32_0 = arith.constant 0 : i32
    %c0_i32_1 = arith.constant 0 : i32
    return %c0_i32, %c0_i32_0 : i32, i32
  }
  func.func @transform_5(%arg0: i32) -> (i32, i32) {
    %c0_i32 = arith.constant 0 : i32
    %c0_i32_0 = arith.constant 0 : i32
    %c0_i32_1 = arith.constant 0 : i32
    return %c0_i32, %c0_i32_0 : i32, i32
  }
}

module attributes {stable_mosaic.version = 11 : i64} {
  func.func @_conv_bn_lrelu_kernel(%arg0: i32, %arg1: memref<128x288xbf16, #tpu.memory_space<vmem>>, %arg2: memref<288x32xbf16, #tpu.memory_space<vmem>>, %arg3: memref<1x32xf32, #tpu.memory_space<vmem>>, %arg4: memref<1x32xf32, #tpu.memory_space<vmem>>, %arg5: memref<1x32xf32, #tpu.memory_space<vmem>>, %arg6: memref<128x32xf32, #tpu.memory_space<vmem>>) attributes {dimension_semantics = [#tpu.dimension_semantics<arbitrary>], iteration_bounds = array<i64: 1>, scalar_prefetch = 0 : i64, scratch_operands = 0 : i64, tpu.core_type = #tpu.core_type<tc>, window_params = [{pipeline_mode = #tpu.pipeline_mode<synchronous>, transform_indices = @transform_0, window_bounds = array<i64: 128, 288>}, {pipeline_mode = #tpu.pipeline_mode<synchronous>, transform_indices = @transform_1, window_bounds = array<i64: 288, 32>}, {pipeline_mode = #tpu.pipeline_mode<synchronous>, transform_indices = @transform_2, window_bounds = array<i64: 1, 32>}, {pipeline_mode = #tpu.pipeline_mode<synchronous>, transform_indices = @transform_3, window_bounds = array<i64: 1, 32>}, {pipeline_mode = #tpu.pipeline_mode<synchronous>, transform_indices = @transform_4, window_bounds = array<i64: 1, 32>}, {pipeline_mode = #tpu.pipeline_mode<synchronous>, transform_indices = @transform_5, window_bounds = array<i64: 128, 32>}]} {
    %c0 = arith.constant 0 : index
    %c0_0 = arith.constant 0 : index
    %0 = vector.load %arg1[%c0, %c0_0] : memref<128x288xbf16, #tpu.memory_space<vmem>>, vector<128x288xbf16>
    %c0_1 = arith.constant 0 : index
    %c0_2 = arith.constant 0 : index
    %1 = vector.load %arg2[%c0_1, %c0_2] : memref<288x32xbf16, #tpu.memory_space<vmem>>, vector<288x32xbf16>
    %cst = arith.constant dense<0.000000e+00> : vector<128x32xf32>
    %2 = tpu.matmul %0, %1, %cst {dimension_numbers = #tpu.dot_dimension_numbers<[1], [0], [0], [1], [0, 0, 1, 1], [], []>} : vector<128x288xbf16>, vector<288x32xbf16>, vector<128x32xf32> -> vector<128x32xf32>
    %c0_3 = arith.constant 0 : index
    %c0_4 = arith.constant 0 : index
    %3 = vector.load %arg3[%c0_3, %c0_4] : memref<1x32xf32, #tpu.memory_space<vmem>>, vector<1x32xf32>
    %4 = vector.broadcast %3 : vector<1x32xf32> to vector<128x32xf32>
    %5 = arith.addf %2, %4 : vector<128x32xf32>
    %cst_5 = arith.constant dense<0.000000e+00> : vector<32xf32>
    %6 = vector.multi_reduction <add>, %5, %cst_5 [0] : vector<128x32xf32> to vector<32xf32>
    %7 = vector.shape_cast %6 : vector<32xf32> to vector<1x32xf32>
    %cst_6 = arith.constant 1.280000e+02 : f32
    %8 = vector.broadcast %cst_6 : f32 to vector<1x32xf32>
    %9 = arith.divf %7, %8 : vector<1x32xf32>
    %10 = vector.broadcast %9 : vector<1x32xf32> to vector<128x32xf32>
    %11 = arith.subf %5, %10 : vector<128x32xf32>
    %12 = arith.mulf %11, %11 : vector<128x32xf32>
    %cst_7 = arith.constant dense<0.000000e+00> : vector<32xf32>
    %13 = vector.multi_reduction <add>, %12, %cst_7 [0] : vector<128x32xf32> to vector<32xf32>
    %14 = vector.shape_cast %13 : vector<32xf32> to vector<1x32xf32>
    %cst_8 = arith.constant 1.280000e+02 : f32
    %15 = vector.broadcast %cst_8 : f32 to vector<1x32xf32>
    %16 = arith.divf %14, %15 : vector<1x32xf32>
    %c0_9 = arith.constant 0 : index
    %c0_10 = arith.constant 0 : index
    %17 = vector.load %arg4[%c0_9, %c0_10] : memref<1x32xf32, #tpu.memory_space<vmem>>, vector<1x32xf32>
    %cst_11 = arith.constant 9.99999974E-6 : f32
    %18 = vector.broadcast %cst_11 : f32 to vector<1x32xf32>
    %19 = arith.addf %16, %18 : vector<1x32xf32>
    %20 = math.rsqrt %19 : vector<1x32xf32>
    %21 = arith.mulf %17, %20 : vector<1x32xf32>
    %c0_12 = arith.constant 0 : index
    %c0_13 = arith.constant 0 : index
    %22 = vector.load %arg5[%c0_12, %c0_13] : memref<1x32xf32, #tpu.memory_space<vmem>>, vector<1x32xf32>
    %23 = arith.mulf %9, %21 : vector<1x32xf32>
    %24 = arith.subf %22, %23 : vector<1x32xf32>
    %25 = vector.broadcast %21 : vector<1x32xf32> to vector<128x32xf32>
    %26 = arith.mulf %5, %25 : vector<128x32xf32>
    %27 = vector.broadcast %24 : vector<1x32xf32> to vector<128x32xf32>
    %28 = arith.addf %26, %27 : vector<128x32xf32>
    %cst_14 = arith.constant 0.000000e+00 : f32
    %29 = vector.broadcast %cst_14 : f32 to vector<128x32xf32>
    %30 = arith.cmpf oge, %28, %29 : vector<128x32xf32>
    %cst_15 = arith.constant 2.000000e-01 : f32
    %31 = vector.broadcast %cst_15 : f32 to vector<128x32xf32>
    %32 = arith.mulf %31, %28 : vector<128x32xf32>
    %33 = arith.select %30, %28, %32 : vector<128x32xi1>, vector<128x32xf32>
    %c0_16 = arith.constant 0 : index
    %c0_17 = arith.constant 0 : index
    %34 = vector.load %arg6[%c0_16, %c0_17] : memref<128x32xf32, #tpu.memory_space<vmem>>, vector<128x32xf32>
    tpu.vector_store %arg6[%c0_16, %c0_17], %33 {strides = array<i32>} : memref<128x32xf32, #tpu.memory_space<vmem>>, vector<128x32xf32>,
    return
  }
  func.func @transform_0(%arg0: i32) -> (i32, i32) {
    %c0_i32 = arith.constant 0 : i32
    %c0_i32_0 = arith.constant 0 : i32
    %c0_i32_1 = arith.constant 0 : i32
    return %c0_i32, %c0_i32_0 : i32, i32
  }
  func.func @transform_1(%arg0: i32) -> (i32, i32) {
    %c0_i32 = arith.constant 0 : i32
    %c0_i32_0 = arith.constant 0 : i32
    %c0_i32_1 = arith.constant 0 : i32
    return %c0_i32, %c0_i32_0 : i32, i32
  }
  func.func @transform_2(%arg0: i32) -> (i32, i32) {
    %c0_i32 = arith.constant 0 : i32
    %c0_i32_0 = arith.constant 0 : i32
    %c0_i32_1 = arith.constant 0 : i32
    return %c0_i32, %c0_i32_0 : i32, i32
  }
  func.func @transform_3(%arg0: i32) -> (i32, i32) {
    %c0_i32 = arith.constant 0 : i32
    %c0_i32_0 = arith.constant 0 : i32
    %c0_i32_1 = arith.constant 0 : i32
    return %c0_i32, %c0_i32_0 : i32, i32
  }
  func.func @transform_4(%arg0: i32) -> (i32, i32) {
    %c0_i32 = arith.constant 0 : i32
    %c0_i32_0 = arith.constant 0 : i32
    %c0_i32_1 = arith.constant 0 : i32
    return %c0_i32, %c0_i32_0 : i32, i32
  }
  func.func @transform_5(%arg0: i32) -> (i32, i32) {
    %c0_i32 = arith.constant 0 : i32
    %c0_i32_0 = arith.constant 0 : i32
    %c0_i32_1 = arith.constant 0 : i32
    return %c0_i32, %c0_i32_0 : i32, i32
  }
}

module attributes {stable_mosaic.version = 11 : i64} {
  func.func @_conv_bn_lrelu_kernel(%arg0: i32, %arg1: memref<32x288xbf16, #tpu.memory_space<vmem>>, %arg2: memref<288x64xbf16, #tpu.memory_space<vmem>>, %arg3: memref<1x64xf32, #tpu.memory_space<vmem>>, %arg4: memref<1x64xf32, #tpu.memory_space<vmem>>, %arg5: memref<1x64xf32, #tpu.memory_space<vmem>>, %arg6: memref<32x64xf32, #tpu.memory_space<vmem>>) attributes {dimension_semantics = [#tpu.dimension_semantics<arbitrary>], iteration_bounds = array<i64: 1>, scalar_prefetch = 0 : i64, scratch_operands = 0 : i64, tpu.core_type = #tpu.core_type<tc>, window_params = [{pipeline_mode = #tpu.pipeline_mode<synchronous>, transform_indices = @transform_0, window_bounds = array<i64: 32, 288>}, {pipeline_mode = #tpu.pipeline_mode<synchronous>, transform_indices = @transform_1, window_bounds = array<i64: 288, 64>}, {pipeline_mode = #tpu.pipeline_mode<synchronous>, transform_indices = @transform_2, window_bounds = array<i64: 1, 64>}, {pipeline_mode = #tpu.pipeline_mode<synchronous>, transform_indices = @transform_3, window_bounds = array<i64: 1, 64>}, {pipeline_mode = #tpu.pipeline_mode<synchronous>, transform_indices = @transform_4, window_bounds = array<i64: 1, 64>}, {pipeline_mode = #tpu.pipeline_mode<synchronous>, transform_indices = @transform_5, window_bounds = array<i64: 32, 64>}]} {
    %c0 = arith.constant 0 : index
    %c0_0 = arith.constant 0 : index
    %0 = vector.load %arg1[%c0, %c0_0] : memref<32x288xbf16, #tpu.memory_space<vmem>>, vector<32x288xbf16>
    %c0_1 = arith.constant 0 : index
    %c0_2 = arith.constant 0 : index
    %1 = vector.load %arg2[%c0_1, %c0_2] : memref<288x64xbf16, #tpu.memory_space<vmem>>, vector<288x64xbf16>
    %cst = arith.constant dense<0.000000e+00> : vector<32x64xf32>
    %2 = tpu.matmul %0, %1, %cst {dimension_numbers = #tpu.dot_dimension_numbers<[1], [0], [0], [1], [0, 0, 1, 1], [], []>} : vector<32x288xbf16>, vector<288x64xbf16>, vector<32x64xf32> -> vector<32x64xf32>
    %c0_3 = arith.constant 0 : index
    %c0_4 = arith.constant 0 : index
    %3 = vector.load %arg3[%c0_3, %c0_4] : memref<1x64xf32, #tpu.memory_space<vmem>>, vector<1x64xf32>
    %4 = vector.broadcast %3 : vector<1x64xf32> to vector<32x64xf32>
    %5 = arith.addf %2, %4 : vector<32x64xf32>
    %cst_5 = arith.constant dense<0.000000e+00> : vector<64xf32>
    %6 = vector.multi_reduction <add>, %5, %cst_5 [0] : vector<32x64xf32> to vector<64xf32>
    %7 = vector.shape_cast %6 : vector<64xf32> to vector<1x64xf32>
    %cst_6 = arith.constant 3.200000e+01 : f32
    %8 = vector.broadcast %cst_6 : f32 to vector<1x64xf32>
    %9 = arith.divf %7, %8 : vector<1x64xf32>
    %10 = vector.broadcast %9 : vector<1x64xf32> to vector<32x64xf32>
    %11 = arith.subf %5, %10 : vector<32x64xf32>
    %12 = arith.mulf %11, %11 : vector<32x64xf32>
    %cst_7 = arith.constant dense<0.000000e+00> : vector<64xf32>
    %13 = vector.multi_reduction <add>, %12, %cst_7 [0] : vector<32x64xf32> to vector<64xf32>
    %14 = vector.shape_cast %13 : vector<64xf32> to vector<1x64xf32>
    %cst_8 = arith.constant 3.200000e+01 : f32
    %15 = vector.broadcast %cst_8 : f32 to vector<1x64xf32>
    %16 = arith.divf %14, %15 : vector<1x64xf32>
    %c0_9 = arith.constant 0 : index
    %c0_10 = arith.constant 0 : index
    %17 = vector.load %arg4[%c0_9, %c0_10] : memref<1x64xf32, #tpu.memory_space<vmem>>, vector<1x64xf32>
    %cst_11 = arith.constant 9.99999974E-6 : f32
    %18 = vector.broadcast %cst_11 : f32 to vector<1x64xf32>
    %19 = arith.addf %16, %18 : vector<1x64xf32>
    %20 = math.rsqrt %19 : vector<1x64xf32>
    %21 = arith.mulf %17, %20 : vector<1x64xf32>
    %c0_12 = arith.constant 0 : index
    %c0_13 = arith.constant 0 : index
    %22 = vector.load %arg5[%c0_12, %c0_13] : memref<1x64xf32, #tpu.memory_space<vmem>>, vector<1x64xf32>
    %23 = arith.mulf %9, %21 : vector<1x64xf32>
    %24 = arith.subf %22, %23 : vector<1x64xf32>
    %25 = vector.broadcast %21 : vector<1x64xf32> to vector<32x64xf32>
    %26 = arith.mulf %5, %25 : vector<32x64xf32>
    %27 = vector.broadcast %24 : vector<1x64xf32> to vector<32x64xf32>
    %28 = arith.addf %26, %27 : vector<32x64xf32>
    %cst_14 = arith.constant 0.000000e+00 : f32
    %29 = vector.broadcast %cst_14 : f32 to vector<32x64xf32>
    %30 = arith.cmpf oge, %28, %29 : vector<32x64xf32>
    %cst_15 = arith.constant 2.000000e-01 : f32
    %31 = vector.broadcast %cst_15 : f32 to vector<32x64xf32>
    %32 = arith.mulf %31, %28 : vector<32x64xf32>
    %33 = arith.select %30, %28, %32 : vector<32x64xi1>, vector<32x64xf32>
    %c0_16 = arith.constant 0 : index
    %c0_17 = arith.constant 0 : index
    %34 = vector.load %arg6[%c0_16, %c0_17] : memref<32x64xf32, #tpu.memory_space<vmem>>, vector<32x64xf32>
    tpu.vector_store %arg6[%c0_16, %c0_17], %33 {strides = array<i32>} : memref<32x64xf32, #tpu.memory_space<vmem>>, vector<32x64xf32>,
    return
  }
  func.func @transform_0(%arg0: i32) -> (i32, i32) {
    %c0_i32 = arith.constant 0 : i32
    %c0_i32_0 = arith.constant 0 : i32
    %c0_i32_1 = arith.constant 0 : i32
    return %c0_i32, %c0_i32_0 : i32, i32
  }
  func.func @transform_1(%arg0: i32) -> (i32, i32) {
    %c0_i32 = arith.constant 0 : i32
    %c0_i32_0 = arith.constant 0 : i32
    %c0_i32_1 = arith.constant 0 : i32
    return %c0_i32, %c0_i32_0 : i32, i32
  }
  func.func @transform_2(%arg0: i32) -> (i32, i32) {
    %c0_i32 = arith.constant 0 : i32
    %c0_i32_0 = arith.constant 0 : i32
    %c0_i32_1 = arith.constant 0 : i32
    return %c0_i32, %c0_i32_0 : i32, i32
  }
  func.func @transform_3(%arg0: i32) -> (i32, i32) {
    %c0_i32 = arith.constant 0 : i32
    %c0_i32_0 = arith.constant 0 : i32
    %c0_i32_1 = arith.constant 0 : i32
    return %c0_i32, %c0_i32_0 : i32, i32
  }
  func.func @transform_4(%arg0: i32) -> (i32, i32) {
    %c0_i32 = arith.constant 0 : i32
    %c0_i32_0 = arith.constant 0 : i32
    %c0_i32_1 = arith.constant 0 : i32
    return %c0_i32, %c0_i32_0 : i32, i32
  }
  func.func @transform_5(%arg0: i32) -> (i32, i32) {
    %c0_i32 = arith.constant 0 : i32
    %c0_i32_0 = arith.constant 0 : i32
    %c0_i32_1 = arith.constant 0 : i32
    return %c0_i32, %c0_i32_0 : i32, i32
  }
}

module attributes {stable_mosaic.version = 11 : i64} {
  func.func @_conv_bn_lrelu_kernel(%arg0: i32, %arg1: memref<32x576xbf16, #tpu.memory_space<vmem>>, %arg2: memref<576x64xbf16, #tpu.memory_space<vmem>>, %arg3: memref<1x64xf32, #tpu.memory_space<vmem>>, %arg4: memref<1x64xf32, #tpu.memory_space<vmem>>, %arg5: memref<1x64xf32, #tpu.memory_space<vmem>>, %arg6: memref<32x64xf32, #tpu.memory_space<vmem>>) attributes {dimension_semantics = [#tpu.dimension_semantics<arbitrary>], iteration_bounds = array<i64: 1>, scalar_prefetch = 0 : i64, scratch_operands = 0 : i64, tpu.core_type = #tpu.core_type<tc>, window_params = [{pipeline_mode = #tpu.pipeline_mode<synchronous>, transform_indices = @transform_0, window_bounds = array<i64: 32, 576>}, {pipeline_mode = #tpu.pipeline_mode<synchronous>, transform_indices = @transform_1, window_bounds = array<i64: 576, 64>}, {pipeline_mode = #tpu.pipeline_mode<synchronous>, transform_indices = @transform_2, window_bounds = array<i64: 1, 64>}, {pipeline_mode = #tpu.pipeline_mode<synchronous>, transform_indices = @transform_3, window_bounds = array<i64: 1, 64>}, {pipeline_mode = #tpu.pipeline_mode<synchronous>, transform_indices = @transform_4, window_bounds = array<i64: 1, 64>}, {pipeline_mode = #tpu.pipeline_mode<synchronous>, transform_indices = @transform_5, window_bounds = array<i64: 32, 64>}]} {
    %c0 = arith.constant 0 : index
    %c0_0 = arith.constant 0 : index
    %0 = vector.load %arg1[%c0, %c0_0] : memref<32x576xbf16, #tpu.memory_space<vmem>>, vector<32x576xbf16>
    %c0_1 = arith.constant 0 : index
    %c0_2 = arith.constant 0 : index
    %1 = vector.load %arg2[%c0_1, %c0_2] : memref<576x64xbf16, #tpu.memory_space<vmem>>, vector<576x64xbf16>
    %cst = arith.constant dense<0.000000e+00> : vector<32x64xf32>
    %2 = tpu.matmul %0, %1, %cst {dimension_numbers = #tpu.dot_dimension_numbers<[1], [0], [0], [1], [0, 0, 1, 1], [], []>} : vector<32x576xbf16>, vector<576x64xbf16>, vector<32x64xf32> -> vector<32x64xf32>
    %c0_3 = arith.constant 0 : index
    %c0_4 = arith.constant 0 : index
    %3 = vector.load %arg3[%c0_3, %c0_4] : memref<1x64xf32, #tpu.memory_space<vmem>>, vector<1x64xf32>
    %4 = vector.broadcast %3 : vector<1x64xf32> to vector<32x64xf32>
    %5 = arith.addf %2, %4 : vector<32x64xf32>
    %cst_5 = arith.constant dense<0.000000e+00> : vector<64xf32>
    %6 = vector.multi_reduction <add>, %5, %cst_5 [0] : vector<32x64xf32> to vector<64xf32>
    %7 = vector.shape_cast %6 : vector<64xf32> to vector<1x64xf32>
    %cst_6 = arith.constant 3.200000e+01 : f32
    %8 = vector.broadcast %cst_6 : f32 to vector<1x64xf32>
    %9 = arith.divf %7, %8 : vector<1x64xf32>
    %10 = vector.broadcast %9 : vector<1x64xf32> to vector<32x64xf32>
    %11 = arith.subf %5, %10 : vector<32x64xf32>
    %12 = arith.mulf %11, %11 : vector<32x64xf32>
    %cst_7 = arith.constant dense<0.000000e+00> : vector<64xf32>
    %13 = vector.multi_reduction <add>, %12, %cst_7 [0] : vector<32x64xf32> to vector<64xf32>
    %14 = vector.shape_cast %13 : vector<64xf32> to vector<1x64xf32>
    %cst_8 = arith.constant 3.200000e+01 : f32
    %15 = vector.broadcast %cst_8 : f32 to vector<1x64xf32>
    %16 = arith.divf %14, %15 : vector<1x64xf32>
    %c0_9 = arith.constant 0 : index
    %c0_10 = arith.constant 0 : index
    %17 = vector.load %arg4[%c0_9, %c0_10] : memref<1x64xf32, #tpu.memory_space<vmem>>, vector<1x64xf32>
    %cst_11 = arith.constant 9.99999974E-6 : f32
    %18 = vector.broadcast %cst_11 : f32 to vector<1x64xf32>
    %19 = arith.addf %16, %18 : vector<1x64xf32>
    %20 = math.rsqrt %19 : vector<1x64xf32>
    %21 = arith.mulf %17, %20 : vector<1x64xf32>
    %c0_12 = arith.constant 0 : index
    %c0_13 = arith.constant 0 : index
    %22 = vector.load %arg5[%c0_12, %c0_13] : memref<1x64xf32, #tpu.memory_space<vmem>>, vector<1x64xf32>
    %23 = arith.mulf %9, %21 : vector<1x64xf32>
    %24 = arith.subf %22, %23 : vector<1x64xf32>
    %25 = vector.broadcast %21 : vector<1x64xf32> to vector<32x64xf32>
    %26 = arith.mulf %5, %25 : vector<32x64xf32>
    %27 = vector.broadcast %24 : vector<1x64xf32> to vector<32x64xf32>
    %28 = arith.addf %26, %27 : vector<32x64xf32>
    %cst_14 = arith.constant 0.000000e+00 : f32
    %29 = vector.broadcast %cst_14 : f32 to vector<32x64xf32>
    %30 = arith.cmpf oge, %28, %29 : vector<32x64xf32>
    %cst_15 = arith.constant 2.000000e-01 : f32
    %31 = vector.broadcast %cst_15 : f32 to vector<32x64xf32>
    %32 = arith.mulf %31, %28 : vector<32x64xf32>
    %33 = arith.select %30, %28, %32 : vector<32x64xi1>, vector<32x64xf32>
    %c0_16 = arith.constant 0 : index
    %c0_17 = arith.constant 0 : index
    %34 = vector.load %arg6[%c0_16, %c0_17] : memref<32x64xf32, #tpu.memory_space<vmem>>, vector<32x64xf32>
    tpu.vector_store %arg6[%c0_16, %c0_17], %33 {strides = array<i32>} : memref<32x64xf32, #tpu.memory_space<vmem>>, vector<32x64xf32>,
    return
  }
  func.func @transform_0(%arg0: i32) -> (i32, i32) {
    %c0_i32 = arith.constant 0 : i32
    %c0_i32_0 = arith.constant 0 : i32
    %c0_i32_1 = arith.constant 0 : i32
    return %c0_i32, %c0_i32_0 : i32, i32
  }
  func.func @transform_1(%arg0: i32) -> (i32, i32) {
    %c0_i32 = arith.constant 0 : i32
    %c0_i32_0 = arith.constant 0 : i32
    %c0_i32_1 = arith.constant 0 : i32
    return %c0_i32, %c0_i32_0 : i32, i32
  }
  func.func @transform_2(%arg0: i32) -> (i32, i32) {
    %c0_i32 = arith.constant 0 : i32
    %c0_i32_0 = arith.constant 0 : i32
    %c0_i32_1 = arith.constant 0 : i32
    return %c0_i32, %c0_i32_0 : i32, i32
  }
  func.func @transform_3(%arg0: i32) -> (i32, i32) {
    %c0_i32 = arith.constant 0 : i32
    %c0_i32_0 = arith.constant 0 : i32
    %c0_i32_1 = arith.constant 0 : i32
    return %c0_i32, %c0_i32_0 : i32, i32
  }
  func.func @transform_4(%arg0: i32) -> (i32, i32) {
    %c0_i32 = arith.constant 0 : i32
    %c0_i32_0 = arith.constant 0 : i32
    %c0_i32_1 = arith.constant 0 : i32
    return %c0_i32, %c0_i32_0 : i32, i32
  }
  func.func @transform_5(%arg0: i32) -> (i32, i32) {
    %c0_i32 = arith.constant 0 : i32
    %c0_i32_0 = arith.constant 0 : i32
    %c0_i32_1 = arith.constant 0 : i32
    return %c0_i32, %c0_i32_0 : i32, i32
  }
}

module attributes {stable_mosaic.version = 11 : i64} {
  func.func @_conv_bn_lrelu_kernel(%arg0: i32, %arg1: memref<8x576xbf16, #tpu.memory_space<vmem>>, %arg2: memref<576x128xbf16, #tpu.memory_space<vmem>>, %arg3: memref<1x128xf32, #tpu.memory_space<vmem>>, %arg4: memref<1x128xf32, #tpu.memory_space<vmem>>, %arg5: memref<1x128xf32, #tpu.memory_space<vmem>>, %arg6: memref<8x128xf32, #tpu.memory_space<vmem>>) attributes {dimension_semantics = [#tpu.dimension_semantics<arbitrary>], iteration_bounds = array<i64: 1>, scalar_prefetch = 0 : i64, scratch_operands = 0 : i64, tpu.core_type = #tpu.core_type<tc>, window_params = [{pipeline_mode = #tpu.pipeline_mode<synchronous>, transform_indices = @transform_0, window_bounds = array<i64: 8, 576>}, {pipeline_mode = #tpu.pipeline_mode<synchronous>, transform_indices = @transform_1, window_bounds = array<i64: 576, 128>}, {pipeline_mode = #tpu.pipeline_mode<synchronous>, transform_indices = @transform_2, window_bounds = array<i64: 1, 128>}, {pipeline_mode = #tpu.pipeline_mode<synchronous>, transform_indices = @transform_3, window_bounds = array<i64: 1, 128>}, {pipeline_mode = #tpu.pipeline_mode<synchronous>, transform_indices = @transform_4, window_bounds = array<i64: 1, 128>}, {pipeline_mode = #tpu.pipeline_mode<synchronous>, transform_indices = @transform_5, window_bounds = array<i64: 8, 128>}]} {
    %c0 = arith.constant 0 : index
    %c0_0 = arith.constant 0 : index
    %0 = vector.load %arg1[%c0, %c0_0] : memref<8x576xbf16, #tpu.memory_space<vmem>>, vector<8x576xbf16>
    %c0_1 = arith.constant 0 : index
    %c0_2 = arith.constant 0 : index
    %1 = vector.load %arg2[%c0_1, %c0_2] : memref<576x128xbf16, #tpu.memory_space<vmem>>, vector<576x128xbf16>
    %cst = arith.constant dense<0.000000e+00> : vector<8x128xf32>
    %2 = tpu.matmul %0, %1, %cst {dimension_numbers = #tpu.dot_dimension_numbers<[1], [0], [0], [1], [0, 0, 1, 1], [], []>} : vector<8x576xbf16>, vector<576x128xbf16>, vector<8x128xf32> -> vector<8x128xf32>
    %c0_3 = arith.constant 0 : index
    %c0_4 = arith.constant 0 : index
    %3 = vector.load %arg3[%c0_3, %c0_4] : memref<1x128xf32, #tpu.memory_space<vmem>>, vector<1x128xf32>
    %4 = vector.broadcast %3 : vector<1x128xf32> to vector<8x128xf32>
    %5 = arith.addf %2, %4 : vector<8x128xf32>
    %cst_5 = arith.constant dense<0.000000e+00> : vector<128xf32>
    %6 = vector.multi_reduction <add>, %5, %cst_5 [0] : vector<8x128xf32> to vector<128xf32>
    %7 = vector.shape_cast %6 : vector<128xf32> to vector<1x128xf32>
    %cst_6 = arith.constant 8.000000e+00 : f32
    %8 = vector.broadcast %cst_6 : f32 to vector<1x128xf32>
    %9 = arith.divf %7, %8 : vector<1x128xf32>
    %10 = vector.broadcast %9 : vector<1x128xf32> to vector<8x128xf32>
    %11 = arith.subf %5, %10 : vector<8x128xf32>
    %12 = arith.mulf %11, %11 : vector<8x128xf32>
    %cst_7 = arith.constant dense<0.000000e+00> : vector<128xf32>
    %13 = vector.multi_reduction <add>, %12, %cst_7 [0] : vector<8x128xf32> to vector<128xf32>
    %14 = vector.shape_cast %13 : vector<128xf32> to vector<1x128xf32>
    %cst_8 = arith.constant 8.000000e+00 : f32
    %15 = vector.broadcast %cst_8 : f32 to vector<1x128xf32>
    %16 = arith.divf %14, %15 : vector<1x128xf32>
    %c0_9 = arith.constant 0 : index
    %c0_10 = arith.constant 0 : index
    %17 = vector.load %arg4[%c0_9, %c0_10] : memref<1x128xf32, #tpu.memory_space<vmem>>, vector<1x128xf32>
    %cst_11 = arith.constant 9.99999974E-6 : f32
    %18 = vector.broadcast %cst_11 : f32 to vector<1x128xf32>
    %19 = arith.addf %16, %18 : vector<1x128xf32>
    %20 = math.rsqrt %19 : vector<1x128xf32>
    %21 = arith.mulf %17, %20 : vector<1x128xf32>
    %c0_12 = arith.constant 0 : index
    %c0_13 = arith.constant 0 : index
    %22 = vector.load %arg5[%c0_12, %c0_13] : memref<1x128xf32, #tpu.memory_space<vmem>>, vector<1x128xf32>
    %23 = arith.mulf %9, %21 : vector<1x128xf32>
    %24 = arith.subf %22, %23 : vector<1x128xf32>
    %25 = vector.broadcast %21 : vector<1x128xf32> to vector<8x128xf32>
    %26 = arith.mulf %5, %25 : vector<8x128xf32>
    %27 = vector.broadcast %24 : vector<1x128xf32> to vector<8x128xf32>
    %28 = arith.addf %26, %27 : vector<8x128xf32>
    %cst_14 = arith.constant 0.000000e+00 : f32
    %29 = vector.broadcast %cst_14 : f32 to vector<8x128xf32>
    %30 = arith.cmpf oge, %28, %29 : vector<8x128xf32>
    %cst_15 = arith.constant 2.000000e-01 : f32
    %31 = vector.broadcast %cst_15 : f32 to vector<8x128xf32>
    %32 = arith.mulf %31, %28 : vector<8x128xf32>
    %33 = arith.select %30, %28, %32 : vector<8x128xi1>, vector<8x128xf32>
    %c0_16 = arith.constant 0 : index
    %c0_17 = arith.constant 0 : index
    %34 = vector.load %arg6[%c0_16, %c0_17] : memref<8x128xf32, #tpu.memory_space<vmem>>, vector<8x128xf32>
    tpu.vector_store %arg6[%c0_16, %c0_17], %33 {strides = array<i32>} : memref<8x128xf32, #tpu.memory_space<vmem>>, vector<8x128xf32>,
    return
  }
  func.func @transform_0(%arg0: i32) -> (i32, i32) {
    %c0_i32 = arith.constant 0 : i32
    %c0_i32_0 = arith.constant 0 : i32
    %c0_i32_1 = arith.constant 0 : i32
    return %c0_i32, %c0_i32_0 : i32, i32
  }
  func.func @transform_1(%arg0: i32) -> (i32, i32) {
    %c0_i32 = arith.constant 0 : i32
    %c0_i32_0 = arith.constant 0 : i32
    %c0_i32_1 = arith.constant 0 : i32
    return %c0_i32, %c0_i32_0 : i32, i32
  }
  func.func @transform_2(%arg0: i32) -> (i32, i32) {
    %c0_i32 = arith.constant 0 : i32
    %c0_i32_0 = arith.constant 0 : i32
    %c0_i32_1 = arith.constant 0 : i32
    return %c0_i32, %c0_i32_0 : i32, i32
  }
  func.func @transform_3(%arg0: i32) -> (i32, i32) {
    %c0_i32 = arith.constant 0 : i32
    %c0_i32_0 = arith.constant 0 : i32
    %c0_i32_1 = arith.constant 0 : i32
    return %c0_i32, %c0_i32_0 : i32, i32
  }
  func.func @transform_4(%arg0: i32) -> (i32, i32) {
    %c0_i32 = arith.constant 0 : i32
    %c0_i32_0 = arith.constant 0 : i32
    %c0_i32_1 = arith.constant 0 : i32
    return %c0_i32, %c0_i32_0 : i32, i32
  }
  func.func @transform_5(%arg0: i32) -> (i32, i32) {
    %c0_i32 = arith.constant 0 : i32
    %c0_i32_0 = arith.constant 0 : i32
    %c0_i32_1 = arith.constant 0 : i32
    return %c0_i32, %c0_i32_0 : i32, i32
  }
}

module attributes {stable_mosaic.version = 11 : i64} {
  func.func @_conv_bn_lrelu_kernel(%arg0: i32, %arg1: memref<8x1152xbf16, #tpu.memory_space<vmem>>, %arg2: memref<1152x128xbf16, #tpu.memory_space<vmem>>, %arg3: memref<1x128xf32, #tpu.memory_space<vmem>>, %arg4: memref<1x128xf32, #tpu.memory_space<vmem>>, %arg5: memref<1x128xf32, #tpu.memory_space<vmem>>, %arg6: memref<8x128xf32, #tpu.memory_space<vmem>>) attributes {dimension_semantics = [#tpu.dimension_semantics<arbitrary>], iteration_bounds = array<i64: 1>, scalar_prefetch = 0 : i64, scratch_operands = 0 : i64, tpu.core_type = #tpu.core_type<tc>, window_params = [{pipeline_mode = #tpu.pipeline_mode<synchronous>, transform_indices = @transform_0, window_bounds = array<i64: 8, 1152>}, {pipeline_mode = #tpu.pipeline_mode<synchronous>, transform_indices = @transform_1, window_bounds = array<i64: 1152, 128>}, {pipeline_mode = #tpu.pipeline_mode<synchronous>, transform_indices = @transform_2, window_bounds = array<i64: 1, 128>}, {pipeline_mode = #tpu.pipeline_mode<synchronous>, transform_indices = @transform_3, window_bounds = array<i64: 1, 128>}, {pipeline_mode = #tpu.pipeline_mode<synchronous>, transform_indices = @transform_4, window_bounds = array<i64: 1, 128>}, {pipeline_mode = #tpu.pipeline_mode<synchronous>, transform_indices = @transform_5, window_bounds = array<i64: 8, 128>}]} {
    %c0 = arith.constant 0 : index
    %c0_0 = arith.constant 0 : index
    %0 = vector.load %arg1[%c0, %c0_0] : memref<8x1152xbf16, #tpu.memory_space<vmem>>, vector<8x1152xbf16>
    %c0_1 = arith.constant 0 : index
    %c0_2 = arith.constant 0 : index
    %1 = vector.load %arg2[%c0_1, %c0_2] : memref<1152x128xbf16, #tpu.memory_space<vmem>>, vector<1152x128xbf16>
    %cst = arith.constant dense<0.000000e+00> : vector<8x128xf32>
    %2 = tpu.matmul %0, %1, %cst {dimension_numbers = #tpu.dot_dimension_numbers<[1], [0], [0], [1], [0, 0, 1, 1], [], []>} : vector<8x1152xbf16>, vector<1152x128xbf16>, vector<8x128xf32> -> vector<8x128xf32>
    %c0_3 = arith.constant 0 : index
    %c0_4 = arith.constant 0 : index
    %3 = vector.load %arg3[%c0_3, %c0_4] : memref<1x128xf32, #tpu.memory_space<vmem>>, vector<1x128xf32>
    %4 = vector.broadcast %3 : vector<1x128xf32> to vector<8x128xf32>
    %5 = arith.addf %2, %4 : vector<8x128xf32>
    %cst_5 = arith.constant dense<0.000000e+00> : vector<128xf32>
    %6 = vector.multi_reduction <add>, %5, %cst_5 [0] : vector<8x128xf32> to vector<128xf32>
    %7 = vector.shape_cast %6 : vector<128xf32> to vector<1x128xf32>
    %cst_6 = arith.constant 8.000000e+00 : f32
    %8 = vector.broadcast %cst_6 : f32 to vector<1x128xf32>
    %9 = arith.divf %7, %8 : vector<1x128xf32>
    %10 = vector.broadcast %9 : vector<1x128xf32> to vector<8x128xf32>
    %11 = arith.subf %5, %10 : vector<8x128xf32>
    %12 = arith.mulf %11, %11 : vector<8x128xf32>
    %cst_7 = arith.constant dense<0.000000e+00> : vector<128xf32>
    %13 = vector.multi_reduction <add>, %12, %cst_7 [0] : vector<8x128xf32> to vector<128xf32>
    %14 = vector.shape_cast %13 : vector<128xf32> to vector<1x128xf32>
    %cst_8 = arith.constant 8.000000e+00 : f32
    %15 = vector.broadcast %cst_8 : f32 to vector<1x128xf32>
    %16 = arith.divf %14, %15 : vector<1x128xf32>
    %c0_9 = arith.constant 0 : index
    %c0_10 = arith.constant 0 : index
    %17 = vector.load %arg4[%c0_9, %c0_10] : memref<1x128xf32, #tpu.memory_space<vmem>>, vector<1x128xf32>
    %cst_11 = arith.constant 9.99999974E-6 : f32
    %18 = vector.broadcast %cst_11 : f32 to vector<1x128xf32>
    %19 = arith.addf %16, %18 : vector<1x128xf32>
    %20 = math.rsqrt %19 : vector<1x128xf32>
    %21 = arith.mulf %17, %20 : vector<1x128xf32>
    %c0_12 = arith.constant 0 : index
    %c0_13 = arith.constant 0 : index
    %22 = vector.load %arg5[%c0_12, %c0_13] : memref<1x128xf32, #tpu.memory_space<vmem>>, vector<1x128xf32>
    %23 = arith.mulf %9, %21 : vector<1x128xf32>
    %24 = arith.subf %22, %23 : vector<1x128xf32>
    %25 = vector.broadcast %21 : vector<1x128xf32> to vector<8x128xf32>
    %26 = arith.mulf %5, %25 : vector<8x128xf32>
    %27 = vector.broadcast %24 : vector<1x128xf32> to vector<8x128xf32>
    %28 = arith.addf %26, %27 : vector<8x128xf32>
    %cst_14 = arith.constant 0.000000e+00 : f32
    %29 = vector.broadcast %cst_14 : f32 to vector<8x128xf32>
    %30 = arith.cmpf oge, %28, %29 : vector<8x128xf32>
    %cst_15 = arith.constant 2.000000e-01 : f32
    %31 = vector.broadcast %cst_15 : f32 to vector<8x128xf32>
    %32 = arith.mulf %31, %28 : vector<8x128xf32>
    %33 = arith.select %30, %28, %32 : vector<8x128xi1>, vector<8x128xf32>
    %c0_16 = arith.constant 0 : index
    %c0_17 = arith.constant 0 : index
    %34 = vector.load %arg6[%c0_16, %c0_17] : memref<8x128xf32, #tpu.memory_space<vmem>>, vector<8x128xf32>
    tpu.vector_store %arg6[%c0_16, %c0_17], %33 {strides = array<i32>} : memref<8x128xf32, #tpu.memory_space<vmem>>, vector<8x128xf32>,
    return
  }
  func.func @transform_0(%arg0: i32) -> (i32, i32) {
    %c0_i32 = arith.constant 0 : i32
    %c0_i32_0 = arith.constant 0 : i32
    %c0_i32_1 = arith.constant 0 : i32
    return %c0_i32, %c0_i32_0 : i32, i32
  }
  func.func @transform_1(%arg0: i32) -> (i32, i32) {
    %c0_i32 = arith.constant 0 : i32
    %c0_i32_0 = arith.constant 0 : i32
    %c0_i32_1 = arith.constant 0 : i32
    return %c0_i32, %c0_i32_0 : i32, i32
  }
  func.func @transform_2(%arg0: i32) -> (i32, i32) {
    %c0_i32 = arith.constant 0 : i32
    %c0_i32_0 = arith.constant 0 : i32
    %c0_i32_1 = arith.constant 0 : i32
    return %c0_i32, %c0_i32_0 : i32, i32
  }
  func.func @transform_3(%arg0: i32) -> (i32, i32) {
    %c0_i32 = arith.constant 0 : i32
    %c0_i32_0 = arith.constant 0 : i32
    %c0_i32_1 = arith.constant 0 : i32
    return %c0_i32, %c0_i32_0 : i32, i32
  }
  func.func @transform_4(%arg0: i32) -> (i32, i32) {
    %c0_i32 = arith.constant 0 : i32
    %c0_i32_0 = arith.constant 0 : i32
    %c0_i32_1 = arith.constant 0 : i32
    return %c0_i32, %c0_i32_0 : i32, i32
  }
  func.func @transform_5(%arg0: i32) -> (i32, i32) {
    %c0_i32 = arith.constant 0 : i32
    %c0_i32_0 = arith.constant 0 : i32
    %c0_i32_1 = arith.constant 0 : i32
    return %c0_i32, %c0_i32_0 : i32, i32
  }
}

module attributes {stable_mosaic.version = 11 : i64} {
  func.func @_tail_kernel(%arg0: i32, %arg1: memref<8x1152xbf16, #tpu.memory_space<vmem>>, %arg2: memref<1152x256xbf16, #tpu.memory_space<vmem>>, %arg3: memref<1x256xf32, #tpu.memory_space<vmem>>, %arg4: memref<2x8xf32, #tpu.memory_space<vmem>>, %arg5: memref<256x256xf32, #tpu.memory_space<vmem>>, %arg6: memref<1x256xf32, #tpu.memory_space<vmem>>, %arg7: memref<8x256xf32, #tpu.memory_space<vmem>>, %arg8: memref<2x256xf32, #tpu.memory_space<vmem>>, %arg9: memref<2x256xf32, #tpu.memory_space<vmem>>) attributes {dimension_semantics = [#tpu.dimension_semantics<arbitrary>], iteration_bounds = array<i64: 1>, scalar_prefetch = 0 : i64, scratch_operands = 0 : i64, tpu.core_type = #tpu.core_type<tc>, window_params = [{pipeline_mode = #tpu.pipeline_mode<synchronous>, transform_indices = @transform_0, window_bounds = array<i64: 8, 1152>}, {pipeline_mode = #tpu.pipeline_mode<synchronous>, transform_indices = @transform_1, window_bounds = array<i64: 1152, 256>}, {pipeline_mode = #tpu.pipeline_mode<synchronous>, transform_indices = @transform_2, window_bounds = array<i64: 1, 256>}, {pipeline_mode = #tpu.pipeline_mode<synchronous>, transform_indices = @transform_3, window_bounds = array<i64: 2, 8>}, {pipeline_mode = #tpu.pipeline_mode<synchronous>, transform_indices = @transform_4, window_bounds = array<i64: 256, 256>}, {pipeline_mode = #tpu.pipeline_mode<synchronous>, transform_indices = @transform_5, window_bounds = array<i64: 1, 256>}, {pipeline_mode = #tpu.pipeline_mode<synchronous>, transform_indices = @transform_6, window_bounds = array<i64: 8, 256>}, {pipeline_mode = #tpu.pipeline_mode<synchronous>, transform_indices = @transform_7, window_bounds = array<i64: 2, 256>}, {pipeline_mode = #tpu.pipeline_mode<synchronous>, transform_indices = @transform_8, window_bounds = array<i64: 2, 256>}]} {
    %c0 = arith.constant 0 : index
    %c0_0 = arith.constant 0 : index
    %0 = vector.load %arg1[%c0, %c0_0] : memref<8x1152xbf16, #tpu.memory_space<vmem>>, vector<8x1152xbf16>
    %c0_1 = arith.constant 0 : index
    %c0_2 = arith.constant 0 : index
    %1 = vector.load %arg2[%c0_1, %c0_2] : memref<1152x256xbf16, #tpu.memory_space<vmem>>, vector<1152x256xbf16>
    %cst = arith.constant dense<0.000000e+00> : vector<8x256xf32>
    %2 = tpu.matmul %0, %1, %cst {dimension_numbers = #tpu.dot_dimension_numbers<[1], [0], [0], [1], [0, 0, 1, 1], [], []>} : vector<8x1152xbf16>, vector<1152x256xbf16>, vector<8x256xf32> -> vector<8x256xf32>
    %c0_3 = arith.constant 0 : index
    %c0_4 = arith.constant 0 : index
    %3 = vector.load %arg3[%c0_3, %c0_4] : memref<1x256xf32, #tpu.memory_space<vmem>>, vector<1x256xf32>
    %4 = vector.broadcast %3 : vector<1x256xf32> to vector<8x256xf32>
    %5 = arith.addf %2, %4 : vector<8x256xf32>
    %c0_5 = arith.constant 0 : index
    %c0_6 = arith.constant 0 : index
    %6 = vector.load %arg7[%c0_5, %c0_6] : memref<8x256xf32, #tpu.memory_space<vmem>>, vector<8x256xf32>
    tpu.vector_store %arg7[%c0_5, %c0_6], %5 {strides = array<i32>} : memref<8x256xf32, #tpu.memory_space<vmem>>, vector<8x256xf32>,
    %c0_7 = arith.constant 0 : index
    %c0_8 = arith.constant 0 : index
    %7 = vector.load %arg4[%c0_7, %c0_8] : memref<2x8xf32, #tpu.memory_space<vmem>>, vector<2x8xf32>
    %cst_9 = arith.constant dense<0.000000e+00> : vector<2x256xf32>
    %8 = tpu.matmul %7, %5, %cst_9 {dimension_numbers = #tpu.dot_dimension_numbers<[1], [0], [0], [1], [0, 0, 1, 1], [], []>} : vector<2x8xf32>, vector<8x256xf32>, vector<2x256xf32> -> vector<2x256xf32>
    %c0_10 = arith.constant 0 : index
    %c0_11 = arith.constant 0 : index
    %9 = vector.load %arg8[%c0_10, %c0_11] : memref<2x256xf32, #tpu.memory_space<vmem>>, vector<2x256xf32>
    tpu.vector_store %arg8[%c0_10, %c0_11], %8 {strides = array<i32>} : memref<2x256xf32, #tpu.memory_space<vmem>>, vector<2x256xf32>,
    %c0_12 = arith.constant 0 : index
    %c0_13 = arith.constant 0 : index
    %10 = vector.load %arg5[%c0_12, %c0_13] : memref<256x256xf32, #tpu.memory_space<vmem>>, vector<256x256xf32>
    %cst_14 = arith.constant dense<0.000000e+00> : vector<2x256xf32>
    %11 = tpu.matmul %8, %10, %cst_14 {dimension_numbers = #tpu.dot_dimension_numbers<[1], [0], [0], [1], [0, 0, 1, 1], [], []>} : vector<2x256xf32>, vector<256x256xf32>, vector<2x256xf32> -> vector<2x256xf32>
    %c0_15 = arith.constant 0 : index
    %c0_16 = arith.constant 0 : index
    %12 = vector.load %arg6[%c0_15, %c0_16] : memref<1x256xf32, #tpu.memory_space<vmem>>, vector<1x256xf32>
    %13 = vector.broadcast %12 : vector<1x256xf32> to vector<2x256xf32>
    %14 = arith.addf %11, %13 : vector<2x256xf32>
    %c0_17 = arith.constant 0 : index
    %c0_18 = arith.constant 0 : index
    %15 = vector.load %arg9[%c0_17, %c0_18] : memref<2x256xf32, #tpu.memory_space<vmem>>, vector<2x256xf32>
    tpu.vector_store %arg9[%c0_17, %c0_18], %14 {strides = array<i32>} : memref<2x256xf32, #tpu.memory_space<vmem>>, vector<2x256xf32>,
    return
  }
  func.func @transform_0(%arg0: i32) -> (i32, i32) {
    %c0_i32 = arith.constant 0 : i32
    %c0_i32_0 = arith.constant 0 : i32
    %c0_i32_1 = arith.constant 0 : i32
    return %c0_i32, %c0_i32_0 : i32, i32
  }
  func.func @transform_1(%arg0: i32) -> (i32, i32) {
    %c0_i32 = arith.constant 0 : i32
    %c0_i32_0 = arith.constant 0 : i32
    %c0_i32_1 = arith.constant 0 : i32
    return %c0_i32, %c0_i32_0 : i32, i32
  }
  func.func @transform_2(%arg0: i32) -> (i32, i32) {
    %c0_i32 = arith.constant 0 : i32
    %c0_i32_0 = arith.constant 0 : i32
    %c0_i32_1 = arith.constant 0 : i32
    return %c0_i32, %c0_i32_0 : i32, i32
  }
  func.func @transform_3(%arg0: i32) -> (i32, i32) {
    %c0_i32 = arith.constant 0 : i32
    %c0_i32_0 = arith.constant 0 : i32
    %c0_i32_1 = arith.constant 0 : i32
    return %c0_i32, %c0_i32_0 : i32, i32
  }
  func.func @transform_4(%arg0: i32) -> (i32, i32) {
    %c0_i32 = arith.constant 0 : i32
    %c0_i32_0 = arith.constant 0 : i32
    %c0_i32_1 = arith.constant 0 : i32
    return %c0_i32, %c0_i32_0 : i32, i32
  }
  func.func @transform_5(%arg0: i32) -> (i32, i32) {
    %c0_i32 = arith.constant 0 : i32
    %c0_i32_0 = arith.constant 0 : i32
    %c0_i32_1 = arith.constant 0 : i32
    return %c0_i32, %c0_i32_0 : i32, i32
  }
  func.func @transform_6(%arg0: i32) -> (i32, i32) {
    %c0_i32 = arith.constant 0 : i32
    %c0_i32_0 = arith.constant 0 : i32
    %c0_i32_1 = arith.constant 0 : i32
    return %c0_i32, %c0_i32_0 : i32, i32
  }
  func.func @transform_7(%arg0: i32) -> (i32, i32) {
    %c0_i32 = arith.constant 0 : i32
    %c0_i32_0 = arith.constant 0 : i32
    %c0_i32_1 = arith.constant 0 : i32
    return %c0_i32, %c0_i32_0 : i32, i32
  }
  func.func @transform_8(%arg0: i32) -> (i32, i32) {
    %c0_i32 = arith.constant 0 : i32
    %c0_i32_0 = arith.constant 0 : i32
    %c0_i32_1 = arith.constant 0 : i32
    return %c0_i32, %c0_i32_0 : i32, i32
  }
}

</mosaic_0001>

<bundles_post_ra>
// kernel: convnet_aae_forward.8
= control target key start
LH: loop header
LB: loop body
LE: loop exit
PB: predicated region body
PF: predicated region fallthrough
CT: control target
= control target key end

     0   :  { %vm364_vm0 = vcmask 1044480   ;;  %vm365_vm1 = vcmask 1045504   ;;  %vm267_vm2 = vcmask 220160   ;;  %v1675_v1 = vmov 65535   ;;  %s3716_s1 = inlined_call_operand.vmem [shape: bf16[27,16], index: 1, kind: input, shape index: {}]   ;;  %s3717_s0 = inlined_call_operand.vmem [shape: bf16[512,27], index: 0, kind: input, shape index: {}]   ;;  %s3718_s2 = inlined_call_operand.vmem [shape: f32[1,16], index: 2, kind: input, shape index: {}]   ;;  %s3719_s3 = inlined_call_operand.vmem [shape: f32[1,16], index: 3, kind: input, shape index: {}]   ;;  %s3720_s4 = inlined_call_operand.vmem [shape: f32[1,16], index: 4, kind: input, shape index: {}]   ;;  %s3721_s5 = inlined_call_operand.vmem [shape: f32[512,16], index: 5, kind: output, shape index: {}]  }
   0x1   :  { %v1639_v0 = vld [vmem:[%s3716_s1] sm:$0xff]   ;;  %v366_v2 = vsel %vm364_vm0, 4294967295, %v1675_v1  ;;  %v1640_v3 = vld [vmem:[%s3716_s1 + $0x8] sm:$0x3f]   ;;  %v1643_v8 = vld [vmem:[%s3717_s0 + $0x10] sm:$0xff]   ;;  %vm660_vm3 = vcmask 130048  }
   0x2   :  { %1566 = vmatprep.subr.bf16.mxu0 %v1639_v0  ;;  %v367_v4 = vsel %vm365_vm1, %v366_v2, 0  ;;  %v1641_v5 = vld [vmem:[%s3717_s0] sm:$0xff]   ;;  %1634 = vmatprep.subr.bf16.mxu1 %v1639_v0  ;;  %v1642_v7 = vld [vmem:[%s3717_s0 + $0x8] sm:$0xff]   ;;  %v1644_v9 = vld [vmem:[%s3717_s0 + $0x18] sm:$0xff]  }
   0x3   :  { %1567 = vmatpush3.bf16.msra.mxu0 %v1639_v0  ;;  %v369_v6 = vand.u32 %v1640_v3, %v367_v4  ;;  %1636 = vmatpush3.bf16.msra.mxu1 %v1639_v0  ;;  %v1645_v10 = vld [vmem:[%s3717_s0 + $0x20] sm:$0xff]   ;;  %v1658_v12 = vld [vmem:[%s3717_s0 + $0x88] sm:$0xff]   ;;  %v1659_v13 = vld [vmem:[%s3717_s0 + $0x90] sm:$0xff]  }
   0x4   :  { %1570 = vmatprep.mubr.msk.bf16.mxu0 %vm267_vm2, %v1641_v5  ;;  %v1657_v11 = vld [vmem:[%s3717_s0 + $0x80] sm:$0xff]   ;;  %v1646_v14 = vld [vmem:[%s3717_s0 + $0x28] sm:$0xff]   ;;  %v1647_v15 = vld [vmem:[%s3717_s0 + $0x30] sm:$0xff]  }
   0x5   :  { %1568 = vmatprep.subr.bf16.mxu0 %v369_v6  ;;  %1635 = vmatprep.subr.bf16.mxu1 %v369_v6  ;;  %v1660_v16 = vld [vmem:[%s3717_s0 + $0x98] sm:$0xff]   ;;  %v1661_v17 = vld [vmem:[%s3717_s0 + $0xa0] sm:$0xff]   ;;  %v1662_v20 = vld [vmem:[%s3717_s0 + $0xa8] sm:$0xff]  }
   0x6   :  { %1602 = vmatprep.mubr.msk.bf16.mxu1 %vm267_vm2, %v1657_v11  ;;  %v1648_v18 = vld [vmem:[%s3717_s0 + $0x38] sm:$0xff]   ;;  %v1649_v19 = vld [vmem:[%s3717_s0 + $0x40] sm:$0xff]   ;;  %v1663_v21 = vld [vmem:[%s3717_s0 + $0xb0] sm:$0xff]  }
   0x7   :  { %1569 = vmatpush3.bf16.msra.mxu0 %v369_v6  ;;  %1637 = vmatpush3.bf16.msra.mxu1 %v369_v6  ;;  %v1650_v22 = vld [vmem:[%s3717_s0 + $0x48] sm:$0xff]   ;;  %v1651_v23 = vld [vmem:[%s3717_s0 + $0x50] sm:$0xff]   ;;  %v1664_v24 = vld [vmem:[%s3717_s0 + $0xb8] sm:$0xff]  }
   0x8   :  { %v1665_v25 = vld [vmem:[%s3717_s0 + $0xc0] sm:$0xff]   ;;  %v1652_v26 = vld [vmem:[%s3717_s0 + $0x58] sm:$0xff]   ;;  %v1666_v28 = vld [vmem:[%s3717_s0 + $0xc8] sm:$0xff]  }
   0x9   :  { %v1653_v27 = vld [vmem:[%s3717_s0 + $0x60] sm:$0xff]   ;;  %v1667_v29 = vld [vmem:[%s3717_s0 + $0xd0] sm:$0xff]   ;;  %v1654_v30 = vld [vmem:[%s3717_s0 + $0x68] sm:$0xff]  }
   0xa   :  { %1571 = vmatmul.mubr.msk.bf16.vlgmr.msra.gmra.mrb[0].mxu0 %vm267_vm2, %v1642_v7  ;;  %1603 = vmatmul.mubr.msk.bf16.vlgmr.msra.gmra.mrb[0].mxu1 %vm267_vm2, %v1658_v12  ;;  %v1655_v31 = vld [vmem:[%s3717_s0 + $0x70] sm:$0xff]   ;;  %v1668_v32 = vld [vmem:[%s3717_s0 + $0xd8] sm:$0xff]   ;;  %v1669_v33 = vld [vmem:[%s3717_s0 + $0xe0] sm:$0xff]  }
   0xb   :  { %1574 = vmatprep.mubr.msk.bf16.mxu0 %vm267_vm2, %v1643_v8  ;;  %1606 = vmatprep.mubr.msk.bf16.mxu1 %vm267_vm2, %v1659_v13  ;;  %v1656_v34 = vld [vmem:[%s3717_s0 + $0x78] sm:$0xff]   ;;  %v1670_v35 = vld [vmem:[%s3717_s0 + $0xe8] sm:$0xff]   ;;  %v1671_v36 = vld [vmem:[%s3717_s0 + $0xf0] sm:$0xff]  }
   0xc   :  { %v1672_v37 = vld [vmem:[%s3717_s0 + $0xf8] sm:$0xff]   ;;  %v1843_v38 = vld [vmem:[%s3718_s2] ss:$0 sm:$0xff] }
  0x12   :  { %1575 = vmatmul.mubr.msk.bf16.gmra.mrb[4].mxu0 %vm267_vm2, %v1644_v9  ;;  %1607 = vmatmul.mubr.msk.bf16.gmra.mrb[4].mxu1 %vm267_vm2, %v1660_v16 }
  0x13   :  { %1578 = vmatprep.mubr.msk.bf16.mxu0 %vm267_vm2, %v1645_v10  ;;  %1610 = vmatprep.mubr.msk.bf16.mxu1 %vm267_vm2, %v1661_v17 }
  0x1a   :  { %1579 = vmatmul.mubr.msk.bf16.gmra.mrb[8].mxu0 %vm267_vm2, %v1646_v14  ;;  %1611 = vmatmul.mubr.msk.bf16.gmra.mrb[8].mxu1 %vm267_vm2, %v1662_v20 }
  0x1b   :  { %1582 = vmatprep.mubr.msk.bf16.mxu0 %vm267_vm2, %v1647_v15  ;;  %1614 = vmatprep.mubr.msk.bf16.mxu1 %vm267_vm2, %v1663_v21 }
  0x22   :  { %1583 = vmatmul.mubr.msk.bf16.gmra.mrb[12].mxu0 %vm267_vm2, %v1648_v18  ;;  %1615 = vmatmul.mubr.msk.bf16.gmra.mrb[12].mxu1 %vm267_vm2, %v1664_v24 }
  0x23   :  { %1586 = vmatprep.mubr.msk.bf16.mxu0 %vm267_vm2, %v1649_v19  ;;  %1618 = vmatprep.mubr.msk.bf16.mxu1 %vm267_vm2, %v1665_v25 }
  0x2a   :  { %1587 = vmatmul.mubr.msk.bf16.gmra.mrb[16].mxu0 %vm267_vm2, %v1650_v22  ;;  %1619 = vmatmul.mubr.msk.bf16.gmra.mrb[16].mxu1 %vm267_vm2, %v1666_v28 }
  0x2b   :  { %1590 = vmatprep.mubr.msk.bf16.mxu0 %vm267_vm2, %v1651_v23  ;;  %1622 = vmatprep.mubr.msk.bf16.mxu1 %vm267_vm2, %v1667_v29 }
  0x32   :  { %1591 = vmatmul.mubr.msk.bf16.gmra.mrb[20].mxu0 %vm267_vm2, %v1652_v26  ;;  %1623 = vmatmul.mubr.msk.bf16.gmra.mrb[20].mxu1 %vm267_vm2, %v1668_v32 }
  0x33   :  { %1594 = vmatprep.mubr.msk.bf16.mxu0 %vm267_vm2, %v1653_v27  ;;  %1626 = vmatprep.mubr.msk.bf16.mxu1 %vm267_vm2, %v1669_v33 }
  0x3a   :  { %1595 = vmatmul.mubr.msk.bf16.gmra.mrb[24].mxu0 %vm267_vm2, %v1654_v30  ;;  %1627 = vmatmul.mubr.msk.bf16.gmra.mrb[24].mxu1 %vm267_vm2, %v1670_v35 }
  0x3b   :  { %1598 = vmatprep.mubr.msk.bf16.mxu0 %vm267_vm2, %v1655_v31  ;;  %1630 = vmatprep.mubr.msk.bf16.mxu1 %vm267_vm2, %v1671_v36 }
  0x42   :  { %1599 = vmatmul.mubr.msk.bf16.gmra.mrb[28].mxu0 %vm267_vm2, %v1656_v34  ;;  %1631 = vmatmul.mubr.msk.bf16.gmra.mrb[28].mxu1 %vm267_vm2, %v1672_v37 }
  0xdd   :  { %v1572_v39 = vpop.f32.mrb[0].mxu0  ;;  %v1868_v59 = vpop.f32.mrb[0].mxu1 }
  0xde   :  { %v405_v40 = vpop.f32.mrb[1].mxu0  ;;  %v1849_v44 = vadd.f32 %v1572_v39, %v1843_v38  ;;  %v1878_v63 = vpop.f32.mrb[1].mxu1 }
  0xdf   :  { %v1846_v41 = vadd.f32 %v1843_v38, %v405_v40  ;;  %v1573_v42 = vpop.f32.mrb[2].mxu0  ;;  %v1880_v1 = vpop.f32.mrb[2].mxu1 }
  0xe0   :  { %v408_v43 = vpop.f32.mrb[3].mxu0  ;;  %v1857_v47 = vadd.f32 %v1573_v42, %v1843_v38  ;;  %v664_v50 = vsel %vm660_vm3, %v1849_v44, 0.0  ;;  %v1887_v4 = vpop.f32.mrb[3].mxu1 }
  0xe1   :  { %v1852_v45 = vadd.f32 %v1843_v38, %v408_v43  ;;  %v661_v46 = vsel %vm660_vm3, %v1846_v41, 0.0 }
  0xe2   :  { %3787 = vst [vmem:[#allocation2_spill] sm:$0xff] %v1857_v47  ;;  %v666_v54 = vsel %vm660_vm3, %v1857_v47, 0.0 }
  0xe3   :  { %v662_v48 = vsel %vm660_vm3, %v1852_v45, 0.0 }
  0xe4   :  { %v663_v49 = vadd.f32 %v662_v48, %v661_v46 }
  0xe5   :  { %v1576_v51 = vpop.f32.mrb[4].mxu0  ;;  %v1896_v15 = vpop.f32.mrb[4].mxu1 }
  0xe6   :  { %v665_v52 = vadd.f32 %v664_v50, %v663_v49  ;;  %v421_v53 = vpop.f32.mrb[5].mxu0  ;;  %v1871_v60 = vadd.f32 %v1576_v51, %v1843_v38  ;;  %v1906_v19 = vpop.f32.mrb[5].mxu1 }
  0xe7   :  { %v1866_v55 = vadd.f32 %v1843_v38, %v421_v53  ;;  %v1577_v56 = vpop.f32.mrb[6].mxu0  ;;  %v1908_v21 = vpop.f32.mrb[6].mxu1 }
  0xe8   :  { %v667_v57 = vadd.f32 %v666_v54, %v665_v52  ;;  %v424_v58 = vpop.f32.mrb[7].mxu0  ;;  %v1883_v2 = vadd.f32 %v1577_v56, %v1843_v38  ;;  %v672_v6 = vsel %vm660_vm3, %v1871_v60, 0.0  ;;  %v1915_v24 = vpop.f32.mrb[7].mxu1 }
  0xe9   :  { %3788 = vst [vmem:[#allocation3_spill] sm:$0xff] %v1866_v55  ;;  %v668_v61 = vsel %vm660_vm3, %v1866_v55, 0.0  ;;  %v1876_v62 = vadd.f32 %v1843_v38, %v424_v58 }
  0xea   :  { %v669_v0 = vadd.f32 %v668_v61, %v667_v57  ;;  %v674_v10 = vsel %vm660_vm3, %v1883_v2, 0.0 }
  0xeb   :  { %3789 = vst [vmem:[#allocation4_spill] sm:$0xff] %v1876_v62  ;;  %v670_v3 = vsel %vm660_vm3, %v1876_v62, 0.0 }
  0xec   :  { %v671_v5 = vadd.f32 %v670_v3, %v669_v0 }
  0xed   :  { %v1580_v7 = vpop.f32.mrb[8].mxu0  ;;  %v1924_v35 = vpop.f32.mrb[8].mxu1 }
  0xee   :  { %v673_v8 = vadd.f32 %v672_v6, %v671_v5  ;;  %v437_v9 = vpop.f32.mrb[9].mxu0  ;;  %v1899_v16 = vadd.f32 %v1580_v7, %v1843_v38  ;;  %v1934_v40 = vpop.f32.mrb[9].mxu1 }
  0xef   :  { %v1894_v11 = vadd.f32 %v1843_v38, %v437_v9  ;;  %v1581_v12 = vpop.f32.mrb[10].mxu0  ;;  %v1936_v43 = vpop.f32.mrb[10].mxu1 }
  0xf0   :  { %v675_v13 = vadd.f32 %v674_v10, %v673_v8  ;;  %v440_v14 = vpop.f32.mrb[11].mxu0  ;;  %v1911_v22 = vadd.f32 %v1581_v12, %v1843_v38  ;;  %v680_v26 = vsel %vm660_vm3, %v1899_v16, 0.0  ;;  %v1943_v49 = vpop.f32.mrb[11].mxu1 }
  0xf1   :  { %v676_v17 = vsel %vm660_vm3, %v1894_v11, 0.0  ;;  %v1904_v18 = vadd.f32 %v1843_v38, %v440_v14 }
  0xf2   :  { %v677_v20 = vadd.f32 %v676_v17, %v675_v13  ;;  %v682_v30 = vsel %vm660_vm3, %v1911_v22, 0.0 }
  0xf3   :  { %v678_v23 = vsel %vm660_vm3, %v1904_v18, 0.0 }
  0xf4   :  { %v679_v25 = vadd.f32 %v678_v23, %v677_v20 }
  0xf5   :  { %v1584_v27 = vpop.f32.mrb[12].mxu0  ;;  %v1952_v3 = vpop.f32.mrb[12].mxu1 }
  0xf6   :  { %v681_v28 = vadd.f32 %v680_v26, %v679_v25  ;;  %v453_v29 = vpop.f32.mrb[13].mxu0  ;;  %v1927_v36 = vadd.f32 %v1584_v27, %v1843_v38  ;;  %v1962_v8 = vpop.f32.mrb[13].mxu1 }
  0xf7   :  { %v1922_v31 = vadd.f32 %v1843_v38, %v453_v29  ;;  %v1585_v32 = vpop.f32.mrb[14].mxu0  ;;  %v1964_v10 = vpop.f32.mrb[14].mxu1 }
  0xf8   :  { %v683_v33 = vadd.f32 %v682_v30, %v681_v28  ;;  %v456_v34 = vpop.f32.mrb[15].mxu0  ;;  %v1939_v46 = vadd.f32 %v1585_v32, %v1843_v38  ;;  %v688_v51 = vsel %vm660_vm3, %v1927_v36, 0.0  ;;  %v1971_v14 = vpop.f32.mrb[15].mxu1 }
  0xf9   :  { %v684_v37 = vsel %vm660_vm3, %v1922_v31, 0.0  ;;  %v1932_v39 = vadd.f32 %v1843_v38, %v456_v34 }
  0xfa   :  { %v685_v42 = vadd.f32 %v684_v37, %v683_v33  ;;  %v690_v56 = vsel %vm660_vm3, %v1939_v46, 0.0 }
  0xfb   :  { %v686_v48 = vsel %vm660_vm3, %v1932_v39, 0.0 }
  0xfc   :  { %v687_v50 = vadd.f32 %v686_v48, %v685_v42 }
  0xfd   :  { %v1588_v52 = vpop.f32.mrb[16].mxu0  ;;  %v1980_v33 = vpop.f32.mrb[16].mxu1 }
  0xfe   :  { %v689_v53 = vadd.f32 %v688_v51, %v687_v50  ;;  %v469_v54 = vpop.f32.mrb[17].mxu0  ;;  %v1955_v5 = vadd.f32 %v1588_v52, %v1843_v38  ;;  %v1990_v48 = vpop.f32.mrb[17].mxu1 }
  0xff   :  { %v1950_v57 = vadd.f32 %v1843_v38, %v469_v54  ;;  %v1589_v58 = vpop.f32.mrb[18].mxu0  ;;  %v1992_v51 = vpop.f32.mrb[18].mxu1 }
 0x100   :  { %v691_v61 = vadd.f32 %v690_v56, %v689_v53  ;;  %v472_v0 = vpop.f32.mrb[19].mxu0  ;;  %v1967_v12 = vadd.f32 %v1589_v58, %v1843_v38  ;;  %v696_v20 = vsel %vm660_vm3, %v1955_v5, 0.0  ;;  %v1999_v54 = vpop.f32.mrb[19].mxu1 }
 0x101   :  { %v692_v6 = vsel %vm660_vm3, %v1950_v57, 0.0  ;;  %v1960_v7 = vadd.f32 %v1843_v38, %v472_v0 }
 0x102   :  { %v693_v9 = vadd.f32 %v692_v6, %v691_v61  ;;  %v698_v27 = vsel %vm660_vm3, %v1967_v12, 0.0 }
 0x103   :  { %v694_v13 = vsel %vm660_vm3, %v1960_v7, 0.0 }
 0x104   :  { %v695_v17 = vadd.f32 %v694_v13, %v693_v9 }
 0x105   :  { %v1592_v23 = vpop.f32.mrb[20].mxu0 }
 0x106   :  { %v697_v25 = vadd.f32 %v696_v20, %v695_v17  ;;  %v485_v26 = vpop.f32.mrb[21].mxu0  ;;  %v1983_v34 = vadd.f32 %v1592_v23, %v1843_v38 }
 0x107   :  { %v1978_v28 = vadd.f32 %v1843_v38, %v485_v26  ;;  %v1593_v29 = vpop.f32.mrb[22].mxu0 }
 0x108   :  { %v699_v30 = vadd.f32 %v698_v27, %v697_v25  ;;  %v488_v32 = vpop.f32.mrb[23].mxu0  ;;  %3791 = vst [vmem:[#allocation6_spill] sm:$0xff] %v1983_v34  ;;  %v1995_v52 = vadd.f32 %v1593_v29, %v1843_v38  ;;  %v704_v58 = vsel %vm660_vm3, %v1983_v34, 0.0  ;;  %v2008_v25 = vpop.f32.mrb[20].mxu1 }
 0x109   :  { %3790 = vst [vmem:[#allocation5_spill] sm:$0xff] %v1978_v28  ;;  %v700_v37 = vsel %vm660_vm3, %v1978_v28, 0.0  ;;  %v1988_v42 = vadd.f32 %v1843_v38, %v488_v32 }
 0x10a   :  { %v701_v50 = vadd.f32 %v700_v37, %v699_v30  ;;  %3793 = vst [vmem:[#allocation8_spill] sm:$0xff] %v1995_v52  ;;  %v706_v9 = vsel %vm660_vm3, %v1995_v52, 0.0  ;;  %v2018_v30 = vpop.f32.mrb[21].mxu1 }
 0x10b   :  { %3792 = vst [vmem:[#allocation7_spill] sm:$0xff] %v1988_v42  ;;  %v702_v53 = vsel %vm660_vm3, %v1988_v42, 0.0  ;;  %v2020_v37 = vpop.f32.mrb[22].mxu1 }
 0x10c   :  { %v703_v56 = vadd.f32 %v702_v53, %v701_v50 }
 0x10d   :  { %v1596_v61 = vpop.f32.mrb[24].mxu0 }
 0x10e   :  { %v705_v0 = vadd.f32 %v704_v58, %v703_v56  ;;  %v501_v6 = vpop.f32.mrb[25].mxu0  ;;  %v2011_v26 = vadd.f32 %v1596_v61, %v1843_v38  ;;  %v2027_v56 = vpop.f32.mrb[23].mxu1 }
 0x10f   :  { %v2006_v13 = vadd.f32 %v1843_v38, %v501_v6  ;;  %v1597_v17 = vpop.f32.mrb[26].mxu0  ;;  %v2036_v52 = vpop.f32.mrb[24].mxu1 }
 0x110   :  { %v707_v20 = vadd.f32 %v706_v9, %v705_v0  ;;  %v504_v23 = vpop.f32.mrb[27].mxu0  ;;  %3795 = vst [vmem:[#allocation10_spill] sm:$0xff] %v2011_v26  ;;  %v2023_v50 = vadd.f32 %v1597_v17, %v1843_v38  ;;  %v712_v61 = vsel %vm660_vm3, %v2011_v26, 0.0 }
 0x111   :  { %3794 = vst [vmem:[#allocation9_spill] sm:$0xff] %v2006_v13  ;;  %v708_v27 = vsel %vm660_vm3, %v2006_v13, 0.0  ;;  %v2016_v29 = vadd.f32 %v1843_v38, %v504_v23 }
 0x112   :  { %v709_v32 = vadd.f32 %v708_v27, %v707_v20  ;;  %3797 = vst [vmem:[#allocation12_spill] sm:$0xff] %v2023_v50  ;;  %v714_v20 = vsel %vm660_vm3, %v2023_v50, 0.0 }
 0x113   :  { %3796 = vst [vmem:[#allocation11_spill] sm:$0xff] %v2016_v29  ;;  %v710_v53 = vsel %vm660_vm3, %v2016_v29, 0.0 }
 0x114   :  { %v711_v58 = vadd.f32 %v710_v53, %v709_v32 }
 0x115   :  { %v1600_v0 = vpop.f32.mrb[28].mxu0 }
 0x116   :  { %v713_v6 = vadd.f32 %v712_v61, %v711_v58  ;;  %v517_v9 = vpop.f32.mrb[29].mxu0  ;;  %v2039_v29 = vadd.f32 %v1600_v0, %v1843_v38  ;;  %v2046_v58 = vpop.f32.mrb[25].mxu1  ;;  %v2057_v0 = vadd.f32 %v1843_v38, %v1878_v63 }
 0x117   :  { %v2034_v23 = vadd.f32 %v1843_v38, %v517_v9  ;;  %v1601_v17 = vpop.f32.mrb[30].mxu0  ;;  %v2048_v50 = vpop.f32.mrb[26].mxu1 }
 0x118   :  { %v715_v27 = vadd.f32 %v714_v20, %v713_v6  ;;  %v520_v13 = vpop.f32.mrb[31].mxu0  ;;  %3799 = vst [vmem:[#allocation14_spill] sm:$0xff] %v2039_v29  ;;  %v2051_v9 = vadd.f32 %v1601_v17, %v1843_v38  ;;  %3802 = vst [vmem:[#allocation17_spill] sm:$0xff] %v2057_v0  ;;  %v2059_v20 = vpop.f32.mrb[27].mxu1  ;;  %v724_v17 = vsel %vm660_vm3, %v2057_v0, 0.0 }
 0x119   :  { %3798 = vst [vmem:[#allocation13_spill] sm:$0xff] %v2034_v23  ;;  %v716_v32 = vsel %vm660_vm3, %v2034_v23, 0.0  ;;  %v2044_v53 = vadd.f32 %v1843_v38, %v520_v13  ;;  %v720_v13 = vsel %vm660_vm3, %v2039_v29, 0.0  ;;  %v2071_v63 = vpop.f32.mrb[28].mxu1 }
 0x11a   :  { %v717_v61 = vadd.f32 %v716_v32, %v715_v27  ;;  %3801 = vst [vmem:[#allocation16_spill] sm:$0xff] %v2051_v9  ;;  %v722_v27 = vsel %vm660_vm3, %v2051_v9, 0.0  ;;  %v2069_v32 = vadd.f32 %v1843_v38, %v1887_v4  ;;  %v2083_v9 = vadd.f32 %v1880_v1, %v1843_v38 }
 0x11b   :  { %3800 = vst [vmem:[#allocation15_spill] sm:$0xff] %v2044_v53  ;;  %v718_v6 = vsel %vm660_vm3, %v2044_v53, 0.0 }
 0x11c   :  { %v719_v23 = vadd.f32 %v718_v6, %v717_v61  ;;  %3803 = vst [vmem:[#allocation18_spill] sm:$0xff] %v2069_v32  ;;  %v2075_v61 = vadd.f32 %v1868_v59, %v1843_v38  ;;  %v2077_v6 = vpop.f32.mrb[29].mxu1  ;;  %v726_v4 = vsel %vm660_vm3, %v2069_v32, 0.0  ;;  %v2101_v32 = vadd.f32 %v1843_v38, %v1915_v24 }
 0x11e   :  { %v721_v26 = vadd.f32 %v720_v13, %v719_v23  ;;  %v2079_v13 = vpop.f32.mrb[30].mxu1  ;;  %v728_v0 = vsel %vm660_vm3, %v2075_v61, 0.0 }
 0x120   :  { %v723_v53 = vadd.f32 %v722_v27, %v721_v26  ;;  %v2089_v26 = vadd.f32 %v1843_v38, %v1906_v19  ;;  %v2091_v27 = vpop.f32.mrb[31].mxu1  ;;  %v2105_v19 = vadd.f32 %v1896_v15, %v1843_v38 }
 0x122   :  { %v725_v23 = vadd.f32 %v724_v17, %v723_v53  ;;  %3804 = vst [vmem:[#allocation19_spill] sm:$0xff] %v2089_v26  ;;  %v730_v17 = vsel %vm660_vm3, %v2083_v9, 0.0  ;;  %v732_v1 = vsel %vm660_vm3, %v2089_v26, 0.0  ;;  %v736_v24 = vsel %vm660_vm3, %v2105_v19, 0.0 }
 0x124   :  { %v727_v59 = vadd.f32 %v726_v4, %v725_v23  ;;  %v2109_v4 = vadd.f32 %v1908_v21, %v1843_v38  ;;  %v2125_v21 = vadd.f32 %v1843_v38, %v1943_v49 }
 0x126   :  { %v729_v53 = vadd.f32 %v728_v0, %v727_v59  ;;  %v734_v0 = vsel %vm660_vm3, %v2101_v32, 0.0  ;;  %v2115_v59 = vadd.f32 %v1843_v38, %v1934_v40  ;;  %v738_v15 = vsel %vm660_vm3, %v2109_v4, 0.0 }
 0x127   :  { %v2129_v40 = vadd.f32 %v1924_v35, %v1843_v38 }
 0x128   :  { %v731_v29 = vadd.f32 %v730_v17, %v729_v53 }
 0x129   :  { %v744_v49 = vsel %vm660_vm3, %v2129_v40, 0.0 }
 0x12a   :  { %v733_v23 = vadd.f32 %v732_v1, %v731_v29  ;;  %v740_v29 = vsel %vm660_vm3, %v2115_v59, 0.0 }
 0x12c   :  { %v735_v26 = vadd.f32 %v734_v0, %v733_v23  ;;  %v2133_v23 = vadd.f32 %v1936_v43, %v1843_v38  ;;  %v2139_v0 = vadd.f32 %v1843_v38, %v1962_v8  ;;  %v2149_v43 = vadd.f32 %v1843_v38, %v1971_v14 }
 0x12d   :  { %v2153_v8 = vadd.f32 %v1952_v3, %v1843_v38 }
 0x12e   :  { %v737_v53 = vadd.f32 %v736_v24, %v735_v26  ;;  %v742_v26 = vsel %vm660_vm3, %v2125_v21, 0.0  ;;  %v746_v35 = vsel %vm660_vm3, %v2133_v23, 0.0 }
 0x12f   :  { %v752_v14 = vsel %vm660_vm3, %v2153_v8, 0.0 }
 0x130   :  { %v739_v17 = vadd.f32 %v738_v15, %v737_v53  ;;  %v748_v15 = vsel %vm660_vm3, %v2139_v0, 0.0 }
 0x132   :  { %v741_v1 = vadd.f32 %v740_v29, %v739_v17 }
 0x134   :  { %v743_v24 = vadd.f32 %v742_v26, %v741_v1  ;;  %v2157_v1 = vadd.f32 %v1964_v10, %v1843_v38  ;;  %v750_v26 = vsel %vm660_vm3, %v2149_v43, 0.0  ;;  %v2173_v10 = vadd.f32 %v1843_v38, %v1999_v54 }
 0x136   :  { %v745_v53 = vadd.f32 %v744_v49, %v743_v24  ;;  %v2163_v24 = vadd.f32 %v1843_v38, %v1990_v48  ;;  %v754_v3 = vsel %vm660_vm3, %v2157_v1, 0.0  ;;  %v2177_v48 = vadd.f32 %v1980_v33, %v1843_v38 }
 0x138   :  { %v747_v29 = vadd.f32 %v746_v35, %v745_v53  ;;  %v756_v35 = vsel %vm660_vm3, %v2163_v24, 0.0  ;;  %v760_v54 = vsel %vm660_vm3, %v2177_v48, 0.0 }
 0x13a   :  { %v749_v17 = vadd.f32 %v748_v15, %v747_v29 }
 0x13c   :  { %v751_v49 = vadd.f32 %v750_v26, %v749_v17  ;;  %v2181_v17 = vadd.f32 %v1992_v51, %v1843_v38  ;;  %v758_v26 = vsel %vm660_vm3, %v2173_v10, 0.0  ;;  %v2197_v51 = vadd.f32 %v1843_v38, %v2027_v56 }
 0x13e   :  { %v753_v53 = vadd.f32 %v752_v14, %v751_v49  ;;  %v2187_v49 = vadd.f32 %v1843_v38, %v2018_v30  ;;  %v762_v33 = vsel %vm660_vm3, %v2181_v17, 0.0  ;;  %v2201_v30 = vadd.f32 %v2008_v25, %v1843_v38 }
 0x140   :  { %v755_v15 = vadd.f32 %v754_v3, %v753_v53  ;;  %v764_v3 = vsel %vm660_vm3, %v2187_v49, 0.0  ;;  %v768_v56 = vsel %vm660_vm3, %v2201_v30, 0.0 }
 0x142   :  { %v757_v29 = vadd.f32 %v756_v35, %v755_v15 }
 0x144   :  { %v759_v14 = vadd.f32 %v758_v26, %v757_v29  ;;  %v2205_v29 = vadd.f32 %v2020_v37, %v1843_v38  ;;  %v766_v26 = vsel %vm660_vm3, %v2197_v51, 0.0  ;;  %v2221_v37 = vadd.f32 %v1843_v38, %v2059_v20 }
 0x145   :  { %v2237_v20 = vadd.f32 %v1843_v38, %v2077_v6 }
 0x146   :  { %v761_v53 = vadd.f32 %v760_v54, %v759_v14  ;;  %3805 = vst [vmem:[#allocation20_spill] sm:$0xff] %v2205_v29  ;;  %v2211_v14 = vadd.f32 %v1843_v38, %v2046_v58  ;;  %v770_v25 = vsel %vm660_vm3, %v2205_v29, 0.0  ;;  %3807 = vst [vmem:[#allocation22_spill] sm:$0xff] %v2221_v37  ;;  %v2225_v58 = vadd.f32 %v2036_v52, %v1843_v38 }
 0x147   :  { %3810 = vst [vmem:[#allocation25_spill] sm:$0xff] %v2237_v20 }
 0x148   :  { %v763_v35 = vadd.f32 %v762_v33, %v761_v53  ;;  %3806 = vst [vmem:[#allocation21_spill] sm:$0xff] %v2211_v14  ;;  %v772_v33 = vsel %vm660_vm3, %v2211_v14, 0.0  ;;  %3808 = vst [vmem:[#allocation23_spill] sm:$0xff] %v2225_v58 }
 0x14a   :  { %v765_v15 = vadd.f32 %v764_v3, %v763_v35 }
 0x14c   :  { %v767_v54 = vadd.f32 %v766_v26, %v765_v15  ;;  %v2229_v15 = vadd.f32 %v2048_v50, %v1843_v38  ;;  %v774_v26 = vsel %vm660_vm3, %v2221_v37, 0.0  ;;  %v780_v50 = vsel %vm660_vm3, %v2237_v20, 0.0 }
 0x14e   :  { %v769_v53 = vadd.f32 %v768_v56, %v767_v54  ;;  %3809 = vst [vmem:[#allocation24_spill] sm:$0xff] %v2229_v15  ;;  %v776_v56 = vsel %vm660_vm3, %v2225_v58, 0.0  ;;  %v778_v52 = vsel %vm660_vm3, %v2229_v15, 0.0 }
 0x150   :  { %v771_v3 = vadd.f32 %v770_v25, %v769_v53 }
 0x152   :  { %v773_v35 = vadd.f32 %v772_v33, %v771_v3  ;;  %v2245_v33 = vadd.f32 %v1843_v38, %v2091_v27 }
 0x154   :  { %v775_v54 = vadd.f32 %v774_v26, %v773_v35  ;;  %3811 = vst [vmem:[#allocation26_spill] sm:$0xff] %v2245_v33  ;;  %v2249_v35 = vadd.f32 %v2071_v63, %v1843_v38  ;;  %v782_v6 = vsel %vm660_vm3, %v2245_v33, 0.0 }
 0x156   :  { %v777_v53 = vadd.f32 %v776_v56, %v775_v54  ;;  %3812 = vst [vmem:[#allocation27_spill] sm:$0xff] %v2249_v35  ;;  %v784_v54 = vsel %vm660_vm3, %v2249_v35, 0.0  ;;  %v2257_v56 = vadd.f32 %v2079_v13, %v1843_v38 }
 0x158   :  { %v779_v25 = vadd.f32 %v778_v52, %v777_v53  ;;  %3813 = vst [vmem:[#allocation28_spill] sm:$0xff] %v2257_v56  ;;  %v786_v27 = vsel %vm660_vm3, %v2257_v56, 0.0 }
 0x15a   :  { %v781_v3 = vadd.f32 %v780_v50, %v779_v25 }
 0x15c   :  { %v783_v26 = vadd.f32 %v782_v6, %v781_v3 }
 0x15e   :  { %v785_v53 = vadd.f32 %v784_v54, %v783_v26 }
 0x160   :  { %v787_v52 = vadd.f32 %v786_v27, %v785_v53 }
 0x162   :  { %v788_v25 = vrot.slane %v787_v52, 4 }
 0x164   :  { %v789_v50 = vadd.f32 %v788_v25, %v787_v52 }
 0x166   :  { %v790_v63 = vrot.slane %v789_v50, 2 }
 0x168   :  { %v791_v20 = vadd.f32 %v790_v63, %v789_v50 }
 0x16a   :  { %v792_v15 = vrot.slane %v791_v20, 1 }
 0x16c   :  { %v793_v58 = vadd.f32 %v792_v15, %v791_v20 }
 0x16e   :  { %v2261_v33 = vmul.f32 0.001953125, %v793_v58 }
 0x170   :  { %v796_v3 = vsub.f32 %v1846_v41, %v2261_v33  ;;  %v797_v38 = vsub.f32 %v1852_v45, %v2261_v33  ;;  %v798_v13 = vsub.f32 %v1849_v44, %v2261_v33  ;;  %v799_v6 = vsub.f32 %v1857_v47, %v2261_v33 }
 0x171   :  { %v800_v53 = vsub.f32 %v1866_v55, %v2261_v33  ;;  %v801_v58 = vsub.f32 %v1876_v62, %v2261_v33  ;;  %v802_v50 = vsub.f32 %v1871_v60, %v2261_v33  ;;  %v803_v55 = vsub.f32 %v1883_v2, %v2261_v33 }
 0x172   :  { %v860_v26 = vmul.f32 %v796_v3, %v796_v3  ;;  %v861_v54 = vmul.f32 %v797_v38, %v797_v38  ;;  %v862_v15 = vmul.f32 %v798_v13, %v798_v13  ;;  %v863_v20 = vmul.f32 %v799_v6, %v799_v6 }
 0x173   :  { %v864_v63 = vmul.f32 %v800_v53, %v800_v53  ;;  %v865_v13 = vmul.f32 %v801_v58, %v801_v58  ;;  %v804_v6 = vsub.f32 %v1894_v11, %v2261_v33  ;;  %v805_v53 = vsub.f32 %v1904_v18, %v2261_v33 }
 0x174   :  { %v924_v27 = vsel %vm660_vm3, %v860_v26, 0.0  ;;  %v925_v52 = vsel %vm660_vm3, %v861_v54, 0.0  ;;  %v927_v3 = vsel %vm660_vm3, %v862_v15, 0.0  ;;  %v929_v47 = vsel %vm660_vm3, %v863_v20, 0.0 }
 0x175   :  { %v926_v25 = vadd.f32 %v925_v52, %v924_v27  ;;  %v866_v26 = vmul.f32 %v802_v50, %v802_v50  ;;  %v931_v54 = vsel %vm660_vm3, %v864_v63, 0.0  ;;  %v867_v52 = vmul.f32 %v803_v55, %v803_v55 }
 0x176   :  { %v933_v15 = vsel %vm660_vm3, %v865_v13, 0.0  ;;  %v806_v58 = vsub.f32 %v1899_v16, %v2261_v33  ;;  %v807_v50 = vsub.f32 %v1911_v22, %v2261_v33  ;;  %v808_v55 = vsub.f32 %v1922_v31, %v2261_v33 }
 0x177   :  { %v928_v38 = vadd.f32 %v927_v3, %v926_v25  ;;  %v868_v3 = vmul.f32 %v804_v6, %v804_v6  ;;  %v809_v6 = vsub.f32 %v1932_v39, %v2261_v33 }
 0x179   :  { %v930_v62 = vadd.f32 %v929_v47, %v928_v38  ;;  %v935_v47 = vsel %vm660_vm3, %v866_v26, 0.0  ;;  %v869_v38 = vmul.f32 %v805_v53, %v805_v53  ;;  %v939_v13 = vsel %vm660_vm3, %v868_v3, 0.0 }
 0x17a   :  { %v810_v53 = vsub.f32 %v1927_v36, %v2261_v33 }
 0x17b   :  { %v932_v27 = vadd.f32 %v931_v54, %v930_v62  ;;  %v937_v62 = vsel %vm660_vm3, %v867_v52, 0.0  ;;  %v870_v54 = vmul.f32 %v806_v58, %v806_v58  ;;  %v941_v26 = vsel %vm660_vm3, %v869_v38, 0.0 }
 0x17c   :  { %v811_v58 = vsub.f32 %v1939_v46, %v2261_v33 }
 0x17d   :  { %v934_v25 = vadd.f32 %v933_v15, %v932_v27  ;;  %v871_v15 = vmul.f32 %v807_v50, %v807_v50  ;;  %v943_v52 = vsel %vm660_vm3, %v870_v54, 0.0  ;;  %v812_v50 = vsub.f32 %v1950_v57, %v2261_v33 }
 0x17f   :  { %v936_v20 = vadd.f32 %v935_v47, %v934_v25  ;;  %v872_v47 = vmul.f32 %v808_v55, %v808_v55  ;;  %v945_v3 = vsel %vm660_vm3, %v871_v15, 0.0  ;;  %v813_v55 = vsub.f32 %v1960_v7, %v2261_v33 }
 0x181   :  { %v938_v63 = vadd.f32 %v937_v62, %v936_v20  ;;  %v873_v62 = vmul.f32 %v809_v6, %v809_v6  ;;  %v947_v38 = vsel %vm660_vm3, %v872_v47, 0.0  ;;  %v814_v6 = vsub.f32 %v1955_v5, %v2261_v33 }
 0x183   :  { %v940_v27 = vadd.f32 %v939_v13, %v938_v63  ;;  %v874_v13 = vmul.f32 %v810_v53, %v810_v53  ;;  %v949_v54 = vsel %vm660_vm3, %v873_v62, 0.0  ;;  %v815_v53 = vsub.f32 %v1967_v12, %v2261_v33 }
 0x185   :  { %v942_v25 = vadd.f32 %v941_v26, %v940_v27  ;;  %v875_v26 = vmul.f32 %v811_v58, %v811_v58  ;;  %v951_v15 = vsel %vm660_vm3, %v874_v13, 0.0  ;;  %v816_v58 = vsub.f32 %v1978_v28, %v2261_v33 }
 0x187   :  { %v944_v20 = vadd.f32 %v943_v52, %v942_v25  ;;  %v876_v52 = vmul.f32 %v812_v50, %v812_v50  ;;  %v953_v47 = vsel %vm660_vm3, %v875_v26, 0.0  ;;  %v817_v50 = vsub.f32 %v1988_v42, %v2261_v33 }
 0x189   :  { %v946_v63 = vadd.f32 %v945_v3, %v944_v20  ;;  %v877_v3 = vmul.f32 %v813_v55, %v813_v55  ;;  %v955_v62 = vsel %vm660_vm3, %v876_v52, 0.0  ;;  %v818_v55 = vsub.f32 %v1983_v34, %v2261_v33 }
 0x18a   :  { %v881_v28 = vmul.f32 %v817_v50, %v817_v50 }
 0x18b   :  { %v948_v27 = vadd.f32 %v947_v38, %v946_v63  ;;  %v878_v38 = vmul.f32 %v814_v6, %v814_v6  ;;  %v957_v13 = vsel %vm660_vm3, %v877_v3, 0.0  ;;  %v882_v42 = vmul.f32 %v818_v55, %v818_v55 }
 0x18d   :  { %v950_v25 = vadd.f32 %v949_v54, %v948_v27  ;;  %v879_v54 = vmul.f32 %v815_v53, %v815_v53  ;;  %v959_v26 = vsel %vm660_vm3, %v878_v38, 0.0  ;;  %v965_v38 = vsel %vm660_vm3, %v881_v28, 0.0 }
 0x18f   :  { %v952_v20 = vadd.f32 %v951_v15, %v950_v25  ;;  %v880_v15 = vmul.f32 %v816_v58, %v816_v58  ;;  %v961_v52 = vsel %vm660_vm3, %v879_v54, 0.0  ;;  %v967_v54 = vsel %vm660_vm3, %v882_v42, 0.0 }
 0x191   :  { %v954_v63 = vadd.f32 %v953_v47, %v952_v20  ;;  %v3814_v47 = vld [vmem:[#allocation8_spill] sm:$0xff]  ;;  %v963_v3 = vsel %vm660_vm3, %v880_v15, 0.0 }
 0x192   :  { %v819_v6 = vsub.f32 %v3814_v47, %v2261_v33 }
 0x193   :  { %v956_v27 = vadd.f32 %v955_v62, %v954_v63  ;;  %v3815_v62 = vld [vmem:[#allocation9_spill] sm:$0xff] }
 0x194   :  { %v820_v53 = vsub.f32 %v3815_v62, %v2261_v33  ;;  %v883_v34 = vmul.f32 %v819_v6, %v819_v6 }
 0x195   :  { %v958_v25 = vadd.f32 %v957_v13, %v956_v27  ;;  %v3816_v13 = vld [vmem:[#allocation11_spill] sm:$0xff] }
 0x196   :  { %v821_v58 = vsub.f32 %v3816_v13, %v2261_v33  ;;  %v884_v47 = vmul.f32 %v820_v53, %v820_v53  ;;  %v969_v15 = vsel %vm660_vm3, %v883_v34, 0.0 }
 0x197   :  { %v960_v20 = vadd.f32 %v959_v26, %v958_v25  ;;  %v3817_v26 = vld [vmem:[#allocation10_spill] sm:$0xff] }
 0x198   :  { %v822_v50 = vsub.f32 %v3817_v26, %v2261_v33  ;;  %v885_v62 = vmul.f32 %v821_v58, %v821_v58  ;;  %v971_v28 = vsel %vm660_vm3, %v884_v47, 0.0 }
 0x199   :  { %v962_v63 = vadd.f32 %v961_v52, %v960_v20  ;;  %v3818_v52 = vld [vmem:[#allocation12_spill] sm:$0xff] }
 0x19a   :  { %v823_v55 = vsub.f32 %v3818_v52, %v2261_v33  ;;  %v886_v13 = vmul.f32 %v822_v50, %v822_v50  ;;  %v973_v42 = vsel %vm660_vm3, %v885_v62, 0.0 }
 0x19b   :  { %v964_v27 = vadd.f32 %v963_v3, %v962_v63  ;;  %v3819_v3 = vld [vmem:[#allocation13_spill] sm:$0xff] }
 0x19c   :  { %v824_v6 = vsub.f32 %v3819_v3, %v2261_v33  ;;  %v887_v26 = vmul.f32 %v823_v55, %v823_v55  ;;  %v975_v34 = vsel %vm660_vm3, %v886_v13, 0.0 }
 0x19d   :  { %v966_v25 = vadd.f32 %v965_v38, %v964_v27  ;;  %v3820_v38 = vld [vmem:[#allocation15_spill] sm:$0xff] }
 0x19e   :  { %v825_v53 = vsub.f32 %v3820_v38, %v2261_v33  ;;  %v888_v52 = vmul.f32 %v824_v6, %v824_v6  ;;  %v977_v47 = vsel %vm660_vm3, %v887_v26, 0.0 }
 0x19f   :  { %v968_v20 = vadd.f32 %v967_v54, %v966_v25  ;;  %v3821_v54 = vld [vmem:[#allocation14_spill] sm:$0xff] }
 0x1a0   :  { %v826_v58 = vsub.f32 %v3821_v54, %v2261_v33  ;;  %v889_v3 = vmul.f32 %v825_v53, %v825_v53  ;;  %v979_v62 = vsel %vm660_vm3, %v888_v52, 0.0  ;;  %v830_v53 = vsub.f32 %v2075_v61, %v2261_v33 }
 0x1a1   :  { %v970_v63 = vadd.f32 %v969_v15, %v968_v20  ;;  %v3822_v15 = vld [vmem:[#allocation16_spill] sm:$0xff] }
 0x1a2   :  { %v827_v50 = vsub.f32 %v3822_v15, %v2261_v33  ;;  %v890_v38 = vmul.f32 %v826_v58, %v826_v58  ;;  %v981_v13 = vsel %vm660_vm3, %v889_v3, 0.0  ;;  %v831_v58 = vsub.f32 %v2083_v9, %v2261_v33 }
 0x1a3   :  { %v972_v27 = vadd.f32 %v971_v28, %v970_v63  ;;  %v3823_v28 = vld [vmem:[#allocation17_spill] sm:$0xff] }
 0x1a4   :  { %v828_v55 = vsub.f32 %v3823_v28, %v2261_v33  ;;  %v891_v54 = vmul.f32 %v827_v50, %v827_v50  ;;  %v983_v26 = vsel %vm660_vm3, %v890_v38, 0.0 }
 0x1a5   :  { %v974_v25 = vadd.f32 %v973_v42, %v972_v27  ;;  %v3824_v42 = vld [vmem:[#allocation18_spill] sm:$0xff] }
 0x1a6   :  { %v829_v6 = vsub.f32 %v3824_v42, %v2261_v33  ;;  %v985_v52 = vsel %vm660_vm3, %v891_v54, 0.0  ;;  %v894_v42 = vmul.f32 %v830_v53, %v830_v53  ;;  %v835_v53 = vsub.f32 %v2109_v4, %v2261_v33 }
 0x1a7   :  { %v976_v20 = vadd.f32 %v975_v34, %v974_v25  ;;  %v892_v34 = vmul.f32 %v828_v55, %v828_v55  ;;  %v833_v55 = vsub.f32 %v2101_v32, %v2261_v33 }
 0x1a8   :  { %v991_v54 = vsel %vm660_vm3, %v894_v42, 0.0 }
 0x1a9   :  { %v978_v63 = vadd.f32 %v977_v47, %v976_v20  ;;  %v893_v47 = vmul.f32 %v829_v6, %v829_v6  ;;  %v987_v3 = vsel %vm660_vm3, %v892_v34, 0.0  ;;  %v834_v6 = vsub.f32 %v2105_v19, %v2261_v33 }
 0x1ab   :  { %v980_v27 = vadd.f32 %v979_v62, %v978_v63  ;;  %v3825_v62 = vld [vmem:[#allocation19_spill] sm:$0xff]  ;;  %v989_v38 = vsel %vm660_vm3, %v893_v47, 0.0 }
 0x1ac   :  { %v832_v50 = vsub.f32 %v3825_v62, %v2261_v33 }
 0x1ad   :  { %v982_v25 = vadd.f32 %v981_v13, %v980_v27  ;;  %v895_v13 = vmul.f32 %v831_v58, %v831_v58  ;;  %v836_v58 = vsub.f32 %v2115_v59, %v2261_v33 }
 0x1af   :  { %v984_v20 = vadd.f32 %v983_v26, %v982_v25  ;;  %v896_v26 = vmul.f32 %v832_v50, %v832_v50  ;;  %v993_v34 = vsel %vm660_vm3, %v895_v13, 0.0  ;;  %v837_v50 = vsub.f32 %v2125_v21, %v2261_v33 }
 0x1b1   :  { %v986_v63 = vadd.f32 %v985_v52, %v984_v20  ;;  %v897_v52 = vmul.f32 %v833_v55, %v833_v55  ;;  %v995_v47 = vsel %vm660_vm3, %v896_v26, 0.0  ;;  %v838_v55 = vsub.f32 %v2129_v40, %v2261_v33 }
 0x1b3   :  { %v988_v27 = vadd.f32 %v987_v3, %v986_v63  ;;  %v898_v3 = vmul.f32 %v834_v6, %v834_v6  ;;  %v997_v42 = vsel %vm660_vm3, %v897_v52, 0.0  ;;  %v839_v6 = vsub.f32 %v2133_v23, %v2261_v33 }
 0x1b5   :  { %v990_v25 = vadd.f32 %v989_v38, %v988_v27  ;;  %v899_v38 = vmul.f32 %v835_v53, %v835_v53  ;;  %v999_v13 = vsel %vm660_vm3, %v898_v3, 0.0  ;;  %v840_v53 = vsub.f32 %v2139_v0, %v2261_v33 }
 0x1b7   :  { %v992_v20 = vadd.f32 %v991_v54, %v990_v25  ;;  %v900_v54 = vmul.f32 %v836_v58, %v836_v58  ;;  %v1001_v26 = vsel %vm660_vm3, %v899_v38, 0.0  ;;  %v841_v58 = vsub.f32 %v2149_v43, %v2261_v33 }
 0x1b9   :  { %v994_v63 = vadd.f32 %v993_v34, %v992_v20  ;;  %v901_v34 = vmul.f32 %v837_v50, %v837_v50  ;;  %v1003_v52 = vsel %vm660_vm3, %v900_v54, 0.0  ;;  %v842_v50 = vsub.f32 %v2153_v8, %v2261_v33 }
 0x1bb   :  { %v996_v27 = vadd.f32 %v995_v47, %v994_v63  ;;  %v902_v47 = vmul.f32 %v838_v55, %v838_v55  ;;  %v1005_v3 = vsel %vm660_vm3, %v901_v34, 0.0  ;;  %v843_v55 = vsub.f32 %v2157_v1, %v2261_v33 }
 0x1bd   :  { %v998_v25 = vadd.f32 %v997_v42, %v996_v27  ;;  %v903_v42 = vmul.f32 %v839_v6, %v839_v6  ;;  %v1007_v38 = vsel %vm660_vm3, %v902_v47, 0.0  ;;  %v844_v6 = vsub.f32 %v2163_v24, %v2261_v33 }
 0x1bf   :  { %v1000_v20 = vadd.f32 %v999_v13, %v998_v25  ;;  %v904_v13 = vmul.f32 %v840_v53, %v840_v53  ;;  %v1009_v54 = vsel %vm660_vm3, %v903_v42, 0.0  ;;  %v845_v53 = vsub.f32 %v2173_v10, %v2261_v33 }
 0x1c1   :  { %v1002_v63 = vadd.f32 %v1001_v26, %v1000_v20  ;;  %v905_v26 = vmul.f32 %v841_v58, %v841_v58  ;;  %v1011_v34 = vsel %vm660_vm3, %v904_v13, 0.0  ;;  %v846_v58 = vsub.f32 %v2177_v48, %v2261_v33 }
 0x1c3   :  { %v1004_v27 = vadd.f32 %v1003_v52, %v1002_v63  ;;  %v906_v52 = vmul.f32 %v842_v50, %v842_v50  ;;  %v1013_v47 = vsel %vm660_vm3, %v905_v26, 0.0  ;;  %v847_v50 = vsub.f32 %v2181_v17, %v2261_v33 }
 0x1c5   :  { %v1006_v25 = vadd.f32 %v1005_v3, %v1004_v27  ;;  %v907_v3 = vmul.f32 %v843_v55, %v843_v55  ;;  %v1015_v42 = vsel %vm660_vm3, %v906_v52, 0.0  ;;  %v848_v55 = vsub.f32 %v2187_v49, %v2261_v33 }
 0x1c7   :  { %v1008_v20 = vadd.f32 %v1007_v38, %v1006_v25  ;;  %v908_v38 = vmul.f32 %v844_v6, %v844_v6  ;;  %v1017_v13 = vsel %vm660_vm3, %v907_v3, 0.0  ;;  %v849_v6 = vsub.f32 %v2197_v51, %v2261_v33 }
 0x1c9   :  { %v1010_v63 = vadd.f32 %v1009_v54, %v1008_v20  ;;  %v909_v54 = vmul.f32 %v845_v53, %v845_v53  ;;  %v1019_v26 = vsel %vm660_vm3, %v908_v38, 0.0  ;;  %v850_v53 = vsub.f32 %v2201_v30, %v2261_v33 }
 0x1cb   :  { %v1012_v27 = vadd.f32 %v1011_v34, %v1010_v63  ;;  %v910_v34 = vmul.f32 %v846_v58, %v846_v58  ;;  %v1021_v52 = vsel %vm660_vm3, %v909_v54, 0.0  ;;  %v851_v58 = vsub.f32 %v2205_v29, %v2261_v33 }
 0x1cd   :  { %v1014_v25 = vadd.f32 %v1013_v47, %v1012_v27  ;;  %v911_v47 = vmul.f32 %v847_v50, %v847_v50  ;;  %v1023_v3 = vsel %vm660_vm3, %v910_v34, 0.0  ;;  %v852_v50 = vsub.f32 %v2211_v14, %v2261_v33 }
 0x1cf   :  { %v1016_v20 = vadd.f32 %v1015_v42, %v1014_v25  ;;  %v912_v42 = vmul.f32 %v848_v55, %v848_v55  ;;  %v1025_v38 = vsel %vm660_vm3, %v911_v47, 0.0  ;;  %v853_v55 = vsub.f32 %v2221_v37, %v2261_v33 }
 0x1d0   :  { %v916_v29 = vmul.f32 %v852_v50, %v852_v50 }
 0x1d1   :  { %v1018_v63 = vadd.f32 %v1017_v13, %v1016_v20  ;;  %v913_v13 = vmul.f32 %v849_v6, %v849_v6  ;;  %v1027_v54 = vsel %vm660_vm3, %v912_v42, 0.0  ;;  %v917_v14 = vmul.f32 %v853_v55, %v853_v55 }
 0x1d2   :  { %v858_v55 = vsub.f32 %v2249_v35, %v2261_v33 }
 0x1d3   :  { %v1020_v27 = vadd.f32 %v1019_v26, %v1018_v63  ;;  %v914_v26 = vmul.f32 %v850_v53, %v850_v53  ;;  %v1029_v34 = vsel %vm660_vm3, %v913_v13, 0.0  ;;  %v1035_v13 = vsel %vm660_vm3, %v916_v29, 0.0 }
 0x1d5   :  { %v1022_v25 = vadd.f32 %v1021_v52, %v1020_v27  ;;  %v915_v52 = vmul.f32 %v851_v58, %v851_v58  ;;  %v1031_v47 = vsel %vm660_vm3, %v914_v26, 0.0  ;;  %v1037_v26 = vsel %vm660_vm3, %v917_v14, 0.0 }
 0x1d7   :  { %v1024_v20 = vadd.f32 %v1023_v3, %v1022_v25  ;;  %v3826_v3 = vld [vmem:[#allocation23_spill] sm:$0xff]  ;;  %v1033_v42 = vsel %vm660_vm3, %v915_v52, 0.0 }
 0x1d8   :  { %v854_v6 = vsub.f32 %v3826_v3, %v2261_v33 }
 0x1d9   :  { %v1026_v63 = vadd.f32 %v1025_v38, %v1024_v20  ;;  %v3827_v38 = vld [vmem:[#allocation24_spill] sm:$0xff] }
 0x1da   :  { %v855_v53 = vsub.f32 %v3827_v38, %v2261_v33  ;;  %v918_v37 = vmul.f32 %v854_v6, %v854_v6  ;;  %v859_v6 = vsub.f32 %v2257_v56, %v2261_v33 }
 0x1db   :  { %v1028_v27 = vadd.f32 %v1027_v54, %v1026_v63  ;;  %v3828_v54 = vld [vmem:[#allocation25_spill] sm:$0xff] }
 0x1dc   :  { %v856_v58 = vsub.f32 %v3828_v54, %v2261_v33  ;;  %v919_v3 = vmul.f32 %v855_v53, %v855_v53  ;;  %v1039_v52 = vsel %vm660_vm3, %v918_v37, 0.0  ;;  %v923_v14 = vmul.f32 %v859_v6, %v859_v6 }
 0x1dd   :  { %v1030_v25 = vadd.f32 %v1029_v34, %v1028_v27  ;;  %v3829_v34 = vld [vmem:[#allocation26_spill] sm:$0xff] }
 0x1de   :  { %v857_v50 = vsub.f32 %v3829_v34, %v2261_v33  ;;  %v1041_v29 = vsel %vm660_vm3, %v919_v3, 0.0  ;;  %v1049_v37 = vsel %vm660_vm3, %v923_v14, 0.0 }
 0x1df   :  { %v1032_v20 = vadd.f32 %v1031_v47, %v1030_v25  ;;  %v920_v47 = vmul.f32 %v856_v58, %v856_v58 }
 0x1e1   :  { %v1034_v63 = vadd.f32 %v1033_v42, %v1032_v20  ;;  %v921_v42 = vmul.f32 %v857_v50, %v857_v50  ;;  %v1043_v53 = vsel %vm660_vm3, %v920_v47, 0.0  ;;  %v1066_v47 = vlaneseq }
 0x1e3   :  { %v1036_v27 = vadd.f32 %v1035_v13, %v1034_v63  ;;  %v922_v13 = vmul.f32 %v858_v55, %v858_v55 }
 0x1e5   :  { %v1038_v25 = vadd.f32 %v1037_v26, %v1036_v27  ;;  %v1045_v27 = vsel %vm660_vm3, %v921_v42, 0.0  ;;  %v1047_v58 = vsel %vm660_vm3, %v922_v13, 0.0  ;;  %v1067_v42 = vshrl.u32 %v1066_v47, 7  ;;  %v3835_v47 = vld [vmem:[#allocation6_spill] sm:$0xff] }
 0x1e7   :  { %v1040_v20 = vadd.f32 %v1039_v52, %v1038_v25  ;;  %v1068_v13 = vsub.s32 0, %v1067_v42  ;;  %v3838_v42 = vld [vmem:[#allocation11_spill] sm:$0xff] }
 0x1e9   :  { %v1042_v63 = vadd.f32 %v1041_v29, %v1040_v20 }
 0x1eb   :  { %v1044_v34 = vadd.f32 %v1043_v53, %v1042_v63 }
 0x1ed   :  { %v1046_v26 = vadd.f32 %v1045_v27, %v1044_v34  ;;  %v1058_v34 = vld [vmem:[%s3719_s3] sm:$0x1] }
 0x1ef   :  { %v1048_v35 = vadd.f32 %v1047_v58, %v1046_v26 }
 0x1f1   :  { %v1050_v25 = vadd.f32 %v1049_v37, %v1048_v35  ;;  %v3831_v37 = vld [vmem:[#allocation3_spill] sm:$0xff] }
 0x1f3   :  { %v1051_v52 = vrot.slane %v1050_v25, 4 }
 0x1f5   :  { %v1052_v56 = vadd.f32 %v1051_v52, %v1050_v25  ;;  %v3832_v52 = vld [vmem:[#allocation4_spill] sm:$0xff] }
 0x1f7   :  { %v1053_v50 = vrot.slane %v1052_v56, 2 }
 0x1f9   :  { %v1054_v54 = vadd.f32 %v1053_v50, %v1052_v56  ;;  %v1062_v56 = vld [vmem:[%s3720_s4] sm:$0x1] }
 0x1fb   :  { %v1055_v3 = vrot.slane %v1054_v54, 1 }
 0x1fd   :  { %v1056_v20 = vadd.f32 %v1055_v3, %v1054_v54 }
 0x1ff   :  { %v1057_v55 = vmul.f32 0.001953125, %v1056_v20 }
 0x201   :  { %v1059_v29 = vadd.f32 1e-05, %v1057_v55  ;;  %v3833_v55 = vld [vmem:[#allocation5_spill] sm:$0xff] }
 0x203   :  { %1673 = vrsqrt.f32 %v1059_v29  ;;  %v3834_v29 = vld [vmem:[#allocation7_spill] sm:$0xff] }
 0x20d   :  { %v1674_v6 = vpop.eup %1673 }
 0x20e   :  { %v1061_v63 = vmul.f32 %v1674_v6, %v1058_v34  ;;  %v3836_v6 = vld [vmem:[#allocation8_spill] sm:$0xff]  ;;  %v3837_v34 = vld [vmem:[#allocation9_spill] sm:$0xff] }
 0x210   :  { %v1063_v35 = vmul.f32 %v1061_v63, %v2261_v33  ;;  %v2462_v53 = vrot.slane %v1061_v63, %v1068_v13  ;;  %v3830_v33 = vld [vmem:[#allocation2_spill] sm:$0xff] }
 0x212   :  { %v1064_v54 = vsub.f32 %v1062_v56, %v1063_v35  ;;  %v2466_v14 = vmul.f32 %v2462_v53, %v1846_v41  ;;  %v2470_v27 = vmul.f32 %v2462_v53, %v1852_v45  ;;  %v2474_v26 = vmul.f32 %v2462_v53, %v1849_v44  ;;  %v3839_v35 = vld [vmem:[#allocation10_spill] sm:$0xff] }
 0x213   :  { %v2478_v58 = vmul.f32 %v2462_v53, %v3830_v33  ;;  %v2482_v25 = vmul.f32 %v2462_v53, %v3831_v37  ;;  %v2486_v41 = vmul.f32 %v2462_v53, %v3832_v52  ;;  %v2490_v45 = vmul.f32 %v2462_v53, %v1871_v60  ;;  %v3840_v33 = vld [vmem:[#allocation12_spill] sm:$0xff]  ;;  %v3841_v52 = vld [vmem:[#allocation13_spill] sm:$0xff] }
 0x214   :  { %v2494_v44 = vmul.f32 %v2462_v53, %v1883_v2  ;;  %v2498_v50 = vmul.f32 %v2462_v53, %v1894_v11  ;;  %v2502_v3 = vmul.f32 %v2462_v53, %v1904_v18  ;;  %v2506_v20 = vmul.f32 %v2462_v53, %v1899_v16 }
 0x215   :  { %v2510_v60 = vmul.f32 %v2462_v53, %v1911_v22  ;;  %v2514_v2 = vmul.f32 %v2462_v53, %v1922_v31  ;;  %v2518_v11 = vmul.f32 %v2462_v53, %v1932_v39  ;;  %v2522_v18 = vmul.f32 %v2462_v53, %v1927_v36 }
 0x216   :  { %v2526_v16 = vmul.f32 %v2462_v53, %v1939_v46  ;;  %v2530_v22 = vmul.f32 %v2462_v53, %v1950_v57  ;;  %v2534_v31 = vmul.f32 %v2462_v53, %v1960_v7  ;;  %v2538_v39 = vmul.f32 %v2462_v53, %v1955_v5 }
 0x217   :  { %v2542_v36 = vmul.f32 %v2462_v53, %v1967_v12  ;;  %v2546_v46 = vmul.f32 %v2462_v53, %v3833_v55  ;;  %v2550_v57 = vmul.f32 %v2462_v53, %v3834_v29  ;;  %v2554_v7 = vmul.f32 %v2462_v53, %v3835_v47  ;;  %v3842_v29 = vld [vmem:[#allocation15_spill] sm:$0xff] }
 0x218   :  { %v2558_v5 = vmul.f32 %v2462_v53, %v3836_v6  ;;  %v2562_v12 = vmul.f32 %v2462_v53, %v3837_v34  ;;  %v2566_v63 = vmul.f32 %v2462_v53, %v3838_v42  ;;  %v2570_v56 = vmul.f32 %v2462_v53, %v3839_v35  ;;  %v3843_v6 = vld [vmem:[#allocation14_spill] sm:$0xff] }
 0x219   :  { %v2574_v37 = vmul.f32 %v2462_v53, %v3840_v33  ;;  %v2578_v55 = vmul.f32 %v2462_v53, %v3841_v52  ;;  %v2582_v47 = vmul.f32 %v2462_v53, %v3842_v29  ;;  %v2586_v34 = vmul.f32 %v2462_v53, %v3843_v6  ;;  %v3844_v33 = vld [vmem:[#allocation18_spill] sm:$0xff] }
 0x21a   :  { %v2590_v42 = vmul.f32 %v2462_v53, %v3822_v15  ;;  %v2594_v35 = vmul.f32 %v2462_v53, %v3823_v28  ;;  %v2598_v52 = vmul.f32 %v2462_v53, %v3844_v33  ;;  %v2602_v29 = vmul.f32 %v2462_v53, %v2075_v61 }
 0x21b   :  { %v2606_v6 = vmul.f32 %v2462_v53, %v2083_v9  ;;  %v2610_v15 = vmul.f32 %v2462_v53, %v3825_v62  ;;  %v2614_v28 = vmul.f32 %v2462_v53, %v2101_v32  ;;  %v2618_v33 = vmul.f32 %v2462_v53, %v2105_v19 }
 0x21c   :  { %v2622_v61 = vmul.f32 %v2462_v53, %v2109_v4  ;;  %v2626_v9 = vmul.f32 %v2462_v53, %v2115_v59  ;;  %v2630_v62 = vmul.f32 %v2462_v53, %v2125_v21  ;;  %v2634_v32 = vmul.f32 %v2462_v53, %v2129_v40 }
 0x21d   :  { %v2638_v19 = vmul.f32 %v2462_v53, %v2133_v23  ;;  %v2642_v4 = vmul.f32 %v2462_v53, %v2139_v0  ;;  %v2646_v59 = vmul.f32 %v2462_v53, %v2149_v43  ;;  %v2650_v21 = vmul.f32 %v2462_v53, %v2153_v8 }
 0x21e   :  { %v2654_v40 = vmul.f32 %v2462_v53, %v2157_v1  ;;  %v2658_v23 = vmul.f32 %v2462_v53, %v2163_v24  ;;  %v2662_v0 = vmul.f32 %v2462_v53, %v2173_v10  ;;  %v2666_v43 = vmul.f32 %v2462_v53, %v2177_v48  ;;  %v3849_v48 = vld [vmem:[#allocation20_spill] sm:$0xff] }
 0x21f   :  { %3845 = vst [vmem:[#allocation16_spill] sm:$0xff] %v2646_v59  ;;  %v2668_v59 = vrot.slane %v1064_v54, %v1068_v13  ;;  %v2672_v8 = vmul.f32 %v2462_v53, %v2181_v17  ;;  %v2676_v1 = vmul.f32 %v2462_v53, %v2187_v49  ;;  %v2680_v24 = vmul.f32 %v2462_v53, %v2197_v51  ;;  %v3851_v54 = vld [vmem:[#allocation21_spill] sm:$0xff] }
 0x220   :  { %v2684_v10 = vmul.f32 %v2462_v53, %v2201_v30  ;;  %v2688_v13 = vmul.f32 %v2462_v53, %v3849_v48  ;;  %v2692_v17 = vmul.f32 %v2462_v53, %v3851_v54  ;;  %v2704_v30 = vmul.f32 %v2462_v53, %v3827_v38 }
 0x221   :  { %3846 = vst [vmem:[#allocation17_spill] sm:$0xff] %v2672_v8  ;;  %3847 = vst [vmem:[#allocation19_spill] sm:$0xff] %v2676_v1  ;;  %v3853_v8 = vld [vmem:[#allocation22_spill] sm:$0xff]  ;;  %v3855_v1 = vld [vmem:[#allocation23_spill] sm:$0xff]  ;;  %v2724_v38 = vadd.f32 %v2668_v59, %v2466_v14  ;;  %v2744_v14 = vadd.f32 %v2668_v59, %v2486_v41  ;;  %v2764_v41 = vadd.f32 %v2668_v59, %v2506_v20 }
 0x222   :  { %3848 = vst [vmem:[#allocation24_spill] sm:$0xff] %v2684_v10  ;;  %3850 = vst [vmem:[#allocation2_spill] sm:$0xff] %v2688_v13  ;;  %v2696_v49 = vmul.f32 %v2462_v53, %v3853_v8  ;;  %v2700_v51 = vmul.f32 %v2462_v53, %v3855_v1  ;;  %v3856_v10 = vld [vmem:[#allocation25_spill] sm:$0xff]  ;;  %v3857_v13 = vld [vmem:[#allocation26_spill] sm:$0xff]  ;;  %v2784_v20 = vadd.f32 %v2668_v59, %v2526_v16 }
 0x223   :  { %3852 = vst [vmem:[#allocation3_spill] sm:$0xff] %v2692_v17  ;;  %v2708_v48 = vmul.f32 %v2462_v53, %v3856_v10  ;;  %v2712_v54 = vmul.f32 %v2462_v53, %v3857_v13  ;;  %v3858_v17 = vld [vmem:[#allocation27_spill] sm:$0xff]  ;;  %v2728_v10 = vadd.f32 %v2668_v59, %v2470_v27  ;;  %v2732_v13 = vadd.f32 %v2668_v59, %v2474_v26 }
 0x224   :  { %3854 = vst [vmem:[#allocation4_spill] sm:$0xff] %v2696_v49  ;;  %v2716_v8 = vmul.f32 %v2462_v53, %v3858_v17  ;;  %v3859_v49 = vld [vmem:[#allocation28_spill] sm:$0xff]  ;;  %v2736_v17 = vadd.f32 %v2668_v59, %v2478_v58  ;;  %v2748_v27 = vadd.f32 %v2668_v59, %v2490_v45  ;;  %v2752_v26 = vadd.f32 %v2668_v59, %v2494_v44 }
 0x225   :  { %v2720_v1 = vmul.f32 %v2462_v53, %v3859_v49  ;;  %v2740_v53 = vadd.f32 %v2668_v59, %v2482_v25  ;;  %v2756_v58 = vadd.f32 %v2668_v59, %v2498_v50  ;;  %v2760_v25 = vadd.f32 %v2668_v59, %v2502_v3 }
 0x226   :  { %v2768_v45 = vadd.f32 %v2668_v59, %v2510_v60  ;;  %v2772_v44 = vadd.f32 %v2668_v59, %v2514_v2  ;;  %v2776_v50 = vadd.f32 %v2668_v59, %v2518_v11  ;;  %v2780_v3 = vadd.f32 %v2668_v59, %v2522_v18  ;;  %v3860_v49 = vld [vmem:[#allocation16_spill] sm:$0xff] }
 0x227   :  { %v2788_v60 = vadd.f32 %v2668_v59, %v2530_v22  ;;  %v2792_v2 = vadd.f32 %v2668_v59, %v2534_v31  ;;  %v2796_v11 = vadd.f32 %v2668_v59, %v2538_v39  ;;  %v2800_v18 = vadd.f32 %v2668_v59, %v2542_v36 }
 0x228   :  { %v2804_v16 = vadd.f32 %v2668_v59, %v2546_v46  ;;  %v2808_v22 = vadd.f32 %v2668_v59, %v2550_v57  ;;  %v2812_v31 = vadd.f32 %v2668_v59, %v2554_v7  ;;  %v2816_v39 = vadd.f32 %v2668_v59, %v2558_v5 }
 0x229   :  { %v2820_v36 = vadd.f32 %v2668_v59, %v2562_v12  ;;  %v2824_v46 = vadd.f32 %v2668_v59, %v2566_v63  ;;  %v2828_v57 = vadd.f32 %v2668_v59, %v2570_v56  ;;  %v2832_v7 = vadd.f32 %v2668_v59, %v2574_v37 }
 0x22a   :  { %v2836_v5 = vadd.f32 %v2668_v59, %v2578_v55  ;;  %v2840_v12 = vadd.f32 %v2668_v59, %v2582_v47  ;;  %v2844_v63 = vadd.f32 %v2668_v59, %v2586_v34  ;;  %v2848_v56 = vadd.f32 %v2668_v59, %v2590_v42 }
 0x22b   :  { %v2852_v37 = vadd.f32 %v2668_v59, %v2594_v35  ;;  %v2856_v55 = vadd.f32 %v2668_v59, %v2598_v52  ;;  %v2860_v47 = vadd.f32 %v2668_v59, %v2602_v29  ;;  %v2864_v34 = vadd.f32 %v2668_v59, %v2606_v6 }
 0x22c   :  { %v2868_v42 = vadd.f32 %v2668_v59, %v2610_v15  ;;  %v2872_v35 = vadd.f32 %v2668_v59, %v2614_v28  ;;  %v2876_v52 = vadd.f32 %v2668_v59, %v2618_v33  ;;  %v2880_v29 = vadd.f32 %v2668_v59, %v2622_v61 }
 0x22d   :  { %v2884_v6 = vadd.f32 %v2668_v59, %v2626_v9  ;;  %v2888_v15 = vadd.f32 %v2668_v59, %v2630_v62  ;;  %v2892_v28 = vadd.f32 %v2668_v59, %v2634_v32  ;;  %v2896_v33 = vadd.f32 %v2668_v59, %v2638_v19 }
 0x22e   :  { %v2900_v61 = vadd.f32 %v2668_v59, %v2642_v4  ;;  %v2904_v9 = vadd.f32 %v2668_v59, %v3860_v49  ;;  %v2908_v62 = vadd.f32 %v2668_v59, %v2650_v21  ;;  %v2912_v32 = vadd.f32 %v2668_v59, %v2654_v40 }
 0x22f   :  { %v2916_v19 = vadd.f32 %v2668_v59, %v2658_v23  ;;  %v2920_v4 = vadd.f32 %v2668_v59, %v2662_v0  ;;  %v2924_v49 = vadd.f32 %v2668_v59, %v2666_v43  ;;  %v2936_v23 = vadd.f32 %v2668_v59, %v2680_v24 }
 0x230   :  { %3861 = vst [vmem:[#allocation5_spill] sm:$0xff] %v2904_v9  ;;  %3862 = vst [vmem:[#allocation7_spill] sm:$0xff] %v2908_v62  ;;  %v3866_v9 = vld [vmem:[#allocation17_spill] sm:$0xff]  ;;  %v3868_v62 = vld [vmem:[#allocation19_spill] sm:$0xff]  ;;  %v2956_v24 = vadd.f32 %v2668_v59, %v2700_v51  ;;  %vm1205_vm4 = vcmp.ge.f32.partialorder %v2724_v38, 0.0  ;;  %vm1206_vm5 = vcmp.ge.f32.partialorder %v2728_v10, 0.0  ;;  %v2981_v51 = vadd.f32 %v2668_v59, %v2716_v8 }
 0x231   :  { %3863 = vst [vmem:[#allocation6_spill] sm:$0xff] %v2916_v19  ;;  %3864 = vst [vmem:[#allocation8_spill] sm:$0xff] %v2920_v4  ;;  %v2928_v21 = vadd.f32 %v2668_v59, %v3866_v9  ;;  %v2932_v40 = vadd.f32 %v2668_v59, %v3868_v62  ;;  %v3870_v19 = vld [vmem:[#allocation24_spill] sm:$0xff]  ;;  %v3872_v4 = vld [vmem:[#allocation2_spill] sm:$0xff]  ;;  %vm1207_vm6 = vcmp.ge.f32.partialorder %v2732_v13, 0.0  ;;  %vm1208_vm7 = vcmp.ge.f32.partialorder %v2736_v17, 0.0 }
 0x232   :  { %3865 = vst [vmem:[#allocation9_spill] sm:$0xff] %v2924_v49  ;;  %3869 = vst [vmem:[#allocation10_spill] sm:$0xff] %v2936_v23  ;;  %v2940_v0 = vadd.f32 %v2668_v59, %v3870_v19  ;;  %v2944_v43 = vadd.f32 %v2668_v59, %v3872_v4  ;;  %v3874_v49 = vld [vmem:[#allocation3_spill] sm:$0xff]  ;;  %v2960_v19 = vadd.f32 %v2668_v59, %v2704_v30  ;;  %vm1209_vm8 = vcmp.ge.f32.partialorder %v2740_v53, 0.0 }
 0x233   :  { %3867 = vst [vmem:[#allocation11_spill] sm:$0xff] %v2928_v21  ;;  %v2948_v9 = vadd.f32 %v2668_v59, %v3874_v49  ;;  %v3876_v21 = vld [vmem:[#allocation4_spill] sm:$0xff]  ;;  %3878 = vst [vmem:[#allocation18_spill] sm:$0xff] %v2956_v24  ;;  %v2964_v4 = vadd.f32 %v2668_v59, %v2708_v48  ;;  %v2968_v49 = vadd.f32 %v2668_v59, %v2712_v54  ;;  %vm1210_vm9 = vcmp.ge.f32.partialorder %v2744_v14, 0.0 }
 0x234   :  { %3871 = vst [vmem:[#allocation12_spill] sm:$0xff] %v2940_v0  ;;  %3873 = vst [vmem:[#allocation13_spill] sm:$0xff] %v2944_v43  ;;  %v2952_v62 = vadd.f32 %v2668_v59, %v3876_v21  ;;  %vm1211_vm10 = vcmp.ge.f32.partialorder %v2748_v27, 0.0  ;;  %vm1212_vm11 = vcmp.ge.f32.partialorder %v2752_v26, 0.0  ;;  %vm1213_vm12 = vcmp.ge.f32.partialorder %v2756_v58, 0.0 }
 0x235   :  { %3875 = vst [vmem:[#allocation15_spill] sm:$0xff] %v2948_v9  ;;  %3879 = vst [vmem:[#allocation20_spill] sm:$0xff] %v2960_v19  ;;  %vm1214_vm13 = vcmp.ge.f32.partialorder %v2760_v25, 0.0  ;;  %v1269_v30 = vmul.f32 0.2, %v2724_v38  ;;  %v2989_v21 = vadd.f32 %v2668_v59, %v2720_v1  ;;  %vm1215_vm14 = vcmp.ge.f32.partialorder %v2764_v41, 0.0 }
 0x236   :  { %3877 = vst [vmem:[#allocation14_spill] sm:$0xff] %v2952_v62  ;;  %3880 = vst [vmem:[#allocation21_spill] sm:$0xff] %v2964_v4  ;;  %v1270_v48 = vmul.f32 0.2, %v2728_v10  ;;  %v1271_v54 = vmul.f32 0.2, %v2732_v13 }
 0x237   :  { %3881 = vst [vmem:[#allocation22_spill] sm:$0xff] %v2968_v49  ;;  %3882 = vst [vmem:[#allocation23_spill] sm:$0xff] %v2981_v51  ;;  %v1272_v49 = vmul.f32 0.2, %v2736_v17  ;;  %v1273_v4 = vmul.f32 0.2, %v2740_v53  ;;  %v1333_v59 = vsel %vm1205_vm4, %v2724_v38, %v1269_v30 }
 0x238   :  { %3883 = vst [vmem:[#allocation25_spill] sm:$0xff] %v2989_v21  ;;  %v1274_v8 = vmul.f32 0.2, %v2744_v14  ;;  %vm1216_vm15 = vcmp.ge.f32.partialorder %v2768_v45, 0.0  ;;  %v1275_v51 = vmul.f32 0.2, %v2748_v27  ;;  %v1334_v9 = vsel %vm1206_vm5, %v2728_v10, %v1270_v48 }
 0x239   :  { %v1276_v19 = vmul.f32 0.2, %v2752_v26  ;;  %v1277_v24 = vmul.f32 0.2, %v2756_v58  ;;  %vm1217_vm0 = vcmp.ge.f32.partialorder %v2772_v44, 0.0  ;;  %1397 = vst.msk [vmem:[%s3721_s5] sm:$0xff] %vm660_vm3, %v1333_v59  ;;  %v1335_v10 = vsel %vm1207_vm6, %v2732_v13, %v1271_v54 }
 0x23a   :  { %v1278_v1 = vmul.f32 0.2, %v2760_v25  ;;  %v3005_v21 = vmul.f32 0.2, %v2764_v41  ;;  %v3008_v62 = vmul.f32 0.2, %v2768_v45  ;;  %v1336_v13 = vsel %vm1208_vm7, %v2736_v17, %v1272_v49 }
 0x23b   :  { %vm1218_vm1 = vcmp.ge.f32.partialorder %v2776_v50, 0.0  ;;  %v3019_v38 = vmul.f32 0.2, %v2772_v44  ;;  %v3022_v30 = vmul.f32 0.2, %v2776_v50  ;;  %1398 = vst.msk [vmem:[%s3721_s5 + $0x8] sm:$0xff] %vm660_vm3, %v1334_v9  ;;  %v1337_v17 = vsel %vm1209_vm8, %v2740_v53, %v1273_v4 }
 0x23c   :  { %v3025_v43 = vmul.f32 0.2, %v2780_v3  ;;  %vm1219_vm2 = vcmp.ge.f32.partialorder %v2780_v3, 0.0  ;;  %v3036_v48 = vmul.f32 0.2, %v2784_v20  ;;  %1399 = vst.msk [vmem:[%s3721_s5 + $0x10] sm:$0xff] %vm660_vm3, %v1335_v10  ;;  %v1338_v53 = vsel %vm1210_vm9, %v2744_v14, %v1274_v8 }
 0x23d   :  { %v3039_v59 = vmul.f32 0.2, %v2788_v60  ;;  %v3042_v0 = vmul.f32 0.2, %v2792_v2  ;;  %vm1220_vm4 = vcmp.ge.f32.partialorder %v2784_v20, 0.0  ;;  %1400 = vst.msk [vmem:[%s3721_s5 + $0x18] sm:$0xff] %vm660_vm3, %v1336_v13  ;;  %v1339_v14 = vsel %vm1211_vm10, %v2748_v27, %v1275_v51 }
 0x23e   :  { %v3053_v9 = vmul.f32 0.2, %v2796_v11  ;;  %v3056_v54 = vmul.f32 0.2, %v2800_v18  ;;  %vm1221_vm5 = vcmp.ge.f32.partialorder %v2788_v60, 0.0  ;;  %1401 = vst.msk [vmem:[%s3721_s5 + $0x20] sm:$0xff] %vm660_vm3, %v1337_v17  ;;  %v1340_v27 = vsel %vm1212_vm11, %v2752_v26, %v1276_v19 }
 0x23f   :  { %3884 = vst [vmem:[#allocation26_spill] sm:$0xff] %v3039_v59  ;;  %v3059_v59 = vmul.f32 0.2, %v2804_v16  ;;  %v3070_v49 = vmul.f32 0.2, %v2808_v22  ;;  %vm1222_vm6 = vcmp.ge.f32.partialorder %v2792_v2, 0.0  ;;  %v1341_v26 = vsel %vm1213_vm12, %v2756_v58, %v1277_v24 }
 0x240   :  { %3885 = vst [vmem:[#allocation27_spill] sm:$0xff] %v3056_v54  ;;  %v3073_v10 = vmul.f32 0.2, %v2812_v31  ;;  %v3076_v54 = vmul.f32 0.2, %v2816_v39  ;;  %1402 = vst.msk [vmem:[%s3721_s5 + $0x28] sm:$0xff] %vm660_vm3, %v1338_v53  ;;  %v1342_v24 = vsel %vm1214_vm13, %v2760_v25, %v1278_v1  ;;  %v1343_v1 = vsel %vm1215_vm14, %v2764_v41, %v3005_v21 }
 0x241   :  { %v3087_v4 = vmul.f32 0.2, %v2820_v36  ;;  %v3090_v13 = vmul.f32 0.2, %v2824_v46  ;;  %vm1223_vm7 = vcmp.ge.f32.partialorder %v2796_v11, 0.0  ;;  %1403 = vst.msk [vmem:[%s3721_s5 + $0x30] sm:$0xff] %vm660_vm3, %v1339_v14  ;;  %v1344_v21 = vsel %vm1216_vm15, %v2768_v45, %v3008_v62 }
 0x242   :  { %3886 = vst [vmem:[#allocation28_spill] sm:$0xff] %v3073_v10  ;;  %v3093_v10 = vmul.f32 0.2, %v2828_v57  ;;  %v3104_v8 = vmul.f32 0.2, %v2832_v7  ;;  %1404 = vst.msk [vmem:[%s3721_s5 + $0x38] sm:$0xff] %vm660_vm3, %v1340_v27  ;;  %v1345_v62 = vsel %vm1217_vm0, %v2772_v44, %v3019_v38  ;;  %v1346_v38 = vsel %vm1218_vm1, %v2776_v50, %v3022_v30 }
 0x243   :  { %3887 = vst [vmem:[#allocation16_spill] sm:$0xff] %v3090_v13  ;;  %v3107_v17 = vmul.f32 0.2, %v2836_v5  ;;  %v3110_v13 = vmul.f32 0.2, %v2840_v12  ;;  %vm1227_vm11 = vcmp.ge.f32.partialorder %v2812_v31, 0.0 }
 0x244   :  { %v3123_v51 = vmul.f32 0.2, %v2844_v63  ;;  %v3126_v53 = vmul.f32 0.2, %v2848_v56  ;;  %v3143_v19 = vmul.f32 0.2, %v2856_v55 }
 0x245   :  { %3888 = vst [vmem:[#allocation17_spill] sm:$0xff] %v3110_v13  ;;  %v3129_v13 = vmul.f32 0.2, %v2852_v37  ;;  %v3146_v14 = vmul.f32 0.2, %v2860_v47  ;;  %1405 = vst.msk [vmem:[%s3721_s5 + $0x40] sm:$0xff] %vm660_vm3, %v1341_v26 }
 0x246   :  { %v3149_v58 = vmul.f32 0.2, %v2864_v34  ;;  %vm1231_vm12 = vcmp.ge.f32.partialorder %v2828_v57, 0.0  ;;  %v3163_v27 = vmul.f32 0.2, %v2868_v42  ;;  %1406 = vst.msk [vmem:[%s3721_s5 + $0x48] sm:$0xff] %vm660_vm3, %v1342_v24 }
 0x247   :  { %v3169_v25 = vmul.f32 0.2, %v2876_v52  ;;  %vm1235_vm13 = vcmp.ge.f32.partialorder %v2844_v63, 0.0  ;;  %v3184_v26 = vmul.f32 0.2, %v2880_v29  ;;  %1407 = vst.msk [vmem:[%s3721_s5 + $0x50] sm:$0xff] %vm660_vm3, %v1343_v1 }
 0x248   :  { %3889 = vst [vmem:[#allocation19_spill] sm:$0xff] %v3149_v58  ;;  %v3166_v58 = vmul.f32 0.2, %v2872_v35  ;;  %v3190_v41 = vmul.f32 0.2, %v2888_v15  ;;  %vm1239_vm14 = vcmp.ge.f32.partialorder %v2860_v47, 0.0 }
 0x249   :  { %3890 = vst [vmem:[#allocation24_spill] sm:$0xff] %v3169_v25  ;;  %v3187_v25 = vmul.f32 0.2, %v2884_v6  ;;  %v3205_v24 = vmul.f32 0.2, %v2892_v28  ;;  %1408 = vst.msk [vmem:[%s3721_s5 + $0x58] sm:$0xff] %vm660_vm3, %v1344_v21 }
 0x24a   :  { %3891 = vst [vmem:[#allocation2_spill] sm:$0xff] %v3190_v41  ;;  %v3208_v41 = vmul.f32 0.2, %v2896_v33  ;;  %v3211_v45 = vmul.f32 0.2, %v2900_v61  ;;  %vm1243_vm15 = vcmp.ge.f32.partialorder %v2876_v52, 0.0 }
 0x24b   :  { %3892 = vst [vmem:[#allocation3_spill] sm:$0xff] %v3205_v24  ;;  %v3895_v1 = vld [vmem:[#allocation5_spill] sm:$0xff]  ;;  %v3232_v44 = vmul.f32 0.2, %v2912_v32  ;;  %1409 = vst.msk [vmem:[%s3721_s5 + $0x60] sm:$0xff] %vm660_vm3, %v1345_v62  ;;  %vm1247_vm0 = vcmp.ge.f32.partialorder %v2892_v28, 0.0  ;;  %v1347_v62 = vsel %vm1219_vm2, %v2780_v3, %v3025_v43  ;;  %v1348_v43 = vsel %vm1220_vm4, %v2784_v20, %v3036_v48 }
 0x24c   :  { %3893 = vst [vmem:[#allocation4_spill] sm:$0xff] %v3208_v41  ;;  %3894 = vst [vmem:[#allocation29_spill] sm:$0xff] %v3211_v45  ;;  %v3226_v45 = vmul.f32 0.2, %v3895_v1  ;;  %v3897_v41 = vld [vmem:[#allocation7_spill] sm:$0xff]  ;;  %v3900_v21 = vld [vmem:[#allocation6_spill] sm:$0xff] }
 0x24d   :  { %v3229_v24 = vmul.f32 0.2, %v3897_v41  ;;  %3899 = vst [vmem:[#allocation30_spill] sm:$0xff] %v3232_v44  ;;  %v3247_v44 = vmul.f32 0.2, %v3900_v21  ;;  %v3904_v50 = vld [vmem:[#allocation9_spill] sm:$0xff] }
 0x24e   :  { %3896 = vst [vmem:[#allocation5_spill] sm:$0xff] %v3226_v45  ;;  %v3253_v30 = vmul.f32 0.2, %v3904_v50  ;;  %1410 = vst.msk [vmem:[%s3721_s5 + $0x68] sm:$0xff] %vm660_vm3, %v1346_v38  ;;  %vm1251_vm1 = vcmp.ge.f32.partialorder %v3897_v41, 0.0  ;;  %vm1255_vm2 = vcmp.ge.f32.partialorder %v3904_v50, 0.0 }
 0x24f   :  { %3898 = vst [vmem:[#allocation7_spill] sm:$0xff] %v3229_v24  ;;  %3901 = vst [vmem:[#allocation6_spill] sm:$0xff] %v3247_v44  ;;  %v3902_v24 = vld [vmem:[#allocation8_spill] sm:$0xff]  ;;  %v3271_v44 = vmul.f32 0.2, %v2932_v40  ;;  %v3914_v20 = vld [vmem:[#allocation15_spill] sm:$0xff] }
 0x250   :  { %v3250_v45 = vmul.f32 0.2, %v3902_v24  ;;  %3905 = vst [vmem:[#allocation9_spill] sm:$0xff] %v3253_v30  ;;  %v3274_v3 = vmul.f32 0.2, %v2936_v23  ;;  %1411 = vst.msk [vmem:[%s3721_s5 + $0x70] sm:$0xff] %vm660_vm3, %v1347_v62 }
 0x251   :  { %3908 = vst [vmem:[#allocation32_spill] sm:$0xff] %v3271_v44  ;;  %v3910_v38 = vld [vmem:[#allocation12_spill] sm:$0xff]  ;;  %v3912_v44 = vld [vmem:[#allocation13_spill] sm:$0xff]  ;;  %v3295_v48 = vmul.f32 0.2, %v3914_v20  ;;  %v3916_v24 = vld [vmem:[#allocation26_spill] sm:$0xff] }
 0x252   :  { %3903 = vst [vmem:[#allocation31_spill] sm:$0xff] %v3250_v45  ;;  %v3906_v45 = vld [vmem:[#allocation11_spill] sm:$0xff]  ;;  %3909 = vst [vmem:[#allocation33_spill] sm:$0xff] %v3274_v3  ;;  %v3289_v3 = vmul.f32 0.2, %v3910_v38  ;;  %v1349_v62 = vsel %vm1221_vm5, %v2788_v60, %v3916_v24  ;;  %vm1259_vm4 = vcmp.ge.f32.partialorder %v3910_v38, 0.0 }
 0x253   :  { %v3268_v30 = vmul.f32 0.2, %v3906_v45  ;;  %3915 = vst [vmem:[#allocation15_spill] sm:$0xff] %v3295_v48  ;;  %1412 = vst.msk [vmem:[%s3721_s5 + $0x78] sm:$0xff] %vm660_vm3, %v1348_v43  ;;  %v3921_v60 = vld [vmem:[#allocation20_spill] sm:$0xff]  ;;  %v1350_v43 = vsel %vm1222_vm6, %v2792_v2, %v3042_v0  ;;  %v3926_v2 = vld [vmem:[#allocation23_spill] sm:$0xff] }
 0x254   :  { %3911 = vst [vmem:[#allocation12_spill] sm:$0xff] %v3289_v3  ;;  %v3919_v3 = vld [vmem:[#allocation18_spill] sm:$0xff]  ;;  %v3316_v24 = vmul.f32 0.2, %v3921_v60  ;;  %1413 = vst.msk [vmem:[%s3721_s5 + $0x80] sm:$0xff] %vm660_vm3, %v1349_v62  ;;  %v1351_v62 = vsel %vm1223_vm7, %v2796_v11, %v3053_v9  ;;  %vm1267_vm6 = vcmp.ge.f32.partialorder %v3926_v2, 0.0 }
 0x255   :  { %3907 = vst [vmem:[#allocation11_spill] sm:$0xff] %v3268_v30  ;;  %v3292_v30 = vmul.f32 0.2, %v3912_v44  ;;  %v3313_v23 = vmul.f32 0.2, %v3919_v3  ;;  %vm1263_vm5 = vcmp.ge.f32.partialorder %v3919_v3, 0.0 }
 0x256   :  { %3922 = vst [vmem:[#allocation20_spill] sm:$0xff] %v3316_v24  ;;  %v3337_v0 = vmul.f32 0.2, %v3926_v2  ;;  %1414 = vst.msk [vmem:[%s3721_s5 + $0x88] sm:$0xff] %vm660_vm3, %v1350_v43  ;;  %vm3930_vm9 = vcmp.ge.f32.partialorder %v2800_v18, 0.0  ;;  %vm3931_vm7 = vcmp.ge.f32.partialorder %v2804_v16, 0.0 }
 0x257   :  { %3913 = vst [vmem:[#allocation13_spill] sm:$0xff] %v3292_v30  ;;  %v3917_v30 = vld [vmem:[#allocation14_spill] sm:$0xff]  ;;  %3920 = vst [vmem:[#allocation18_spill] sm:$0xff] %v3313_v23  ;;  %v1353_v11 = vsel %vm3931_vm7, %v2804_v16, %v3059_v59  ;;  %vm3932_vm8 = vcmp.ge.f32.partialorder %v2808_v22, 0.0  ;;  %v3933_v43 = vld [vmem:[#allocation28_spill] sm:$0xff]  ;;  %vm3935_vm7 = vcmp.ge.f32.partialorder %v2820_v36, 0.0 }
 0x258   :  { %v3310_v48 = vmul.f32 0.2, %v3917_v30  ;;  %v3923_v30 = vld [vmem:[#allocation21_spill] sm:$0xff]  ;;  %v3924_v23 = vld [vmem:[#allocation22_spill] sm:$0xff]  ;;  %3927 = vst [vmem:[#allocation23_spill] sm:$0xff] %v3337_v0  ;;  %v1354_v9 = vsel %vm3932_vm8, %v2808_v22, %v3070_v49  ;;  %1415 = vst.msk [vmem:[%s3721_s5 + $0x90] sm:$0xff] %vm660_vm3, %v1351_v62  ;;  %v1357_v22 = vsel %vm3935_vm7, %v2820_v36, %v3087_v4 }
 0x259   :  { %v3331_v24 = vmul.f32 0.2, %v3923_v30  ;;  %v3928_v30 = vld [vmem:[#allocation25_spill] sm:$0xff]  ;;  %v3936_v59 = vld [vmem:[#allocation16_spill] sm:$0xff]  ;;  %vm3937_vm8 = vcmp.ge.f32.partialorder %v2824_v46, 0.0  ;;  %1417 = vst.msk [vmem:[%s3721_s5 + $0xa0] sm:$0xff] %vm660_vm3, %v1353_v11 }
 0x25a   :  { %3918 = vst [vmem:[#allocation26_spill] sm:$0xff] %v3310_v48  ;;  %v3334_v48 = vmul.f32 0.2, %v3924_v23  ;;  %vm1268_vm10 = vcmp.ge.f32.partialorder %v3928_v30, 0.0  ;;  %v3350_v23 = vmul.f32 0.2, %v3928_v30  ;;  %v1358_v49 = vsel %vm3937_vm8, %v2824_v46, %v3936_v59 }
 0x25b   :  { %1418 = vst.msk [vmem:[%s3721_s5 + $0xa8] sm:$0xff] %vm660_vm3, %v1354_v9  ;;  %v3940_v46 = vld [vmem:[#allocation17_spill] sm:$0xff]  ;;  %vm3941_vm7 = vcmp.ge.f32.partialorder %v2840_v12, 0.0  ;;  %1421 = vst.msk [vmem:[%s3721_s5 + $0xc0] sm:$0xff] %vm660_vm3, %v1357_v22  ;;  %vm3943_vm8 = vcmp.ge.f32.partialorder %v2852_v37, 0.0  ;;  %v3952_v4 = vld [vmem:[#allocation2_spill] sm:$0xff] }
 0x25c   :  { %3925 = vst [vmem:[#allocation34_spill] sm:$0xff] %v3334_v48  ;;  %v3929_v48 = vld [vmem:[#allocation27_spill] sm:$0xff]  ;;  %1422 = vst.msk [vmem:[%s3721_s5 + $0xc8] sm:$0xff] %vm660_vm3, %v1358_v49  ;;  %v3974_v62 = vld [vmem:[#allocation33_spill] sm:$0xff] }
 0x25d   :  { %v1352_v0 = vsel %vm3930_vm9, %v2800_v18, %v3929_v48  ;;  %v1355_v18 = vsel %vm1227_vm11, %v2812_v31, %v3933_v43  ;;  %vm3934_vm9 = vcmp.ge.f32.partialorder %v2816_v39, 0.0  ;;  %v1359_v31 = vsel %vm1231_vm12, %v2828_v57, %v3093_v10  ;;  %v3972_v48 = vld [vmem:[#allocation32_spill] sm:$0xff]  ;;  %v3975_v11 = vld [vmem:[#allocation10_spill] sm:$0xff] }
 0x25e   :  { %v1356_v16 = vsel %vm3934_vm9, %v2816_v39, %v3076_v54  ;;  %1416 = vst.msk [vmem:[%s3721_s5 + $0x98] sm:$0xff] %vm660_vm3, %v1352_v0  ;;  %vm3938_vm11 = vcmp.ge.f32.partialorder %v2832_v7, 0.0  ;;  %vm3939_vm9 = vcmp.ge.f32.partialorder %v2836_v5, 0.0  ;;  %v1362_v54 = vsel %vm3941_vm7, %v2840_v12, %v3940_v46  ;;  %1419 = vst.msk [vmem:[%s3721_s5 + $0xb0] sm:$0xff] %vm660_vm3, %v1355_v18  ;;  %v3980_v18 = vld [vmem:[#allocation15_spill] sm:$0xff]  ;;  %v3983_v59 = vld [vmem:[#allocation14_spill] sm:$0xff] }
 0x25f   :  { %v1360_v39 = vsel %vm3938_vm11, %v2832_v7, %v3104_v8  ;;  %v1361_v36 = vsel %vm3939_vm9, %v2836_v5, %v3107_v17  ;;  %1420 = vst.msk [vmem:[%s3721_s5 + $0xb8] sm:$0xff] %vm660_vm3, %v1356_v16  ;;  %v1363_v57 = vsel %vm1235_vm13, %v2844_v63, %v3123_v51  ;;  %vm3942_vm12 = vcmp.ge.f32.partialorder %v2848_v56, 0.0  ;;  %1423 = vst.msk [vmem:[%s3721_s5 + $0xd0] sm:$0xff] %vm660_vm3, %v1359_v31  ;;  %v3957_v8 = vld [vmem:[#allocation29_spill] sm:$0xff] }
 0x260   :  { %v1364_v7 = vsel %vm3942_vm12, %v2848_v56, %v3126_v53  ;;  %v1365_v5 = vsel %vm3943_vm8, %v2852_v37, %v3129_v13  ;;  %vm3944_vm11 = vcmp.ge.f32.partialorder %v2856_v55, 0.0  ;;  %1424 = vst.msk [vmem:[%s3721_s5 + $0xd8] sm:$0xff] %vm660_vm3, %v1360_v39  ;;  %1425 = vst.msk [vmem:[%s3721_s5 + $0xe0] sm:$0xff] %vm660_vm3, %v1361_v36  ;;  %v1367_v63 = vsel %vm1239_vm14, %v2860_v47, %v3146_v14  ;;  %v3945_v56 = vld [vmem:[#allocation19_spill] sm:$0xff]  ;;  %v3949_v47 = vld [vmem:[#allocation24_spill] sm:$0xff] }
 0x261   :  { %v1366_v12 = vsel %vm3944_vm11, %v2856_v55, %v3143_v19  ;;  %1426 = vst.msk [vmem:[%s3721_s5 + $0xe8] sm:$0xff] %vm660_vm3, %v1362_v54  ;;  %vm3946_vm13 = vcmp.ge.f32.partialorder %v2864_v34, 0.0  ;;  %vm3947_vm9 = vcmp.ge.f32.partialorder %v2868_v42, 0.0  ;;  %vm3948_vm7 = vcmp.ge.f32.partialorder %v2872_v35, 0.0  ;;  %1427 = vst.msk [vmem:[%s3721_s5 + $0xf0] sm:$0xff] %vm660_vm3, %v1363_v57  ;;  %v3959_v51 = vld [vmem:[#allocation5_spill] sm:$0xff] }
 0x262   :  { %v1368_v37 = vsel %vm3946_vm13, %v2864_v34, %v3945_v56  ;;  %v1369_v55 = vsel %vm3947_vm9, %v2868_v42, %v3163_v27  ;;  %v1370_v10 = vsel %vm3948_vm7, %v2872_v35, %v3166_v58  ;;  %1428 = vst.msk [vmem:[%s3721_s5 + $0xf8] sm:$0xff] %vm660_vm3, %v1364_v7  ;;  %1429 = vst.msk [vmem:[%s3721_s5 + $0x100] sm:$0xff] %vm660_vm3, %v1365_v5  ;;  %vm3950_vm14 = vcmp.ge.f32.partialorder %v2880_v29, 0.0  ;;  %v3964_v14 = vld [vmem:[#allocation6_spill] sm:$0xff]  ;;  %v3966_v27 = vld [vmem:[#allocation31_spill] sm:$0xff] }
 0x263   :  { %1430 = vst.msk [vmem:[%s3721_s5 + $0x108] sm:$0xff] %vm660_vm3, %v1366_v12  ;;  %v1371_v34 = vsel %vm1243_vm15, %v2876_v52, %v3949_v47  ;;  %v1372_v42 = vsel %vm3950_vm14, %v2880_v29, %v3184_v26  ;;  %vm3951_vm12 = vcmp.ge.f32.partialorder %v2884_v6, 0.0  ;;  %vm3953_vm8 = vcmp.ge.f32.partialorder %v2888_v15, 0.0  ;;  %1431 = vst.msk [vmem:[%s3721_s5 + $0x110] sm:$0xff] %vm660_vm3, %v1367_v63  ;;  %v3954_v52 = vld [vmem:[#allocation3_spill] sm:$0xff]  ;;  %v3982_v22 = vld [vmem:[#allocation26_spill] sm:$0xff] }
 0x264   :  { %v1373_v35 = vsel %vm3951_vm12, %v2884_v6, %v3187_v25  ;;  %v1374_v13 = vsel %vm3953_vm8, %v2888_v15, %v3952_v4  ;;  %1432 = vst.msk [vmem:[%s3721_s5 + $0x118] sm:$0xff] %vm660_vm3, %v1368_v37  ;;  %1433 = vst.msk [vmem:[%s3721_s5 + $0x120] sm:$0xff] %vm660_vm3, %v1369_v55  ;;  %v1375_v29 = vsel %vm1247_vm0, %v2892_v28, %v3954_v52  ;;  %v3955_v6 = vld [vmem:[#allocation4_spill] sm:$0xff]  ;;  %vm3956_vm15 = vcmp.ge.f32.partialorder %v2896_v33, 0.0  ;;  %v3961_v28 = vld [vmem:[#allocation7_spill] sm:$0xff] }
 0x265   :  { %1434 = vst.msk [vmem:[%s3721_s5 + $0x128] sm:$0xff] %vm660_vm3, %v1370_v10  ;;  %v1376_v15 = vsel %vm3956_vm15, %v2896_v33, %v3955_v6  ;;  %vm3958_vm11 = vcmp.ge.f32.partialorder %v2900_v61, 0.0  ;;  %vm3960_vm13 = vcmp.ge.f32.partialorder %v3895_v1, 0.0  ;;  %1435 = vst.msk [vmem:[%s3721_s5 + $0x130] sm:$0xff] %vm660_vm3, %v1371_v34  ;;  %v1379_v33 = vsel %vm1251_vm1, %v3897_v41, %v3961_v28  ;;  %v3967_v25 = vld [vmem:[#allocation8_spill] sm:$0xff]  ;;  %v3988_v39 = vld [vmem:[#allocation21_spill] sm:$0xff] }
 0x266   :  { %v1377_v17 = vsel %vm3958_vm11, %v2900_v61, %v3957_v8  ;;  %v1378_v53 = vsel %vm3960_vm13, %v3895_v1, %v3959_v51  ;;  %1436 = vst.msk [vmem:[%s3721_s5 + $0x138] sm:$0xff] %vm660_vm3, %v1372_v42  ;;  %1437 = vst.msk [vmem:[%s3721_s5 + $0x140] sm:$0xff] %vm660_vm3, %v1373_v35  ;;  %v3962_v61 = vld [vmem:[#allocation30_spill] sm:$0xff]  ;;  %vm3963_vm0 = vcmp.ge.f32.partialorder %v2912_v32, 0.0  ;;  %vm3965_vm9 = vcmp.ge.f32.partialorder %v3900_v21, 0.0  ;;  %v3970_v1 = vld [vmem:[#allocation11_spill] sm:$0xff] }
 0x267   :  { %1438 = vst.msk [vmem:[%s3721_s5 + $0x148] sm:$0xff] %vm660_vm3, %v1374_v13  ;;  %v1380_v19 = vsel %vm3963_vm0, %v2912_v32, %v3962_v61  ;;  %v1381_v58 = vsel %vm3965_vm9, %v3900_v21, %v3964_v14  ;;  %vm3968_vm7 = vcmp.ge.f32.partialorder %v3967_v25, 0.0  ;;  %1439 = vst.msk [vmem:[%s3721_s5 + $0x150] sm:$0xff] %vm660_vm3, %v1375_v29  ;;  %v3969_v32 = vld [vmem:[#allocation9_spill] sm:$0xff]  ;;  %vm3971_vm1 = vcmp.ge.f32.partialorder %v3906_v45, 0.0  ;;  %v3990_v46 = vld [vmem:[#allocation34_spill] sm:$0xff] }
 0x268   :  { %v1382_v26 = vsel %vm3968_vm7, %v3967_v25, %v3966_v27  ;;  %1440 = vst.msk [vmem:[%s3721_s5 + $0x158] sm:$0xff] %vm660_vm3, %v1376_v15  ;;  %1441 = vst.msk [vmem:[%s3721_s5 + $0x160] sm:$0xff] %vm660_vm3, %v1377_v17  ;;  %v1383_v41 = vsel %vm1255_vm2, %v3904_v50, %v3969_v32  ;;  %v1384_v21 = vsel %vm3971_vm1, %v3906_v45, %v3970_v1  ;;  %vm3973_vm14 = vcmp.ge.f32.partialorder %v2932_v40, 0.0  ;;  %v3978_v50 = vld [vmem:[#allocation13_spill] sm:$0xff]  ;;  %v3991_v54 = vld [vmem:[#allocation22_spill] sm:$0xff] }
 0x269   :  { %1442 = vst.msk [vmem:[%s3721_s5 + $0x168] sm:$0xff] %vm660_vm3, %v1378_v53  ;;  %v1385_v0 = vsel %vm3973_vm14, %v2932_v40, %v3972_v48  ;;  %vm3976_vm12 = vcmp.ge.f32.partialorder %v3975_v11, 0.0  ;;  %1443 = vst.msk [vmem:[%s3721_s5 + $0x170] sm:$0xff] %vm660_vm3, %v1379_v33  ;;  %v3977_v40 = vld [vmem:[#allocation12_spill] sm:$0xff]  ;;  %vm3979_vm2 = vcmp.ge.f32.partialorder %v3912_v44, 0.0  ;;  %vm3981_vm8 = vcmp.ge.f32.partialorder %v3914_v20, 0.0 }
 0x26a   :  { %v1386_v9 = vsel %vm3976_vm12, %v3975_v11, %v3974_v62  ;;  %1444 = vst.msk [vmem:[%s3721_s5 + $0x178] sm:$0xff] %vm660_vm3, %v1380_v19  ;;  %1445 = vst.msk [vmem:[%s3721_s5 + $0x180] sm:$0xff] %vm660_vm3, %v1381_v58  ;;  %v1387_v45 = vsel %vm1259_vm4, %v3910_v38, %v3977_v40  ;;  %v1388_v43 = vsel %vm3979_vm2, %v3912_v44, %v3978_v50  ;;  %vm3984_vm15 = vcmp.ge.f32.partialorder %v3983_v59, 0.0  ;;  %v3985_v44 = vld [vmem:[#allocation18_spill] sm:$0xff] }
 0x26b   :  { %1446 = vst.msk [vmem:[%s3721_s5 + $0x188] sm:$0xff] %vm660_vm3, %v1382_v26  ;;  %v1389_v16 = vsel %vm3981_vm8, %v3914_v20, %v3980_v18  ;;  %v1390_v49 = vsel %vm3984_vm15, %v3983_v59, %v3982_v22  ;;  %1447 = vst.msk [vmem:[%s3721_s5 + $0x190] sm:$0xff] %vm660_vm3, %v1383_v41  ;;  %v1391_v38 = vsel %vm1263_vm5, %v3919_v3, %v3985_v44  ;;  %v3986_v20 = vld [vmem:[#allocation20_spill] sm:$0xff]  ;;  %vm3987_vm4 = vcmp.ge.f32.partialorder %v3921_v60, 0.0  ;;  %v3993_v3 = vld [vmem:[#allocation23_spill] sm:$0xff] }
 0x26c   :  { %1448 = vst.msk [vmem:[%s3721_s5 + $0x198] sm:$0xff] %vm660_vm3, %v1384_v21  ;;  %1449 = vst.msk [vmem:[%s3721_s5 + $0x1a0] sm:$0xff] %vm660_vm3, %v1385_v0  ;;  %v1392_v31 = vsel %vm3987_vm4, %v3921_v60, %v3986_v20  ;;  %vm3989_vm11 = vcmp.ge.f32.partialorder %v3988_v39, 0.0  ;;  %vm3992_vm13 = vcmp.ge.f32.partialorder %v3991_v54, 0.0  ;;  %v1395_v60 = vsel %vm1267_vm6, %v3926_v2, %v3993_v3 }
 0x26d   :  { %1450 = vst.msk [vmem:[%s3721_s5 + $0x1a8] sm:$0xff] %vm660_vm3, %v1386_v9  ;;  %v1393_v36 = vsel %vm3989_vm11, %v3988_v39, %v3331_v24  ;;  %v1394_v57 = vsel %vm3992_vm13, %v3991_v54, %v3990_v46  ;;  %1451 = vst.msk [vmem:[%s3721_s5 + $0x1b0] sm:$0xff] %vm660_vm3, %v1387_v45  ;;  %v1396_v24 = vsel %vm1268_vm10, %v3928_v30, %v3350_v23 }
 0x26e   :  { %1452 = vst.msk [vmem:[%s3721_s5 + $0x1b8] sm:$0xff] %vm660_vm3, %v1388_v43  ;;  %1453 = vst.msk [vmem:[%s3721_s5 + $0x1c0] sm:$0xff] %vm660_vm3, %v1389_v16 }
 0x26f   :  { %1454 = vst.msk [vmem:[%s3721_s5 + $0x1c8] sm:$0xff] %vm660_vm3, %v1390_v49  ;;  %1455 = vst.msk [vmem:[%s3721_s5 + $0x1d0] sm:$0xff] %vm660_vm3, %v1391_v38 }
 0x270   :  { %1456 = vst.msk [vmem:[%s3721_s5 + $0x1d8] sm:$0xff] %vm660_vm3, %v1392_v31  ;;  %1457 = vst.msk [vmem:[%s3721_s5 + $0x1e0] sm:$0xff] %vm660_vm3, %v1393_v36 }
 0x271   :  { %1458 = vst.msk [vmem:[%s3721_s5 + $0x1e8] sm:$0xff] %vm660_vm3, %v1394_v57  ;;  %1459 = vst.msk [vmem:[%s3721_s5 + $0x1f0] sm:$0xff] %vm660_vm3, %v1395_v60 }
 0x272   :  { %1460 = vst.msk [vmem:[%s3721_s5 + $0x1f8] sm:$0xff] %vm660_vm3, %v1396_v24 }

// kernel: convnet_aae_forward.9
= control target key start
LH: loop header
LB: loop body
LE: loop exit
PB: predicated region body
PF: predicated region fallthrough
CT: control target
= control target key end

     0   :  { %v627_v0 = vmov 0   ;;  %vm188_vm0 = vcmask 130048   ;;  %vm985_vm1 = vcmask 261120   ;;  %vm986_vm14 = vcmask 261120   ;;  %s979_s1 = inlined_call_operand.vmem [shape: bf16[144,32], index: 1, kind: input, shape index: {}]   ;;  %s980_s0 = inlined_call_operand.vmem [shape: bf16[128,144], index: 0, kind: input, shape index: {}]   ;;  %s981_s2 = inlined_call_operand.vmem [shape: f32[1,32], index: 2, kind: input, shape index: {}]   ;;  %s982_s3 = inlined_call_operand.vmem [shape: f32[1,32], index: 3, kind: input, shape index: {}]   ;;  %s983_s4 = inlined_call_operand.vmem [shape: f32[1,32], index: 4, kind: input, shape index: {}]   ;;  %s984_s5 = inlined_call_operand.vmem [shape: f32[128,32], index: 5, kind: output, shape index: {}]  }
   0x1   :  { %213 = vmatprep.subr.bf16.mxu0 %v627_v0  ;;  %v592_v1 = vld [vmem:[%s979_s1] sm:$0xff]   ;;  %573 = vmatprep.subr.bf16.mxu1 %v627_v0  ;;  %v593_v2 = vld [vmem:[%s979_s1 + $0x8] sm:$0xff]   ;;  %v594_v3 = vld [vmem:[%s979_s1 + $0x10] sm:$0xff]  }
   0x2   :  { %214 = vmatpush1.bf16.msra.mxu0 %v592_v1  ;;  %582 = vmatpush1.bf16.msra.mxu1 %v592_v1  ;;  %v595_v4 = vld [vmem:[%s979_s1 + $0x18] sm:$0xff]   ;;  %v603_v5 = vld [vmem:[%s980_s0 + $0x4] ss:$8 sps:$4 sm:$0xff]   ;;  %v598_v9 = vld [vmem:[%s979_s1 + $0x30] sm:$0xff]  }
   0x3   :  { %215 = vmatprep.subr.bf16.mxu0 %v627_v0  ;;  %574 = vmatprep.subr.bf16.mxu1 %v627_v0  ;;  %v609_v6 = vld [vmem:[%s980_s0 + $0x44] ss:$8 sps:$4 sm:$0xff]   ;;  %v599_v10 = vld [vmem:[%s979_s1 + $0x38] sm:$0xff]   ;;  %v601_v12 = vld [vmem:[%s980_s0] ss:$8 sps:$4 sm:$0xff]  }
   0x4   :  { %565 = vmatprep.mubr.msk.bf16.mxu0 %vm188_vm0, %v603_v5  ;;  %v596_v7 = vld [vmem:[%s979_s1 + $0x20] sm:$0xff]   ;;  %569 = vmatprep.mubr.msk.bf16.mxu1 %vm188_vm0, %v609_v6  ;;  %v597_v8 = vld [vmem:[%s979_s1 + $0x28] sm:$0xff]   ;;  %v604_v14 = vld [vmem:[%s980_s0 + $0x14] ss:$8 sps:$4 sm:$0xff]  }
   0x5   :  { %v600_v11 = vld [vmem:[%s979_s1 + $0x40] sm:$0xff]   ;;  %v613_v15 = vld [vmem:[%s980_s0 + $0x54] ss:$8 sps:$4 sm:$0xff]   ;;  %v606_v16 = vld [vmem:[%s980_s0 + $0x10] ss:$8 sps:$4 sm:$0xff]  }
   0x6   :  { %216 = vmatpush1.bf16.msra.mxu0 %v593_v2  ;;  %583 = vmatpush1.bf16.msra.mxu1 %v593_v2  ;;  %v607_v13 = vld [vmem:[%s980_s0 + $0x40] ss:$8 sps:$4 sm:$0xff]   ;;  %v615_v17 = vld [vmem:[%s980_s0 + $0x50] ss:$8 sps:$4 sm:$0xff]   ;;  %v610_v18 = vld [vmem:[%s980_s0 + $0x24] ss:$8 sps:$4 sm:$0xff]  }
   0x7   :  { %217 = vmatprep.subr.bf16.mxu0 %v627_v0  ;;  %575 = vmatprep.subr.bf16.mxu1 %v627_v0  ;;  %v619_v19 = vld [vmem:[%s980_s0 + $0x64] ss:$8 sps:$4 sm:$0xff]   ;;  %v612_v20 = vld [vmem:[%s980_s0 + $0x20] ss:$8 sps:$4 sm:$0xff]   ;;  %v616_v22 = vld [vmem:[%s980_s0 + $0x34] ss:$8 sps:$4 sm:$0xff]  }
   0x8   :  { %v621_v21 = vld [vmem:[%s980_s0 + $0x60] ss:$8 sps:$4 sm:$0xff]   ;;  %v622_v23 = vld [vmem:[%s980_s0 + $0x74] ss:$8 sps:$4 sm:$0xff]   ;;  %v618_v24 = vld [vmem:[%s980_s0 + $0x30] ss:$8 sps:$4 sm:$0xff]  }
   0x9   :  { %v624_v25 = vld [vmem:[%s980_s0 + $0x70] ss:$8 sps:$4 sm:$0xff]   ;;  %v744_v34 = vld [vmem:[%s981_s2] ss:$0 sm:$0xff] }
   0xa   :  { %218 = vmatpush1.bf16.msra.mxu0 %v594_v3  ;;  %584 = vmatpush1.bf16.msra.mxu1 %v594_v3 }
   0xb   :  { %219 = vmatprep.subr.bf16.mxu0 %v627_v0  ;;  %576 = vmatprep.subr.bf16.mxu1 %v627_v0 }
   0xe   :  { %220 = vmatpush1.bf16.msra.mxu0 %v595_v4  ;;  %585 = vmatpush1.bf16.msra.mxu1 %v595_v4 }
   0xf   :  { %221 = vmatprep.subr.bf16.mxu0 %v627_v0  ;;  %577 = vmatprep.subr.bf16.mxu1 %v627_v0 }
  0x12   :  { %222 = vmatpush1.bf16.msra.mxu0 %v596_v7  ;;  %586 = vmatpush1.bf16.msra.mxu1 %v596_v7 }
  0x13   :  { %223 = vmatprep.subr.bf16.mxu0 %v627_v0  ;;  %578 = vmatprep.subr.bf16.mxu1 %v627_v0 }
  0x16   :  { %224 = vmatpush1.bf16.msra.mxu0 %v597_v8  ;;  %587 = vmatpush1.bf16.msra.mxu1 %v597_v8 }
  0x17   :  { %225 = vmatprep.subr.bf16.mxu0 %v627_v0  ;;  %579 = vmatprep.subr.bf16.mxu1 %v627_v0 }
  0x1a   :  { %226 = vmatpush1.bf16.msra.mxu0 %v598_v9  ;;  %588 = vmatpush1.bf16.msra.mxu1 %v598_v9 }
  0x1b   :  { %227 = vmatprep.subr.bf16.mxu0 %v627_v0  ;;  %580 = vmatprep.subr.bf16.mxu1 %v627_v0 }
  0x1e   :  { %228 = vmatpush1.bf16.msra.mxu0 %v599_v10  ;;  %589 = vmatpush1.bf16.msra.mxu1 %v599_v10 }
  0x1f   :  { %229 = vmatprep.subr.bf16.mxu0 %v627_v0  ;;  %581 = vmatprep.subr.bf16.mxu1 %v627_v0 }
  0x22   :  { %230 = vmatpush1.bf16.msra.mxu0 %v600_v11  ;;  %590 = vmatpush1.bf16.msra.mxu1 %v600_v11 }
  0x25   :  { %246 = vmatmul.mubr.bf16.vlgmr.msra.gmra.mrb[0].mxu0 %v601_v12  ;;  %278 = vmatmul.mubr.bf16.vlgmr.msra.gmra.mrb[0].mxu1 %v607_v13 }
  0x26   :  { %566 = vmatprep.mubr.msk.bf16.mxu0 %vm188_vm0, %v604_v14  ;;  %570 = vmatprep.mubr.msk.bf16.mxu1 %vm188_vm0, %v613_v15 }
  0x2d   :  { %254 = vmatmul.mubr.bf16.gmra.mrb[4].mxu0 %v606_v16  ;;  %286 = vmatmul.mubr.bf16.gmra.mrb[4].mxu1 %v615_v17 }
  0x2e   :  { %567 = vmatprep.mubr.msk.bf16.mxu0 %vm188_vm0, %v610_v18  ;;  %571 = vmatprep.mubr.msk.bf16.mxu1 %vm188_vm0, %v619_v19 }
  0x35   :  { %262 = vmatmul.mubr.bf16.gmra.mrb[8].mxu0 %v612_v20  ;;  %294 = vmatmul.mubr.bf16.gmra.mrb[8].mxu1 %v621_v21 }
  0x36   :  { %568 = vmatprep.mubr.msk.bf16.mxu0 %vm188_vm0, %v616_v22  ;;  %572 = vmatprep.mubr.msk.bf16.mxu1 %vm188_vm0, %v622_v23 }
  0x3d   :  { %270 = vmatmul.mubr.bf16.gmra.mrb[12].mxu0 %v618_v24  ;;  %302 = vmatmul.mubr.bf16.gmra.mrb[12].mxu1 %v624_v25 }
  0xf8   :  { %v247_v26 = vpop.f32.mrb[0].mxu0  ;;  %v279_v27 = vpop.f32.mrb[0].mxu1 }
  0xf9   :  { %v249_v28 = vpop.f32.mrb[1].mxu0  ;;  %v281_v29 = vpop.f32.mrb[1].mxu1  ;;  %v750_v38 = vadd.f32 %v744_v34, %v247_v26  ;;  %v780_v11 = vadd.f32 %v744_v34, %v279_v27 }
  0xfa   :  { %v250_v30 = vpop.f32.mrb[2].mxu0  ;;  %v282_v31 = vpop.f32.mrb[2].mxu1 }
  0xfb   :  { %v252_v32 = vpop.f32.mrb[3].mxu0  ;;  %v284_v33 = vpop.f32.mrb[3].mxu1  ;;  %v747_v35 = vadd.f32 %v744_v34, %v250_v30  ;;  %v311_v47 = vsel %vm985_vm1, %v750_v38, 0.0  ;;  %v788_v17 = vadd.f32 %v744_v34, %v282_v31  ;;  %v326_v20 = vsel %vm985_vm1, %v780_v11, 0.0 }
  0xfd   :  { %v312_v44 = vsel %vm985_vm1, %v747_v35, 0.0  ;;  %v328_v23 = vsel %vm985_vm1, %v788_v17, 0.0 }
  0xfe   :  { %v313_v50 = vadd.f32 %v312_v44, %v311_v47 }
 0x100   :  { %v255_v36 = vpop.f32.mrb[4].mxu0  ;;  %v287_v37 = vpop.f32.mrb[4].mxu1 }
 0x101   :  { %v753_v39 = vadd.f32 %v744_v34, %v255_v36  ;;  %v257_v40 = vpop.f32.mrb[5].mxu0  ;;  %v289_v41 = vpop.f32.mrb[5].mxu1  ;;  %v795_v21 = vadd.f32 %v744_v34, %v287_v37 }
 0x102   :  { %v258_v42 = vpop.f32.mrb[6].mxu0  ;;  %v290_v43 = vpop.f32.mrb[6].mxu1 }
 0x103   :  { %v260_v45 = vpop.f32.mrb[7].mxu0  ;;  %v292_v46 = vpop.f32.mrb[7].mxu1  ;;  %v314_v48 = vsel %vm985_vm1, %v753_v39, 0.0  ;;  %v762_v49 = vadd.f32 %v744_v34, %v258_v42  ;;  %v800_v24 = vadd.f32 %v744_v34, %v290_v43  ;;  %v330_v26 = vsel %vm985_vm1, %v795_v21, 0.0 }
 0x104   :  { %v315_v51 = vadd.f32 %v314_v48, %v313_v50 }
 0x105   :  { %v316_v54 = vsel %vm985_vm1, %v762_v49, 0.0  ;;  %v332_v29 = vsel %vm985_vm1, %v800_v24, 0.0 }
 0x106   :  { %v317_v0 = vadd.f32 %v316_v54, %v315_v51 }
 0x108   :  { %v263_v52 = vpop.f32.mrb[8].mxu0  ;;  %v295_v53 = vpop.f32.mrb[8].mxu1 }
 0x109   :  { %v767_v55 = vadd.f32 %v744_v34, %v263_v52  ;;  %v265_v56 = vpop.f32.mrb[9].mxu0  ;;  %v297_v57 = vpop.f32.mrb[9].mxu1  ;;  %v805_v27 = vadd.f32 %v744_v34, %v295_v53 }
 0x10a   :  { %v266_v58 = vpop.f32.mrb[10].mxu0  ;;  %v298_v59 = vpop.f32.mrb[10].mxu1 }
 0x10b   :  { %v318_v60 = vsel %vm985_vm1, %v767_v55, 0.0  ;;  %v772_v61 = vadd.f32 %v744_v34, %v266_v58  ;;  %v268_v62 = vpop.f32.mrb[11].mxu0  ;;  %v300_v63 = vpop.f32.mrb[11].mxu1  ;;  %v810_v30 = vadd.f32 %v744_v34, %v298_v59  ;;  %v334_v33 = vsel %vm985_vm1, %v805_v27, 0.0 }
 0x10c   :  { %v319_v1 = vadd.f32 %v318_v60, %v317_v0 }
 0x10d   :  { %v320_v2 = vsel %vm985_vm1, %v772_v61, 0.0  ;;  %v336_v37 = vsel %vm985_vm1, %v810_v30, 0.0 }
 0x10e   :  { %v321_v8 = vadd.f32 %v320_v2, %v319_v1 }
 0x110   :  { %v271_v3 = vpop.f32.mrb[12].mxu0  ;;  %v303_v4 = vpop.f32.mrb[12].mxu1 }
 0x111   :  { %v777_v5 = vadd.f32 %v744_v34, %v271_v3  ;;  %v273_v6 = vpop.f32.mrb[13].mxu0  ;;  %v305_v7 = vpop.f32.mrb[13].mxu1  ;;  %v813_v31 = vadd.f32 %v744_v34, %v303_v4 }
 0x112   :  { %v274_v9 = vpop.f32.mrb[14].mxu0  ;;  %v306_v10 = vpop.f32.mrb[14].mxu1 }
 0x113   :  { %v322_v12 = vsel %vm985_vm1, %v777_v5, 0.0  ;;  %v785_v13 = vadd.f32 %v744_v34, %v274_v9  ;;  %v276_v14 = vpop.f32.mrb[15].mxu0  ;;  %v308_v15 = vpop.f32.mrb[15].mxu1  ;;  %v338_v40 = vsel %vm985_vm1, %v813_v31, 0.0  ;;  %v822_v41 = vadd.f32 %v744_v34, %v306_v10 }
 0x114   :  { %v323_v16 = vadd.f32 %v322_v12, %v321_v8 }
 0x115   :  { %v324_v18 = vsel %vm985_vm1, %v785_v13, 0.0  ;;  %v340_v44 = vsel %vm985_vm1, %v822_v41, 0.0 }
 0x116   :  { %v325_v19 = vadd.f32 %v324_v18, %v323_v16 }
 0x118   :  { %v327_v22 = vadd.f32 %v326_v20, %v325_v19 }
 0x11a   :  { %v329_v25 = vadd.f32 %v328_v23, %v327_v22 }
 0x11c   :  { %v331_v28 = vadd.f32 %v330_v26, %v329_v25 }
 0x11e   :  { %v333_v32 = vadd.f32 %v332_v29, %v331_v28 }
 0x120   :  { %v335_v36 = vadd.f32 %v334_v33, %v333_v32 }
 0x122   :  { %v337_v42 = vadd.f32 %v336_v37, %v335_v36 }
 0x124   :  { %v339_v43 = vadd.f32 %v338_v40, %v337_v42 }
 0x126   :  { %v341_v45 = vadd.f32 %v340_v44, %v339_v43 }
 0x128   :  { %v342_v46 = vrot.slane %v341_v45, 4 }
 0x12a   :  { %v343_v47 = vadd.f32 %v342_v46, %v341_v45 }
 0x12c   :  { %v344_v48 = vrot.slane %v343_v47, 2 }
 0x12e   :  { %v345_v50 = vadd.f32 %v344_v48, %v343_v47 }
 0x130   :  { %v346_v51 = vrot.slane %v345_v50, 1 }
 0x132   :  { %v347_v52 = vadd.f32 %v346_v51, %v345_v50 }
 0x134   :  { %v826_v53 = vmul.f32 0.0078125, %v347_v52 }
 0x136   :  { %v350_v54 = vsub.f32 %v750_v38, %v826_v53  ;;  %v351_v34 = vsub.f32 %v747_v35, %v826_v53  ;;  %v352_v56 = vsub.f32 %v753_v39, %v826_v53  ;;  %v353_v57 = vsub.f32 %v762_v49, %v826_v53 }
 0x137   :  { %v354_v60 = vsub.f32 %v767_v55, %v826_v53  ;;  %v355_v63 = vsub.f32 %v772_v61, %v826_v53  ;;  %v356_v4 = vsub.f32 %v777_v5, %v826_v53  ;;  %v357_v9 = vsub.f32 %v785_v13, %v826_v53 }
 0x138   :  { %v366_v58 = vmul.f32 %v350_v54, %v350_v54  ;;  %v367_v59 = vmul.f32 %v351_v34, %v351_v34  ;;  %v368_v62 = vmul.f32 %v352_v56, %v352_v56  ;;  %v369_v0 = vmul.f32 %v353_v57, %v353_v57 }
 0x139   :  { %v370_v6 = vmul.f32 %v354_v60, %v354_v60  ;;  %v371_v10 = vmul.f32 %v355_v63, %v355_v63  ;;  %v358_v15 = vsub.f32 %v780_v11, %v826_v53  ;;  %v372_v16 = vmul.f32 %v356_v4, %v356_v4 }
 0x13a   :  { %v382_v1 = vsel %vm985_vm1, %v366_v58, 0.0  ;;  %v383_v2 = vsel %vm985_vm1, %v367_v59, 0.0  ;;  %v385_v7 = vsel %vm985_vm1, %v368_v62, 0.0  ;;  %v387_v12 = vsel %vm985_vm1, %v369_v0, 0.0 }
 0x13b   :  { %v384_v3 = vadd.f32 %v383_v2, %v382_v1  ;;  %v389_v18 = vsel %vm985_vm1, %v370_v6, 0.0  ;;  %v359_v20 = vsub.f32 %v788_v17, %v826_v53  ;;  %v373_v22 = vmul.f32 %v357_v9, %v357_v9 }
 0x13c   :  { %v391_v23 = vsel %vm985_vm1, %v371_v10, 0.0  ;;  %v360_v26 = vsub.f32 %v795_v21, %v826_v53  ;;  %v374_v28 = vmul.f32 %v358_v15, %v358_v15  ;;  %v393_v29 = vsel %vm985_vm1, %v372_v16, 0.0 }
 0x13d   :  { %v386_v8 = vadd.f32 %v385_v7, %v384_v3  ;;  %v361_v33 = vsub.f32 %v800_v24, %v826_v53  ;;  %v375_v36 = vmul.f32 %v359_v20, %v359_v20  ;;  %v395_v37 = vsel %vm985_vm1, %v373_v22, 0.0  ;;  %v420_v22 = vld [vmem:[%s982_s3] sm:$0x1] }
 0x13e   :  { %v362_v42 = vsub.f32 %v805_v27, %v826_v53  ;;  %v376_v43 = vmul.f32 %v360_v26, %v360_v26  ;;  %v397_v44 = vsel %vm985_vm1, %v374_v28, 0.0  ;;  %v363_v46 = vsub.f32 %v810_v30, %v826_v53  ;;  %v424_v28 = vld [vmem:[%s983_s4] sm:$0x1] }
 0x13f   :  { %v388_v14 = vadd.f32 %v387_v12, %v386_v8  ;;  %v377_v47 = vmul.f32 %v361_v33, %v361_v33  ;;  %v399_v48 = vsel %vm985_vm1, %v375_v36, 0.0  ;;  %v364_v51 = vsub.f32 %v813_v31, %v826_v53 }
 0x140   :  { %v378_v52 = vmul.f32 %v362_v42, %v362_v42  ;;  %v401_v54 = vsel %vm985_vm1, %v376_v43, 0.0  ;;  %v365_v56 = vsub.f32 %v822_v41, %v826_v53  ;;  %v379_v57 = vmul.f32 %v363_v46, %v363_v46 }
 0x141   :  { %v390_v19 = vadd.f32 %v389_v18, %v388_v14  ;;  %v403_v58 = vsel %vm985_vm1, %v377_v47, 0.0  ;;  %v380_v60 = vmul.f32 %v364_v51, %v364_v51 }
 0x142   :  { %v405_v62 = vsel %vm985_vm1, %v378_v52, 0.0  ;;  %v381_v0 = vmul.f32 %v365_v56, %v365_v56  ;;  %v407_v1 = vsel %vm985_vm1, %v379_v57, 0.0 }
 0x143   :  { %v392_v25 = vadd.f32 %v391_v23, %v390_v19  ;;  %v409_v3 = vsel %vm985_vm1, %v380_v60, 0.0  ;;  %v428_v19 = vlaneseq }
 0x144   :  { %v411_v6 = vsel %vm985_vm1, %v381_v0, 0.0  ;;  %vm987_vm1 = vmmov %vm986_vm14 }
 0x145   :  { %v394_v32 = vadd.f32 %v393_v29, %v392_v25  ;;  %v429_v20 = vshrl.u32 %v428_v19, 7 }
 0x147   :  { %v396_v40 = vadd.f32 %v395_v37, %v394_v32  ;;  %v430_v23 = vsub.s32 0, %v429_v20 }
 0x149   :  { %v398_v45 = vadd.f32 %v397_v44, %v396_v40 }
 0x14b   :  { %v400_v50 = vadd.f32 %v399_v48, %v398_v45 }
 0x14d   :  { %v402_v34 = vadd.f32 %v401_v54, %v400_v50 }
 0x14f   :  { %v404_v59 = vadd.f32 %v403_v58, %v402_v34 }
 0x151   :  { %v406_v63 = vadd.f32 %v405_v62, %v404_v59 }
 0x153   :  { %v408_v2 = vadd.f32 %v407_v1, %v406_v63 }
 0x155   :  { %v410_v4 = vadd.f32 %v409_v3, %v408_v2 }
 0x157   :  { %v412_v7 = vadd.f32 %v411_v6, %v410_v4 }
 0x159   :  { %v413_v8 = vrot.slane %v412_v7, 4 }
 0x15b   :  { %v414_v9 = vadd.f32 %v413_v8, %v412_v7 }
 0x15d   :  { %v415_v10 = vrot.slane %v414_v9, 2 }
 0x15f   :  { %v416_v12 = vadd.f32 %v415_v10, %v414_v9 }
 0x161   :  { %v417_v14 = vrot.slane %v416_v12, 1 }
 0x163   :  { %v418_v15 = vadd.f32 %v417_v14, %v416_v12 }
 0x165   :  { %v419_v16 = vmul.f32 0.0078125, %v418_v15 }
 0x167   :  { %v421_v18 = vadd.f32 1e-05, %v419_v16 }
 0x169   :  { %625 = vrsqrt.f32 %v421_v18 }
 0x173   :  { %v626_v25 = vpop.eup %625 }
 0x174   :  { %v423_v26 = vmul.f32 %v626_v25, %v420_v22 }
 0x176   :  { %v425_v29 = vmul.f32 %v423_v26, %v826_v53  ;;  %v431_v32 = vrot.slane %v423_v26, %v430_v23 }
 0x178   :  { %v426_v33 = vsub.f32 %v424_v28, %v425_v29  ;;  %v433_v36 = vmul.f32 %v431_v32, %v750_v38  ;;  %v434_v37 = vmul.f32 %v431_v32, %v747_v35  ;;  %v435_v40 = vmul.f32 %v431_v32, %v753_v39 }
 0x179   :  { %v436_v42 = vmul.f32 %v431_v32, %v762_v49  ;;  %v437_v43 = vmul.f32 %v431_v32, %v767_v55  ;;  %v438_v44 = vmul.f32 %v431_v32, %v772_v61  ;;  %v439_v45 = vmul.f32 %v431_v32, %v777_v5 }
 0x17a   :  { %v440_v46 = vmul.f32 %v431_v32, %v785_v13  ;;  %v441_v53 = vmul.f32 %v431_v32, %v780_v11  ;;  %v442_v47 = vmul.f32 %v431_v32, %v788_v17  ;;  %v443_v38 = vmul.f32 %v431_v32, %v795_v21 }
 0x17b   :  { %v444_v35 = vmul.f32 %v431_v32, %v800_v24  ;;  %v453_v48 = vrot.slane %v426_v33, %v430_v23  ;;  %v445_v39 = vmul.f32 %v431_v32, %v805_v27  ;;  %v446_v49 = vmul.f32 %v431_v32, %v810_v30 }
 0x17c   :  { %v447_v55 = vmul.f32 %v431_v32, %v813_v31  ;;  %v448_v61 = vmul.f32 %v431_v32, %v822_v41 }
 0x17d   :  { %v455_v5 = vadd.f32 %v453_v48, %v433_v36  ;;  %v456_v50 = vadd.f32 %v453_v48, %v434_v37  ;;  %v457_v13 = vadd.f32 %v453_v48, %v435_v40  ;;  %v458_v51 = vadd.f32 %v453_v48, %v436_v42 }
 0x17e   :  { %v459_v11 = vadd.f32 %v453_v48, %v437_v43  ;;  %v460_v52 = vadd.f32 %v453_v48, %v438_v44  ;;  %v461_v17 = vadd.f32 %v453_v48, %v439_v45  ;;  %v462_v54 = vadd.f32 %v453_v48, %v440_v46 }
 0x17f   :  { %v463_v21 = vadd.f32 %v453_v48, %v441_v53  ;;  %v464_v34 = vadd.f32 %v453_v48, %v442_v47  ;;  %v465_v24 = vadd.f32 %v453_v48, %v443_v38  ;;  %v466_v56 = vadd.f32 %v453_v48, %v444_v35 }
 0x180   :  { %v467_v57 = vadd.f32 %v453_v48, %v445_v39  ;;  %v468_v27 = vadd.f32 %v453_v48, %v446_v49  ;;  %v469_v58 = vadd.f32 %v453_v48, %v447_v55  ;;  %v470_v30 = vadd.f32 %v453_v48, %v448_v61 }
 0x181   :  { %vm471_vm2 = vcmp.ge.f32.partialorder %v455_v5, 0.0  ;;  %vm472_vm3 = vcmp.ge.f32.partialorder %v456_v50, 0.0  ;;  %vm473_vm4 = vcmp.ge.f32.partialorder %v457_v13, 0.0  ;;  %vm474_vm5 = vcmp.ge.f32.partialorder %v458_v51, 0.0 }
 0x182   :  { %vm475_vm6 = vcmp.ge.f32.partialorder %v459_v11, 0.0  ;;  %vm476_vm7 = vcmp.ge.f32.partialorder %v460_v52, 0.0  ;;  %vm477_vm8 = vcmp.ge.f32.partialorder %v461_v17, 0.0  ;;  %vm478_vm9 = vcmp.ge.f32.partialorder %v462_v54, 0.0 }
 0x183   :  { %vm479_vm10 = vcmp.ge.f32.partialorder %v463_v21, 0.0  ;;  %vm480_vm11 = vcmp.ge.f32.partialorder %v464_v34, 0.0  ;;  %vm481_vm12 = vcmp.ge.f32.partialorder %v465_v24, 0.0  ;;  %vm482_vm13 = vcmp.ge.f32.partialorder %v466_v56, 0.0 }
 0x184   :  { %vm484_vm15 = vcmp.ge.f32.partialorder %v468_v27, 0.0  ;;  %vm485_vm0 = vcmp.ge.f32.partialorder %v469_v58, 0.0  ;;  %v487_v31 = vmul.f32 0.2, %v455_v5  ;;  %v488_v41 = vmul.f32 0.2, %v456_v50 }
 0x185   :  { %v489_v59 = vmul.f32 0.2, %v457_v13  ;;  %v490_v60 = vmul.f32 0.2, %v458_v51  ;;  %v491_v62 = vmul.f32 0.2, %v459_v11 }
 0x186   :  { %v492_v63 = vmul.f32 0.2, %v460_v52  ;;  %v493_v0 = vmul.f32 0.2, %v461_v17  ;;  %v494_v1 = vmul.f32 0.2, %v462_v54  ;;  %v503_v3 = vsel %vm471_vm2, %v455_v5, %v487_v31  ;;  %vm988_vm2 = vmmov %vm987_vm1 }
 0x187   :  { %v495_v2 = vmul.f32 0.2, %v463_v21  ;;  %v496_v4 = vmul.f32 0.2, %v464_v34  ;;  %v497_v6 = vmul.f32 0.2, %v465_v24  ;;  %v504_v8 = vsel %vm472_vm3, %v456_v50, %v488_v41  ;;  %vm989_vm3 = vmmov %vm987_vm1 }
 0x188   :  { %v498_v7 = vmul.f32 0.2, %v466_v56  ;;  %519 = vst.msk [vmem:[%s984_s5] sm:$0xff] %vm986_vm14, %v503_v3  ;;  %v499_v9 = vmul.f32 0.2, %v467_v57  ;;  %v505_v14 = vsel %vm473_vm4, %v457_v13, %v489_v59  ;;  %v506_v16 = vsel %vm474_vm5, %v458_v51, %v490_v60  ;;  %vm990_vm4 = vmmov %vm987_vm1 }
 0x189   :  { %v500_v10 = vmul.f32 0.2, %v468_v27  ;;  %v501_v12 = vmul.f32 0.2, %v469_v58  ;;  %520 = vst.msk [vmem:[%s984_s5 + $0x8] sm:$0xff] %vm987_vm1, %v504_v8  ;;  %v507_v18 = vsel %vm475_vm6, %v459_v11, %v491_v62  ;;  %v508_v19 = vsel %vm476_vm7, %v460_v52, %v492_v63  ;;  %522 = vst.msk [vmem:[%s984_s5 + $0x18] sm:$0xff] %vm987_vm1, %v506_v16 }
 0x18a   :  { %v502_v15 = vmul.f32 0.2, %v470_v30  ;;  %521 = vst.msk [vmem:[%s984_s5 + $0x10] sm:$0xff] %vm988_vm2, %v505_v14  ;;  %v509_v20 = vsel %vm477_vm8, %v461_v17, %v493_v0  ;;  %v510_v22 = vsel %vm478_vm9, %v462_v54, %v494_v1  ;;  %v511_v23 = vsel %vm479_vm10, %v463_v21, %v495_v2  ;;  %vm992_vm6 = vmmov %vm987_vm1 }
 0x18b   :  { %v512_v25 = vsel %vm480_vm11, %v464_v34, %v496_v4  ;;  %523 = vst.msk [vmem:[%s984_s5 + $0x20] sm:$0xff] %vm989_vm3, %v507_v18  ;;  %v513_v26 = vsel %vm481_vm12, %v465_v24, %v497_v6  ;;  %v514_v28 = vsel %vm482_vm13, %v466_v56, %v498_v7  ;;  %vm991_vm5 = vcmp.ge.f32.partialorder %v467_v57, 0.0  ;;  %vm993_vm7 = vmmov %vm987_vm1 }
 0x18c   :  { %524 = vst.msk [vmem:[%s984_s5 + $0x28] sm:$0xff] %vm990_vm4, %v508_v19  ;;  %v515_v29 = vsel %vm991_vm5, %v467_v57, %v499_v9  ;;  %v516_v32 = vsel %vm484_vm15, %v468_v27, %v500_v10  ;;  %vm994_vm8 = vmmov %vm987_vm1  ;;  %v517_v33 = vsel %vm485_vm0, %v469_v58, %v501_v12  ;;  %vm996_vm10 = vcmp.ge.f32.partialorder %v470_v30, 0.0 }
 0x18d   :  { %525 = vst.msk [vmem:[%s984_s5 + $0x30] sm:$0xff] %vm992_vm6, %v509_v20  ;;  %vm995_vm9 = vmmov %vm987_vm1  ;;  %v518_v36 = vsel %vm996_vm10, %v470_v30, %v502_v15 }
 0x18e   :  { %526 = vst.msk [vmem:[%s984_s5 + $0x38] sm:$0xff] %vm993_vm7, %v510_v22  ;;  %vm997_vm11 = vmmov %vm987_vm1 }
 0x18f   :  { %527 = vst.msk [vmem:[%s984_s5 + $0x40] sm:$0xff] %vm994_vm8, %v511_v23  ;;  %vm998_vm12 = vmmov %vm987_vm1 }
 0x190   :  { %528 = vst.msk [vmem:[%s984_s5 + $0x48] sm:$0xff] %vm995_vm9, %v512_v25  ;;  %vm999_vm13 = vmmov %vm987_vm1 }
 0x191   :  { %529 = vst.msk [vmem:[%s984_s5 + $0x50] sm:$0xff] %vm997_vm11, %v513_v26  ;;  %vm1000_vm14 = vmmov %vm987_vm1 }
 0x192   :  { %530 = vst.msk [vmem:[%s984_s5 + $0x58] sm:$0xff] %vm998_vm12, %v514_v28  ;;  %vm1001_vm15 = vmmov %vm987_vm1 }
 0x193   :  { %531 = vst.msk [vmem:[%s984_s5 + $0x60] sm:$0xff] %vm999_vm13, %v515_v29  ;;  %vm1002_vm0 = vmmov %vm987_vm1 }
 0x194   :  { %532 = vst.msk [vmem:[%s984_s5 + $0x68] sm:$0xff] %vm1000_vm14, %v516_v32 }
 0x195   :  { %533 = vst.msk [vmem:[%s984_s5 + $0x70] sm:$0xff] %vm1001_vm15, %v517_v33 }
 0x196   :  { %534 = vst.msk [vmem:[%s984_s5 + $0x78] sm:$0xff] %vm1002_vm0, %v518_v36 }

// kernel: convnet_aae_forward.10
= control target key start
LH: loop header
LB: loop body
LE: loop exit
PB: predicated region body
PF: predicated region fallthrough
CT: control target
= control target key end

     0   :  { %vm1404_vm0 = vcmask 261120   ;;  %vm1405_vm13 = vcmask 261120   ;;  %s1398_s1 = inlined_call_operand.vmem [shape: bf16[288,32], index: 1, kind: input, shape index: {}]   ;;  %s1399_s0 = inlined_call_operand.vmem [shape: bf16[128,288], index: 0, kind: input, shape index: {}]   ;;  %s1400_s2 = inlined_call_operand.vmem [shape: f32[1,32], index: 2, kind: input, shape index: {}]   ;;  %s1401_s3 = inlined_call_operand.vmem [shape: f32[1,32], index: 3, kind: input, shape index: {}]   ;;  %s1402_s4 = inlined_call_operand.vmem [shape: f32[1,32], index: 4, kind: input, shape index: {}]   ;;  %s1403_s5 = inlined_call_operand.vmem [shape: f32[128,32], index: 5, kind: output, shape index: {}]  }
   0x1   :  { %v932_v0 = vld [vmem:[%s1398_s1 + $0x40] sm:$0xff]   ;;  %v934_v2 = vld [vmem:[%s1398_s1 + $0x48] sm:$0xff]   ;;  %v936_v4 = vld [vmem:[%s1398_s1 + $0x50] sm:$0xff]  }
   0x2   :  { %v933_v1 = vld [vmem:[%s1398_s1] sm:$0xff]   ;;  %822 = vmatprep.subr.bf16.mxu0 %v932_v0  ;;  %916 = vmatprep.subr.bf16.mxu1 %v932_v0  ;;  %v935_v3 = vld [vmem:[%s1398_s1 + $0x8] sm:$0xff]   ;;  %v937_v5 = vld [vmem:[%s1398_s1 + $0x10] sm:$0xff]  }
   0x3   :  { %823 = vmatpush3.bf16.msra.mxu0 %v933_v1  ;;  %924 = vmatpush3.bf16.msra.mxu1 %v933_v1  ;;  %v938_v6 = vld [vmem:[%s1398_s1 + $0x58] sm:$0xff]   ;;  %v940_v8 = vld [vmem:[%s1398_s1 + $0x60] sm:$0xff]   ;;  %v942_v10 = vld [vmem:[%s1398_s1 + $0x68] sm:$0xff]  }
   0x4   :  { %824 = vmatprep.subr.bf16.mxu0 %v934_v2  ;;  %917 = vmatprep.subr.bf16.mxu1 %v934_v2  ;;  %v939_v7 = vld [vmem:[%s1398_s1 + $0x18] sm:$0xff]   ;;  %v941_v9 = vld [vmem:[%s1398_s1 + $0x20] sm:$0xff]   ;;  %v943_v13 = vld [vmem:[%s1398_s1 + $0x28] sm:$0xff]  }
   0x5   :  { %v950_v11 = vld [vmem:[%s1399_s0 + $0x4] ss:$12 sps:$4 sm:$0xff]   ;;  %v953_v12 = vld [vmem:[%s1399_s0 + $0x94] ss:$12 sps:$4 sm:$0xff]   ;;  %v946_v16 = vld [vmem:[%s1398_s1 + $0x78] sm:$0xff]  }
   0x6   :  { %v944_v14 = vld [vmem:[%s1398_s1 + $0x70] sm:$0xff]   ;;  %381 = vmatprep.mubr.bf16.mxu0 %v950_v11  ;;  %429 = vmatprep.mubr.bf16.mxu1 %v953_v12  ;;  %v947_v17 = vld [vmem:[%s1398_s1 + $0x38] sm:$0xff]   ;;  %v948_v18 = vld [vmem:[%s1399_s0] ss:$12 sps:$4 sm:$0xff]  }
   0x7   :  { %825 = vmatpush3.bf16.msra.mxu0 %v935_v3  ;;  %925 = vmatpush3.bf16.msra.mxu1 %v935_v3  ;;  %v945_v15 = vld [vmem:[%s1398_s1 + $0x30] sm:$0xff]   ;;  %v958_v19 = vld [vmem:[%s1398_s1 + $0x80] sm:$0xff]   ;;  %v954_v21 = vld [vmem:[%s1399_s0 + $0x1c] ss:$12 sps:$4 sm:$0xff]  }
   0x8   :  { %826 = vmatprep.subr.bf16.mxu0 %v936_v4  ;;  %918 = vmatprep.subr.bf16.mxu1 %v936_v4  ;;  %v951_v20 = vld [vmem:[%s1399_s0 + $0x90] ss:$12 sps:$4 sm:$0xff]   ;;  %v956_v22 = vld [vmem:[%s1399_s0 + $0xac] ss:$12 sps:$4 sm:$0xff]   ;;  %v960_v25 = vld [vmem:[%s1399_s0 + $0xa8] ss:$12 sps:$4 sm:$0xff]  }
   0x9   :  { %v961_v23 = vld [vmem:[%s1398_s1 + $0x88] sm:$0xff]   ;;  %v959_v24 = vld [vmem:[%s1399_s0 + $0x18] ss:$12 sps:$4 sm:$0xff]   ;;  %v962_v26 = vld [vmem:[%s1399_s0 + $0x34] ss:$12 sps:$4 sm:$0xff]  }
   0xa   :  { %v964_v27 = vld [vmem:[%s1399_s0 + $0x8] ss:$12 sps:$4 sm:$0xff]   ;;  %v965_v28 = vld [vmem:[%s1399_s0 + $0x30] ss:$12 sps:$4 sm:$0xff]   ;;  %v966_v29 = vld [vmem:[%s1399_s0 + $0x20] ss:$12 sps:$4 sm:$0xff]  }
   0xb   :  { %827 = vmatpush3.bf16.msra.mxu0 %v937_v5  ;;  %926 = vmatpush3.bf16.msra.mxu1 %v937_v5  ;;  %v967_v30 = vld [vmem:[%s1399_s0 + $0x4c] ss:$12 sps:$4 sm:$0xff]   ;;  %v970_v32 = vld [vmem:[%s1399_s0 + $0x48] ss:$12 sps:$4 sm:$0xff]   ;;  %v971_v33 = vld [vmem:[%s1399_s0 + $0x50] ss:$12 sps:$4 sm:$0xff]  }
   0xc   :  { %828 = vmatprep.subr.bf16.mxu0 %v938_v6  ;;  %919 = vmatprep.subr.bf16.mxu1 %v938_v6  ;;  %v969_v31 = vld [vmem:[%s1399_s0 + $0x38] ss:$12 sps:$4 sm:$0xff]   ;;  %v974_v35 = vld [vmem:[%s1399_s0 + $0x68] ss:$12 sps:$4 sm:$0xff]   ;;  %v975_v36 = vld [vmem:[%s1399_s0 + $0x60] ss:$12 sps:$4 sm:$0xff]  }
   0xd   :  { %v972_v34 = vld [vmem:[%s1399_s0 + $0x64] ss:$12 sps:$4 sm:$0xff]   ;;  %v976_v37 = vld [vmem:[%s1399_s0 + $0x80] ss:$12 sps:$4 sm:$0xff]   ;;  %v977_v38 = vld [vmem:[%s1399_s0 + $0x7c] ss:$12 sps:$4 sm:$0xff]  }
   0xe   :  { %v979_v39 = vld [vmem:[%s1399_s0 + $0x98] ss:$12 sps:$4 sm:$0xff]   ;;  %v981_v41 = vld [vmem:[%s1399_s0 + $0xb0] ss:$12 sps:$4 sm:$0xff]   ;;  %v1159_v2 = vld [vmem:[%s1400_s2] ss:$0 sm:$0xff] }
   0xf   :  { %829 = vmatpush3.bf16.msra.mxu0 %v939_v7  ;;  %927 = vmatpush3.bf16.msra.mxu1 %v939_v7  ;;  %v980_v40 = vld [vmem:[%s1399_s0 + $0x78] ss:$12 sps:$4 sm:$0xff]  }
  0x10   :  { %830 = vmatprep.subr.bf16.mxu0 %v940_v8  ;;  %920 = vmatprep.subr.bf16.mxu1 %v940_v8 }
  0x13   :  { %831 = vmatpush3.bf16.msra.mxu0 %v941_v9  ;;  %928 = vmatpush3.bf16.msra.mxu1 %v941_v9 }
  0x14   :  { %832 = vmatprep.subr.bf16.mxu0 %v942_v10  ;;  %921 = vmatprep.subr.bf16.mxu1 %v942_v10 }
  0x17   :  { %833 = vmatpush3.bf16.msra.mxu0 %v943_v13  ;;  %929 = vmatpush3.bf16.msra.mxu1 %v943_v13 }
  0x18   :  { %834 = vmatprep.subr.bf16.mxu0 %v944_v14  ;;  %922 = vmatprep.subr.bf16.mxu1 %v944_v14 }
  0x1b   :  { %835 = vmatpush3.bf16.msra.mxu0 %v945_v15  ;;  %930 = vmatpush3.bf16.msra.mxu1 %v945_v15 }
  0x1c   :  { %836 = vmatprep.subr.bf16.mxu0 %v946_v16  ;;  %923 = vmatprep.subr.bf16.mxu1 %v946_v16 }
  0x1f   :  { %837 = vmatpush3.bf16.msra.mxu0 %v947_v17  ;;  %931 = vmatpush3.bf16.msra.mxu1 %v947_v17 }
  0x20   :  { %896 = vmatprep.subr.bf16.mxu1 %v958_v19 }
  0x22   :  { %382 = vmatmul.mubr.bf16.vlgmr.msra.gmra.mrb[0].mxu0 %v948_v18  ;;  %430 = vmatmul.mubr.bf16.vlgmr.msra.gmra.mrb[0].mxu1 %v951_v20 }
  0x23   :  { %389 = vmatprep.mubr.bf16.mxu0 %v954_v21  ;;  %437 = vmatprep.mubr.bf16.mxu1 %v956_v22 }
  0x24   :  { %897 = vmatpush3.bf16.msra.mxu1 %v958_v19 }
  0x25   :  { %898 = vmatprep.subr.bf16.mxu1 %v961_v23 }
  0x28   :  { %899 = vmatpush3.bf16.msra.mxu1 %v961_v23 }
  0x2a   :  { %390 = vmatmul.mubr.bf16.gmra.mrb[4].mxu0 %v959_v24  ;;  %438 = vmatmul.mubr.bf16.gmra.mrb[4].mxu1 %v960_v25 }
  0x2b   :  { %397 = vmatprep.mubr.bf16.mxu0 %v962_v26  ;;  %900 = vmatprep.mubr.msk.bf16.mxu1 %vm1404_vm0, %v964_v27 }
  0x32   :  { %398 = vmatmul.mubr.bf16.gmra.mrb[8].mxu0 %v965_v28  ;;  %901 = vmatmul.mubr.msk.bf16.vlgmr.msra.gmra.mrb[8].mxu1 %vm1404_vm0, %v966_v29 }
  0x33   :  { %405 = vmatprep.mubr.bf16.mxu0 %v967_v30  ;;  %904 = vmatprep.mubr.msk.bf16.mxu1 %vm1404_vm0, %v969_v31 }
  0x3a   :  { %406 = vmatmul.mubr.bf16.gmra.mrb[12].mxu0 %v970_v32  ;;  %905 = vmatmul.mubr.msk.bf16.gmra.mrb[12].mxu1 %vm1404_vm0, %v971_v33 }
  0x3b   :  { %413 = vmatprep.mubr.bf16.mxu0 %v972_v34  ;;  %908 = vmatprep.mubr.msk.bf16.mxu1 %vm1404_vm0, %v974_v35 }
  0x42   :  { %414 = vmatmul.mubr.bf16.gmra.mrb[16].mxu0 %v975_v36  ;;  %909 = vmatmul.mubr.msk.bf16.gmra.mrb[16].mxu1 %vm1404_vm0, %v976_v37 }
  0x43   :  { %421 = vmatprep.mubr.bf16.mxu0 %v977_v38  ;;  %912 = vmatprep.mubr.msk.bf16.mxu1 %vm1404_vm0, %v979_v39 }
  0x4a   :  { %422 = vmatmul.mubr.bf16.gmra.mrb[20].mxu0 %v980_v40  ;;  %913 = vmatmul.mubr.msk.bf16.gmra.mrb[20].mxu1 %vm1404_vm0, %v981_v41 }
  0xf5   :  { %v838_v42 = vpop.f32.mrb[0].mxu0  ;;  %v874_v43 = vpop.f32.mrb[0].mxu1 }
  0xf6   :  { %v839_v44 = vpop.f32.mrb[1].mxu0  ;;  %v875_v45 = vpop.f32.mrb[1].mxu1 }
  0xf7   :  { %v840_v46 = vadd.f32 %v839_v44, %v838_v42  ;;  %v841_v47 = vpop.f32.mrb[2].mxu0  ;;  %v1148_v48 = vadd.f32 %v875_v45, %v874_v43  ;;  %v877_v49 = vpop.f32.mrb[2].mxu1 }
  0xf8   :  { %v842_v50 = vpop.f32.mrb[3].mxu0  ;;  %v878_v51 = vpop.f32.mrb[3].mxu1 }
  0xf9   :  { %v843_v52 = vadd.f32 %v842_v50, %v841_v47  ;;  %v1150_v53 = vadd.f32 %v878_v51, %v877_v49  ;;  %v384_v6 = vadd.f32 %v840_v46, %v1159_v2 }
  0xfb   :  { %v387_v15 = vadd.f32 %v843_v52, %v1159_v2 }
  0xfd   :  { %v844_v54 = vpop.f32.mrb[4].mxu0  ;;  %v880_v55 = vpop.f32.mrb[4].mxu1 }
  0xfe   :  { %v845_v56 = vpop.f32.mrb[5].mxu0  ;;  %v881_v57 = vpop.f32.mrb[5].mxu1 }
  0xff   :  { %v846_v58 = vadd.f32 %v845_v56, %v844_v54  ;;  %v847_v59 = vpop.f32.mrb[6].mxu0  ;;  %v1152_v60 = vadd.f32 %v881_v57, %v880_v55  ;;  %v883_v61 = vpop.f32.mrb[6].mxu1 }
 0x100   :  { %v848_v62 = vpop.f32.mrb[7].mxu0  ;;  %v884_v63 = vpop.f32.mrb[7].mxu1 }
 0x101   :  { %v849_v0 = vadd.f32 %v848_v62, %v847_v59  ;;  %v1154_v1 = vadd.f32 %v884_v63, %v883_v61  ;;  %v392_v3 = vadd.f32 %v846_v58, %v1159_v2 }
 0x103   :  { %v395_v10 = vadd.f32 %v849_v0, %v1159_v2 }
 0x105   :  { %v850_v4 = vpop.f32.mrb[8].mxu0  ;;  %v902_v5 = vpop.f32.mrb[8].mxu1 }
 0x106   :  { %v1163_v7 = vadd.f32 %v902_v5, %v392_v3  ;;  %v851_v8 = vpop.f32.mrb[9].mxu0  ;;  %v480_v9 = vpop.f32.mrb[9].mxu1 }
 0x107   :  { %v852_v11 = vadd.f32 %v851_v8, %v850_v4  ;;  %v1166_v12 = vadd.f32 %v480_v9, %v384_v6  ;;  %v853_v13 = vpop.f32.mrb[10].mxu0  ;;  %v903_v14 = vpop.f32.mrb[10].mxu1  ;;  %v440_v8 = vadd.f32 %v1152_v60, %v1159_v2 }
 0x108   :  { %v1169_v16 = vadd.f32 %v903_v14, %v395_v10  ;;  %v854_v17 = vpop.f32.mrb[11].mxu0  ;;  %v483_v18 = vpop.f32.mrb[11].mxu1  ;;  %v546_v24 = vsel %vm1404_vm0, %v1163_v7, 0.0  ;;  %v432_v14 = vadd.f32 %v1148_v48, %v1159_v2 }
 0x109   :  { %v855_v19 = vadd.f32 %v854_v17, %v853_v13  ;;  %v1171_v20 = vadd.f32 %v483_v18, %v387_v15  ;;  %v543_v21 = vsel %vm1404_vm0, %v1166_v12, 0.0  ;;  %v400_v27 = vadd.f32 %v852_v11, %v1159_v2 }
 0x10a   :  { %v548_v31 = vsel %vm1404_vm0, %v1169_v16, 0.0 }
 0x10b   :  { %v544_v22 = vsel %vm1404_vm0, %v1171_v20, 0.0  ;;  %v403_v36 = vadd.f32 %v855_v19, %v1159_v2 }
 0x10c   :  { %v545_v23 = vadd.f32 %v544_v22, %v543_v21  ;;  %v443_v21 = vadd.f32 %v1154_v1, %v1159_v2 }
 0x10d   :  { %v856_v25 = vpop.f32.mrb[12].mxu0  ;;  %v906_v26 = vpop.f32.mrb[12].mxu1 }
 0x10e   :  { %v547_v28 = vadd.f32 %v546_v24, %v545_v23  ;;  %v857_v29 = vpop.f32.mrb[13].mxu0  ;;  %v496_v30 = vpop.f32.mrb[13].mxu1 }
 0x10f   :  { %v858_v32 = vadd.f32 %v857_v29, %v856_v25  ;;  %v1182_v33 = vadd.f32 %v496_v30, %v400_v27  ;;  %v859_v34 = vpop.f32.mrb[14].mxu0  ;;  %v907_v35 = vpop.f32.mrb[14].mxu1  ;;  %v435_v25 = vadd.f32 %v1150_v53, %v1159_v2 }
 0x110   :  { %v549_v37 = vadd.f32 %v548_v31, %v547_v28  ;;  %v860_v38 = vpop.f32.mrb[15].mxu0  ;;  %v499_v39 = vpop.f32.mrb[15].mxu1 }
 0x111   :  { %v408_v40 = vadd.f32 %v858_v32, %v1159_v2  ;;  %v550_v41 = vsel %vm1404_vm0, %v1182_v33, 0.0  ;;  %v861_v42 = vadd.f32 %v860_v38, %v859_v34  ;;  %v1188_v43 = vadd.f32 %v499_v39, %v403_v36 }
 0x112   :  { %v551_v44 = vadd.f32 %v550_v41, %v549_v37 }
 0x113   :  { %v1190_v45 = vadd.f32 %v906_v26, %v408_v40  ;;  %v411_v46 = vadd.f32 %v861_v42, %v1159_v2  ;;  %v552_v47 = vsel %vm1404_vm0, %v1188_v43, 0.0 }
 0x114   :  { %v553_v52 = vadd.f32 %v552_v47, %v551_v44 }
 0x115   :  { %v1195_v49 = vadd.f32 %v907_v35, %v411_v46  ;;  %v862_v50 = vpop.f32.mrb[16].mxu0  ;;  %v910_v51 = vpop.f32.mrb[16].mxu1  ;;  %v554_v56 = vsel %vm1404_vm0, %v1190_v45, 0.0 }
 0x116   :  { %v863_v54 = vpop.f32.mrb[17].mxu0  ;;  %v512_v55 = vpop.f32.mrb[17].mxu1  ;;  %v555_v3 = vadd.f32 %v554_v56, %v553_v52 }
 0x117   :  { %v864_v57 = vadd.f32 %v863_v54, %v862_v50  ;;  %v865_v58 = vpop.f32.mrb[18].mxu0  ;;  %v911_v59 = vpop.f32.mrb[18].mxu1  ;;  %v556_v5 = vsel %vm1404_vm0, %v1195_v49, 0.0 }
 0x118   :  { %v866_v61 = vpop.f32.mrb[19].mxu0  ;;  %v515_v62 = vpop.f32.mrb[19].mxu1  ;;  %v557_v15 = vadd.f32 %v556_v5, %v555_v3 }
 0x119   :  { %v867_v63 = vadd.f32 %v866_v61, %v865_v58  ;;  %v416_v0 = vadd.f32 %v864_v57, %v1159_v2 }
 0x11b   :  { %v1200_v4 = vadd.f32 %v512_v55, %v416_v0  ;;  %v419_v6 = vadd.f32 %v867_v63, %v1159_v2 }
 0x11d   :  { %v558_v9 = vsel %vm1404_vm0, %v1200_v4, 0.0  ;;  %v1209_v10 = vadd.f32 %v515_v62, %v419_v6  ;;  %v868_v11 = vpop.f32.mrb[20].mxu0  ;;  %v914_v13 = vpop.f32.mrb[20].mxu1 }
 0x11e   :  { %v1213_v17 = vadd.f32 %v914_v13, %v440_v8  ;;  %v869_v18 = vpop.f32.mrb[21].mxu0  ;;  %v528_v19 = vpop.f32.mrb[21].mxu1  ;;  %v559_v26 = vadd.f32 %v558_v9, %v557_v15 }
 0x11f   :  { %v870_v22 = vadd.f32 %v869_v18, %v868_v11  ;;  %v1217_v60 = vadd.f32 %v528_v19, %v432_v14  ;;  %v871_v23 = vpop.f32.mrb[22].mxu0  ;;  %v915_v24 = vpop.f32.mrb[22].mxu1  ;;  %v560_v29 = vsel %vm1404_vm0, %v1209_v10, 0.0 }
 0x120   :  { %v1221_v27 = vadd.f32 %v915_v24, %v443_v21  ;;  %v872_v48 = vpop.f32.mrb[23].mxu0  ;;  %v531_v28 = vpop.f32.mrb[23].mxu1  ;;  %v561_v35 = vadd.f32 %v560_v29, %v559_v26 }
 0x121   :  { %v424_v30 = vadd.f32 %v870_v22, %v1159_v2  ;;  %v873_v31 = vadd.f32 %v872_v48, %v871_v23  ;;  %v1226_v1 = vadd.f32 %v531_v28, %v435_v25  ;;  %v566_v40 = vsel %vm1404_vm0, %v1217_v60, 0.0 }
 0x122   :  { %v572_v47 = vsel %vm1404_vm0, %v1221_v27, 0.0 }
 0x123   :  { %v1228_v32 = vadd.f32 %v910_v51, %v424_v30  ;;  %v427_v34 = vadd.f32 %v873_v31, %v1159_v2  ;;  %v568_v42 = vsel %vm1404_vm0, %v1226_v1, 0.0  ;;  %v570_v2 = vsel %vm1404_vm0, %v1213_v17, 0.0 }
 0x125   :  { %v562_v53 = vsel %vm1404_vm0, %v1228_v32, 0.0  ;;  %v1233_v36 = vadd.f32 %v911_v59, %v427_v34 }
 0x126   :  { %v563_v37 = vadd.f32 %v562_v53, %v561_v35 }
 0x127   :  { %v564_v38 = vsel %vm1404_vm0, %v1233_v36, 0.0 }
 0x128   :  { %v565_v39 = vadd.f32 %v564_v38, %v563_v37 }
 0x12a   :  { %v567_v41 = vadd.f32 %v566_v40, %v565_v39 }
 0x12c   :  { %v569_v44 = vadd.f32 %v568_v42, %v567_v41 }
 0x12e   :  { %v571_v46 = vadd.f32 %v570_v2, %v569_v44 }
 0x130   :  { %v573_v50 = vadd.f32 %v572_v47, %v571_v46 }
 0x132   :  { %v574_v51 = vrot.slane %v573_v50, 4 }
 0x134   :  { %v575_v52 = vadd.f32 %v574_v51, %v573_v50 }
 0x136   :  { %v576_v54 = vrot.slane %v575_v52, 2 }
 0x138   :  { %v577_v55 = vadd.f32 %v576_v54, %v575_v52 }
 0x13a   :  { %v578_v56 = vrot.slane %v577_v55, 1 }
 0x13c   :  { %v579_v57 = vadd.f32 %v578_v56, %v577_v55 }
 0x13e   :  { %v1245_v58 = vmul.f32 0.0078125, %v579_v57 }
 0x140   :  { %v582_v59 = vsub.f32 %v1166_v12, %v1245_v58  ;;  %v583_v61 = vsub.f32 %v1171_v20, %v1245_v58  ;;  %v584_v62 = vsub.f32 %v1163_v7, %v1245_v58  ;;  %v585_v63 = vsub.f32 %v1169_v16, %v1245_v58 }
 0x141   :  { %v586_v5 = vsub.f32 %v1182_v33, %v1245_v58  ;;  %v587_v8 = vsub.f32 %v1188_v43, %v1245_v58  ;;  %v588_v15 = vsub.f32 %v1190_v45, %v1245_v58  ;;  %v589_v22 = vsub.f32 %v1195_v49, %v1245_v58 }
 0x142   :  { %v598_v0 = vmul.f32 %v582_v59, %v582_v59  ;;  %v599_v3 = vmul.f32 %v583_v61, %v583_v61  ;;  %v600_v6 = vmul.f32 %v584_v62, %v584_v62  ;;  %v601_v9 = vmul.f32 %v585_v63, %v585_v63 }
 0x143   :  { %v602_v18 = vmul.f32 %v586_v5, %v586_v5  ;;  %v603_v23 = vmul.f32 %v587_v8, %v587_v8  ;;  %v590_v26 = vsub.f32 %v1200_v4, %v1245_v58  ;;  %v604_v48 = vmul.f32 %v588_v15, %v588_v15 }
 0x144   :  { %v614_v11 = vsel %vm1404_vm0, %v598_v0, 0.0  ;;  %v615_v13 = vsel %vm1404_vm0, %v599_v3, 0.0  ;;  %v617_v19 = vsel %vm1404_vm0, %v600_v6, 0.0  ;;  %v619_v24 = vsel %vm1404_vm0, %v601_v9, 0.0 }
 0x145   :  { %v616_v14 = vadd.f32 %v615_v13, %v614_v11  ;;  %v621_v28 = vsel %vm1404_vm0, %v602_v18, 0.0  ;;  %v591_v30 = vsub.f32 %v1209_v10, %v1245_v58  ;;  %v605_v31 = vmul.f32 %v589_v22, %v589_v22 }
 0x146   :  { %v623_v34 = vsel %vm1404_vm0, %v603_v23, 0.0  ;;  %v592_v53 = vsub.f32 %v1228_v32, %v1245_v58  ;;  %v606_v37 = vmul.f32 %v590_v26, %v590_v26  ;;  %v625_v38 = vsel %vm1404_vm0, %v604_v48, 0.0 }
 0x147   :  { %v618_v21 = vadd.f32 %v617_v19, %v616_v14  ;;  %v593_v40 = vsub.f32 %v1233_v36, %v1245_v58  ;;  %v607_v41 = vmul.f32 %v591_v30, %v591_v30  ;;  %v627_v42 = vsel %vm1404_vm0, %v605_v31, 0.0  ;;  %v652_v31 = vld [vmem:[%s1401_s3] sm:$0x1] }
 0x148   :  { %v594_v2 = vsub.f32 %v1217_v60, %v1245_v58  ;;  %v608_v46 = vmul.f32 %v592_v53, %v592_v53  ;;  %v629_v47 = vsel %vm1404_vm0, %v606_v37, 0.0  ;;  %v595_v51 = vsub.f32 %v1226_v1, %v1245_v58  ;;  %v656_v37 = vld [vmem:[%s1402_s4] sm:$0x1] }
 0x149   :  { %v620_v25 = vadd.f32 %v619_v24, %v618_v21  ;;  %v609_v52 = vmul.f32 %v593_v40, %v593_v40  ;;  %v631_v54 = vsel %vm1404_vm0, %v607_v41, 0.0  ;;  %v596_v56 = vsub.f32 %v1213_v17, %v1245_v58 }
 0x14a   :  { %v610_v57 = vmul.f32 %v594_v2, %v594_v2  ;;  %v633_v59 = vsel %vm1404_vm0, %v608_v46, 0.0  ;;  %v597_v62 = vsub.f32 %v1221_v27, %v1245_v58  ;;  %v611_v63 = vmul.f32 %v595_v51, %v595_v51 }
 0x14b   :  { %v622_v29 = vadd.f32 %v621_v28, %v620_v25  ;;  %v635_v0 = vsel %vm1404_vm0, %v609_v52, 0.0  ;;  %v612_v5 = vmul.f32 %v596_v56, %v596_v56 }
 0x14c   :  { %v637_v6 = vsel %vm1404_vm0, %v610_v57, 0.0  ;;  %v613_v9 = vmul.f32 %v597_v62, %v597_v62  ;;  %v639_v11 = vsel %vm1404_vm0, %v611_v63, 0.0 }
 0x14d   :  { %v624_v35 = vadd.f32 %v623_v34, %v622_v29  ;;  %v641_v14 = vsel %vm1404_vm0, %v612_v5, 0.0  ;;  %v660_v29 = vlaneseq }
 0x14e   :  { %v643_v18 = vsel %vm1404_vm0, %v613_v9, 0.0  ;;  %vm1406_vm0 = vmmov %vm1405_vm13 }
 0x14f   :  { %v626_v39 = vadd.f32 %v625_v38, %v624_v35  ;;  %v661_v30 = vshrl.u32 %v660_v29, 7 }
 0x151   :  { %v628_v44 = vadd.f32 %v627_v42, %v626_v39  ;;  %v662_v34 = vsub.s32 0, %v661_v30 }
 0x153   :  { %v630_v50 = vadd.f32 %v629_v47, %v628_v44 }
 0x155   :  { %v632_v55 = vadd.f32 %v631_v54, %v630_v50 }
 0x157   :  { %v634_v61 = vadd.f32 %v633_v59, %v632_v55 }
 0x159   :  { %v636_v3 = vadd.f32 %v635_v0, %v634_v61 }
 0x15b   :  { %v638_v8 = vadd.f32 %v637_v6, %v636_v3 }
 0x15d   :  { %v640_v13 = vadd.f32 %v639_v11, %v638_v8 }
 0x15f   :  { %v642_v15 = vadd.f32 %v641_v14, %v640_v13 }
 0x161   :  { %v644_v19 = vadd.f32 %v643_v18, %v642_v15 }
 0x163   :  { %v645_v21 = vrot.slane %v644_v19, 4 }
 0x165   :  { %v646_v22 = vadd.f32 %v645_v21, %v644_v19 }
 0x167   :  { %v647_v23 = vrot.slane %v646_v22, 2 }
 0x169   :  { %v648_v24 = vadd.f32 %v647_v23, %v646_v22 }
 0x16b   :  { %v649_v25 = vrot.slane %v648_v24, 1 }
 0x16d   :  { %v650_v26 = vadd.f32 %v649_v25, %v648_v24 }
 0x16f   :  { %v651_v48 = vmul.f32 0.0078125, %v650_v26 }
 0x171   :  { %v653_v28 = vadd.f32 1e-05, %v651_v48 }
 0x173   :  { %982 = vrsqrt.f32 %v653_v28 }
 0x17d   :  { %v983_v35 = vpop.eup %982 }
 0x17e   :  { %v655_v53 = vmul.f32 %v983_v35, %v652_v31 }
 0x180   :  { %v657_v38 = vmul.f32 %v655_v53, %v1245_v58  ;;  %v663_v39 = vrot.slane %v655_v53, %v662_v34 }
 0x182   :  { %v658_v40 = vsub.f32 %v656_v37, %v657_v38  ;;  %v665_v41 = vmul.f32 %v663_v39, %v1166_v12  ;;  %v666_v42 = vmul.f32 %v663_v39, %v1171_v20  ;;  %v667_v44 = vmul.f32 %v663_v39, %v1163_v7 }
 0x183   :  { %v668_v2 = vmul.f32 %v663_v39, %v1169_v16  ;;  %v669_v46 = vmul.f32 %v663_v39, %v1182_v33  ;;  %v670_v47 = vmul.f32 %v663_v39, %v1188_v43  ;;  %v671_v50 = vmul.f32 %v663_v39, %v1190_v45 }
 0x184   :  { %v672_v51 = vmul.f32 %v663_v39, %v1195_v49  ;;  %v673_v58 = vmul.f32 %v663_v39, %v1200_v4  ;;  %v674_v52 = vmul.f32 %v663_v39, %v1209_v10  ;;  %v675_v12 = vmul.f32 %v663_v39, %v1228_v32 }
 0x185   :  { %v676_v20 = vmul.f32 %v663_v39, %v1233_v36  ;;  %v685_v54 = vrot.slane %v658_v40, %v662_v34  ;;  %v677_v7 = vmul.f32 %v663_v39, %v1217_v60  ;;  %v678_v16 = vmul.f32 %v663_v39, %v1226_v1 }
 0x186   :  { %v679_v33 = vmul.f32 %v663_v39, %v1213_v17  ;;  %v680_v43 = vmul.f32 %v663_v39, %v1221_v27 }
 0x187   :  { %v687_v45 = vadd.f32 %v685_v54, %v665_v41  ;;  %v688_v55 = vadd.f32 %v685_v54, %v666_v42  ;;  %v689_v49 = vadd.f32 %v685_v54, %v667_v44  ;;  %v690_v56 = vadd.f32 %v685_v54, %v668_v2 }
 0x188   :  { %v691_v4 = vadd.f32 %v685_v54, %v669_v46  ;;  %v692_v57 = vadd.f32 %v685_v54, %v670_v47  ;;  %v693_v10 = vadd.f32 %v685_v54, %v671_v50  ;;  %v694_v59 = vadd.f32 %v685_v54, %v672_v51 }
 0x189   :  { %v695_v32 = vadd.f32 %v685_v54, %v673_v58  ;;  %v696_v61 = vadd.f32 %v685_v54, %v674_v52  ;;  %v697_v36 = vadd.f32 %v685_v54, %v675_v12  ;;  %v698_v62 = vadd.f32 %v685_v54, %v676_v20 }
 0x18a   :  { %v699_v63 = vadd.f32 %v685_v54, %v677_v7  ;;  %v700_v60 = vadd.f32 %v685_v54, %v678_v16  ;;  %v701_v0 = vadd.f32 %v685_v54, %v679_v33  ;;  %v702_v1 = vadd.f32 %v685_v54, %v680_v43 }
 0x18b   :  { %vm703_vm1 = vcmp.ge.f32.partialorder %v687_v45, 0.0  ;;  %vm704_vm2 = vcmp.ge.f32.partialorder %v688_v55, 0.0  ;;  %vm705_vm3 = vcmp.ge.f32.partialorder %v689_v49, 0.0  ;;  %vm706_vm4 = vcmp.ge.f32.partialorder %v690_v56, 0.0 }
 0x18c   :  { %vm707_vm5 = vcmp.ge.f32.partialorder %v691_v4, 0.0  ;;  %vm708_vm6 = vcmp.ge.f32.partialorder %v692_v57, 0.0  ;;  %vm709_vm7 = vcmp.ge.f32.partialorder %v693_v10, 0.0  ;;  %vm710_vm8 = vcmp.ge.f32.partialorder %v694_v59, 0.0 }
 0x18d   :  { %vm711_vm9 = vcmp.ge.f32.partialorder %v695_v32, 0.0  ;;  %vm712_vm10 = vcmp.ge.f32.partialorder %v696_v61, 0.0  ;;  %vm713_vm11 = vcmp.ge.f32.partialorder %v697_v36, 0.0  ;;  %vm714_vm12 = vcmp.ge.f32.partialorder %v698_v62, 0.0 }
 0x18e   :  { %vm716_vm14 = vcmp.ge.f32.partialorder %v700_v60, 0.0  ;;  %vm717_vm15 = vcmp.ge.f32.partialorder %v701_v0, 0.0  ;;  %v719_v17 = vmul.f32 0.2, %v687_v45  ;;  %v720_v27 = vmul.f32 0.2, %v688_v55 }
 0x18f   :  { %v721_v3 = vmul.f32 0.2, %v689_v49  ;;  %v722_v5 = vmul.f32 0.2, %v690_v56  ;;  %v723_v6 = vmul.f32 0.2, %v691_v4 }
 0x190   :  { %v724_v8 = vmul.f32 0.2, %v692_v57  ;;  %v725_v9 = vmul.f32 0.2, %v693_v10  ;;  %v726_v11 = vmul.f32 0.2, %v694_v59  ;;  %v735_v14 = vsel %vm703_vm1, %v687_v45, %v719_v17  ;;  %vm1407_vm1 = vmmov %vm1406_vm0 }
 0x191   :  { %v727_v13 = vmul.f32 0.2, %v695_v32  ;;  %v728_v15 = vmul.f32 0.2, %v696_v61  ;;  %v729_v18 = vmul.f32 0.2, %v697_v36  ;;  %v736_v21 = vsel %vm704_vm2, %v688_v55, %v720_v27  ;;  %vm1408_vm2 = vmmov %vm1406_vm0 }
 0x192   :  { %v730_v19 = vmul.f32 0.2, %v698_v62  ;;  %751 = vst.msk [vmem:[%s1403_s5] sm:$0xff] %vm1405_vm13, %v735_v14  ;;  %v731_v22 = vmul.f32 0.2, %v699_v63  ;;  %v737_v25 = vsel %vm705_vm3, %v689_v49, %v721_v3  ;;  %v738_v48 = vsel %vm706_vm4, %v690_v56, %v722_v5  ;;  %vm1409_vm3 = vmmov %vm1406_vm0 }
 0x193   :  { %v732_v23 = vmul.f32 0.2, %v700_v60  ;;  %v733_v24 = vmul.f32 0.2, %v701_v0  ;;  %752 = vst.msk [vmem:[%s1403_s5 + $0x8] sm:$0xff] %vm1406_vm0, %v736_v21  ;;  %v739_v28 = vsel %vm707_vm5, %v691_v4, %v723_v6  ;;  %v740_v29 = vsel %vm708_vm6, %v692_v57, %v724_v8  ;;  %754 = vst.msk [vmem:[%s1403_s5 + $0x18] sm:$0xff] %vm1406_vm0, %v738_v48 }
 0x194   :  { %v734_v26 = vmul.f32 0.2, %v702_v1  ;;  %753 = vst.msk [vmem:[%s1403_s5 + $0x10] sm:$0xff] %vm1407_vm1, %v737_v25  ;;  %v741_v30 = vsel %vm709_vm7, %v693_v10, %v725_v9  ;;  %v742_v31 = vsel %vm710_vm8, %v694_v59, %v726_v11  ;;  %v743_v34 = vsel %vm711_vm9, %v695_v32, %v727_v13  ;;  %vm1411_vm5 = vmmov %vm1406_vm0 }
 0x195   :  { %v744_v35 = vsel %vm712_vm10, %v696_v61, %v728_v15  ;;  %755 = vst.msk [vmem:[%s1403_s5 + $0x20] sm:$0xff] %vm1408_vm2, %v739_v28  ;;  %v745_v53 = vsel %vm713_vm11, %v697_v36, %v729_v18  ;;  %v746_v37 = vsel %vm714_vm12, %v698_v62, %v730_v19  ;;  %vm1410_vm4 = vcmp.ge.f32.partialorder %v699_v63, 0.0  ;;  %vm1412_vm6 = vmmov %vm1406_vm0 }
 0x196   :  { %756 = vst.msk [vmem:[%s1403_s5 + $0x28] sm:$0xff] %vm1409_vm3, %v740_v29  ;;  %v747_v38 = vsel %vm1410_vm4, %v699_v63, %v731_v22  ;;  %v748_v39 = vsel %vm716_vm14, %v700_v60, %v732_v23  ;;  %vm1413_vm7 = vmmov %vm1406_vm0  ;;  %v749_v40 = vsel %vm717_vm15, %v701_v0, %v733_v24  ;;  %vm1415_vm9 = vcmp.ge.f32.partialorder %v702_v1, 0.0 }
 0x197   :  { %757 = vst.msk [vmem:[%s1403_s5 + $0x30] sm:$0xff] %vm1411_vm5, %v741_v30  ;;  %vm1414_vm8 = vmmov %vm1406_vm0  ;;  %v750_v41 = vsel %vm1415_vm9, %v702_v1, %v734_v26 }
 0x198   :  { %758 = vst.msk [vmem:[%s1403_s5 + $0x38] sm:$0xff] %vm1412_vm6, %v742_v31  ;;  %vm1416_vm10 = vmmov %vm1406_vm0 }
 0x199   :  { %759 = vst.msk [vmem:[%s1403_s5 + $0x40] sm:$0xff] %vm1413_vm7, %v743_v34  ;;  %vm1417_vm11 = vmmov %vm1406_vm0 }
 0x19a   :  { %760 = vst.msk [vmem:[%s1403_s5 + $0x48] sm:$0xff] %vm1414_vm8, %v744_v35  ;;  %vm1418_vm12 = vmmov %vm1406_vm0 }
 0x19b   :  { %761 = vst.msk [vmem:[%s1403_s5 + $0x50] sm:$0xff] %vm1416_vm10, %v745_v53  ;;  %vm1419_vm13 = vmmov %vm1406_vm0 }
 0x19c   :  { %762 = vst.msk [vmem:[%s1403_s5 + $0x58] sm:$0xff] %vm1417_vm11, %v746_v37  ;;  %vm1420_vm14 = vmmov %vm1406_vm0 }
 0x19d   :  { %763 = vst.msk [vmem:[%s1403_s5 + $0x60] sm:$0xff] %vm1418_vm12, %v747_v38  ;;  %vm1421_vm15 = vmmov %vm1406_vm0 }
 0x19e   :  { %764 = vst.msk [vmem:[%s1403_s5 + $0x68] sm:$0xff] %vm1419_vm13, %v748_v39 }
 0x19f   :  { %765 = vst.msk [vmem:[%s1403_s5 + $0x70] sm:$0xff] %vm1420_vm14, %v749_v40 }
 0x1a0   :  { %766 = vst.msk [vmem:[%s1403_s5 + $0x78] sm:$0xff] %vm1421_vm15, %v750_v41 }

// kernel: convnet_aae_forward.11
= control target key start
LH: loop header
LB: loop body
LE: loop exit
PB: predicated region body
PF: predicated region fallthrough
CT: control target
= control target key end

     0   :  { %vm210_vm0 = vcmask 261120   ;;  %vm315_vm1 = vcmask 523264   ;;  %s640_s1 = inlined_call_operand.vmem [shape: bf16[288,64], index: 1, kind: input, shape index: {}]   ;;  %s641_s0 = inlined_call_operand.vmem [shape: bf16[32,288], index: 0, kind: input, shape index: {}]   ;;  %s642_s2 = inlined_call_operand.vmem [shape: f32[1,64], index: 2, kind: input, shape index: {}]   ;;  %s643_s3 = inlined_call_operand.vmem [shape: f32[1,64], index: 3, kind: input, shape index: {}]   ;;  %s644_s4 = inlined_call_operand.vmem [shape: f32[1,64], index: 4, kind: input, shape index: {}]   ;;  %s645_s5 = inlined_call_operand.vmem [shape: f32[32,64], index: 5, kind: output, shape index: {}]  }
   0x1   :  { %v467_v0 = vld [vmem:[%s640_s1 + $0x40] sm:$0xff]   ;;  %v469_v2 = vld [vmem:[%s640_s1 + $0x48] sm:$0xff]   ;;  %v471_v4 = vld [vmem:[%s640_s1 + $0x50] sm:$0xff]  }
   0x2   :  { %v468_v1 = vld [vmem:[%s640_s1] sm:$0xff]   ;;  %427 = vmatprep.subr.bf16.mxu0 %v467_v0  ;;  %v470_v3 = vld [vmem:[%s640_s1 + $0x8] sm:$0xff]   ;;  %v472_v5 = vld [vmem:[%s640_s1 + $0x10] sm:$0xff]  }
   0x3   :  { %428 = vmatpush3.bf16.msra.mxu0 %v468_v1  ;;  %v473_v6 = vld [vmem:[%s640_s1 + $0x58] sm:$0xff]   ;;  %v475_v8 = vld [vmem:[%s640_s1 + $0x60] sm:$0xff]   ;;  %v477_v11 = vld [vmem:[%s640_s1 + $0x68] sm:$0xff]  }
   0x4   :  { %429 = vmatprep.subr.bf16.mxu0 %v469_v2  ;;  %v474_v7 = vld [vmem:[%s640_s1 + $0x18] sm:$0xff]   ;;  %v476_v9 = vld [vmem:[%s640_s1 + $0x20] sm:$0xff]   ;;  %v478_v12 = vld [vmem:[%s640_s1 + $0x28] sm:$0xff]  }
   0x5   :  { %v482_v10 = vld [vmem:[%s640_s1 + $0x80] sm:$0xff]   ;;  %v479_v13 = vld [vmem:[%s640_s1 + $0x70] sm:$0xff]   ;;  %v487_v15 = vld [vmem:[%s640_s1 + $0x88] sm:$0xff]  }
   0x6   :  { %459 = vmatprep.subr.bf16.mxu1 %v482_v10  ;;  %v486_v14 = vld [vmem:[%s641_s0 + $0x4] ss:$12 sps:$4 sm:$0xff]   ;;  %v488_v16 = vld [vmem:[%s641_s0 + $0x8] ss:$12 sps:$4 sm:$0xff]   ;;  %v489_v17 = vld [vmem:[%s641_s0 + $0x20] ss:$12 sps:$4 sm:$0xff]  }
   0x7   :  { %430 = vmatpush3.bf16.msra.mxu0 %v470_v3  ;;  %460 = vmatpush3.bf16.msra.mxu1 %v482_v10  ;;  %v480_v18 = vld [vmem:[%s640_s1 + $0x30] sm:$0xff]   ;;  %v481_v19 = vld [vmem:[%s640_s1 + $0x78] sm:$0xff]   ;;  %v484_v21 = vld [vmem:[%s641_s0] ss:$12 sps:$4 sm:$0xff]  }
   0x8   :  { %431 = vmatprep.subr.bf16.mxu0 %v471_v4  ;;  %249 = vmatprep.mubr.bf16.mxu0 %v486_v14  ;;  %v483_v20 = vld [vmem:[%s640_s1 + $0x38] sm:$0xff]   ;;  %v400_v30 = vld [vmem:[%s642_s2] ss:$0 sm:$0xff] }
   0x9   :  { %461 = vmatprep.subr.bf16.mxu1 %v487_v15  ;;  %463 = vmatprep.mubr.msk.bf16.mxu1 %vm210_vm0, %v488_v16  ;;  %v490_v22 = vld [vmem:[%s641_s0 + $0x1c] ss:$12 sps:$4 sm:$0xff]   ;;  %v492_v23 = vld [vmem:[%s641_s0 + $0x18] ss:$12 sps:$4 sm:$0xff]  }
   0xb   :  { %432 = vmatpush3.bf16.msra.mxu0 %v472_v5  ;;  %462 = vmatpush3.bf16.msra.mxu1 %v487_v15 }
   0xc   :  { %433 = vmatprep.subr.bf16.mxu0 %v473_v6 }
   0xe   :  { %464 = vmatmul.mubr.msk.bf16.vlgmr.msra.gmra.mrb[0].mxu1 %vm210_vm0, %v489_v17 }
   0xf   :  { %434 = vmatpush3.bf16.msra.mxu0 %v474_v7 }
  0x10   :  { %435 = vmatprep.subr.bf16.mxu0 %v475_v8 }
  0x13   :  { %436 = vmatpush3.bf16.msra.mxu0 %v476_v9 }
  0x14   :  { %437 = vmatprep.subr.bf16.mxu0 %v477_v11 }
  0x17   :  { %438 = vmatpush3.bf16.msra.mxu0 %v478_v12 }
  0x18   :  { %439 = vmatprep.subr.bf16.mxu0 %v479_v13 }
  0x1b   :  { %440 = vmatpush3.bf16.msra.mxu0 %v480_v18 }
  0x1c   :  { %441 = vmatprep.subr.bf16.mxu0 %v481_v19 }
  0x1f   :  { %442 = vmatpush3.bf16.msra.mxu0 %v483_v20 }
  0x22   :  { %250 = vmatmul.mubr.bf16.vlgmr.msra.gmra.mrb[0].mxu0 %v484_v21 }
  0x23   :  { %257 = vmatprep.mubr.bf16.mxu0 %v490_v22  ;;  %v361_v22 = vlaneseq }
  0x2a   :  { %258 = vmatmul.mubr.bf16.gmra.mrb[4].mxu0 %v492_v23  ;;  %v362_v23 = vshrl.u32 %v361_v22, 7 }
  0xe1   :  { %v465_v24 = vpop.f32.mrb[0].mxu1 }
  0xe2   :  { %v300_v25 = vpop.f32.mrb[1].mxu1 }
  0xe3   :  { %v466_v26 = vpop.f32.mrb[2].mxu1 }
  0xe4   :  { %v303_v27 = vpop.f32.mrb[3].mxu1 }
  0xf5   :  { %v443_v28 = vpop.f32.mrb[0].mxu0 }
  0xf6   :  { %v444_v29 = vpop.f32.mrb[1].mxu0 }
  0xf7   :  { %v445_v31 = vadd.f32 %v444_v29, %v443_v28  ;;  %v446_v32 = vpop.f32.mrb[2].mxu0  ;;  %v357_v28 = vld [vmem:[%s644_s4] sm:$0x1] }
  0xf8   :  { %v447_v33 = vpop.f32.mrb[3].mxu0 }
  0xf9   :  { %v448_v34 = vadd.f32 %v447_v33, %v446_v32  ;;  %v252_v35 = vadd.f32 %v445_v31, %v400_v30 }
  0xfb   :  { %v600_v36 = vadd.f32 %v300_v25, %v252_v35  ;;  %v255_v37 = vadd.f32 %v448_v34, %v400_v30  ;;  %v363_v25 = vsub.s32 0, %v362_v23 }
  0xfd   :  { %v602_v38 = vadd.f32 %v303_v27, %v255_v37  ;;  %v449_v39 = vpop.f32.mrb[4].mxu0  ;;  %v316_v47 = vsel %vm315_vm1, %v600_v36, 0.0 }
  0xfe   :  { %v450_v40 = vpop.f32.mrb[5].mxu0 }
  0xff   :  { %v451_v41 = vadd.f32 %v450_v40, %v449_v39  ;;  %v452_v42 = vpop.f32.mrb[6].mxu0  ;;  %v317_v44 = vsel %vm315_vm1, %v602_v38, 0.0 }
 0x100   :  { %v453_v43 = vpop.f32.mrb[7].mxu0  ;;  %v318_v50 = vadd.f32 %v317_v44, %v316_v47 }
 0x101   :  { %v260_v45 = vadd.f32 %v451_v41, %v400_v30  ;;  %v454_v46 = vadd.f32 %v453_v43, %v452_v42 }
 0x103   :  { %v309_v48 = vadd.f32 %v465_v24, %v260_v45  ;;  %v263_v49 = vadd.f32 %v454_v46, %v400_v30  ;;  %v353_v24 = vld [vmem:[%s643_s3] sm:$0x1] }
 0x105   :  { %v319_v51 = vsel %vm315_vm1, %v309_v48, 0.0  ;;  %v312_v52 = vadd.f32 %v466_v26, %v263_v49 }
 0x106   :  { %v320_v53 = vadd.f32 %v319_v51, %v318_v50 }
 0x107   :  { %v321_v54 = vsel %vm315_vm1, %v312_v52, 0.0 }
 0x108   :  { %v322_v55 = vadd.f32 %v321_v54, %v320_v53 }
 0x10a   :  { %v323_v56 = vrot.slane %v322_v55, 4 }
 0x10c   :  { %v324_v57 = vadd.f32 %v323_v56, %v322_v55 }
 0x10e   :  { %v325_v58 = vrot.slane %v324_v57, 2 }
 0x110   :  { %v326_v59 = vadd.f32 %v325_v58, %v324_v57 }
 0x112   :  { %v327_v60 = vrot.slane %v326_v59, 1 }
 0x114   :  { %v328_v61 = vadd.f32 %v327_v60, %v326_v59 }
 0x116   :  { %v330_v62 = vmul.f32 0.03125, %v328_v61 }
 0x118   :  { %v331_v63 = vsub.f32 %v600_v36, %v330_v62  ;;  %v332_v0 = vsub.f32 %v602_v38, %v330_v62  ;;  %v333_v1 = vsub.f32 %v309_v48, %v330_v62  ;;  %v334_v2 = vsub.f32 %v312_v52, %v330_v62 }
 0x11a   :  { %v335_v3 = vmul.f32 %v331_v63, %v331_v63  ;;  %v336_v4 = vmul.f32 %v332_v0, %v332_v0  ;;  %v337_v5 = vmul.f32 %v333_v1, %v333_v1  ;;  %v338_v6 = vmul.f32 %v334_v2, %v334_v2 }
 0x11c   :  { %v339_v7 = vsel %vm315_vm1, %v335_v3, 0.0  ;;  %v340_v8 = vsel %vm315_vm1, %v336_v4, 0.0  ;;  %v342_v10 = vsel %vm315_vm1, %v337_v5, 0.0  ;;  %v344_v12 = vsel %vm315_vm1, %v338_v6, 0.0 }
 0x11d   :  { %v341_v9 = vadd.f32 %v340_v8, %v339_v7 }
 0x11f   :  { %v343_v11 = vadd.f32 %v342_v10, %v341_v9 }
 0x121   :  { %v345_v13 = vadd.f32 %v344_v12, %v343_v11 }
 0x123   :  { %v346_v14 = vrot.slane %v345_v13, 4 }
 0x125   :  { %v347_v15 = vadd.f32 %v346_v14, %v345_v13 }
 0x127   :  { %v348_v16 = vrot.slane %v347_v15, 2 }
 0x129   :  { %v349_v17 = vadd.f32 %v348_v16, %v347_v15 }
 0x12b   :  { %v350_v18 = vrot.slane %v349_v17, 1 }
 0x12d   :  { %v351_v19 = vadd.f32 %v350_v18, %v349_v17 }
 0x12f   :  { %v352_v20 = vmul.f32 0.03125, %v351_v19 }
 0x131   :  { %v354_v21 = vadd.f32 1e-05, %v352_v20 }
 0x133   :  { %493 = vrsqrt.f32 %v354_v21 }
 0x13d   :  { %v494_v26 = vpop.eup %493 }
 0x13e   :  { %v356_v27 = vmul.f32 %v494_v26, %v353_v24 }
 0x140   :  { %v358_v29 = vmul.f32 %v356_v27, %v330_v62  ;;  %v364_v30 = vrot.slane %v356_v27, %v363_v25 }
 0x142   :  { %v359_v31 = vsub.f32 %v357_v28, %v358_v29  ;;  %v368_v32 = vmul.f32 %v364_v30, %v309_v48  ;;  %v369_v33 = vmul.f32 %v364_v30, %v312_v52  ;;  %v366_v34 = vmul.f32 %v364_v30, %v600_v36 }
 0x143   :  { %v367_v35 = vmul.f32 %v364_v30, %v602_v38 }
 0x144   :  { %v374_v37 = vrot.slane %v359_v31, %v363_v25 }
 0x146   :  { %v376_v39 = vadd.f32 %v374_v37, %v366_v34  ;;  %v377_v40 = vadd.f32 %v374_v37, %v367_v35  ;;  %v378_v41 = vadd.f32 %v374_v37, %v368_v32  ;;  %v379_v42 = vadd.f32 %v374_v37, %v369_v33 }
 0x148   :  { %vm380_vm2 = vcmp.ge.f32.partialorder %v376_v39, 0.0  ;;  %vm381_vm3 = vcmp.ge.f32.partialorder %v377_v40, 0.0  ;;  %vm382_vm4 = vcmp.ge.f32.partialorder %v378_v41, 0.0  ;;  %vm383_vm5 = vcmp.ge.f32.partialorder %v379_v42, 0.0 }
 0x149   :  { %v384_v43 = vmul.f32 0.2, %v376_v39  ;;  %v385_v44 = vmul.f32 0.2, %v377_v40  ;;  %v386_v45 = vmul.f32 0.2, %v378_v41 }
 0x14a   :  { %v387_v46 = vmul.f32 0.2, %v379_v42 }
 0x14b   :  { %v388_v47 = vsel %vm380_vm2, %v376_v39, %v384_v43  ;;  %v389_v48 = vsel %vm381_vm3, %v377_v40, %v385_v44  ;;  %v390_v49 = vsel %vm382_vm4, %v378_v41, %v386_v45 }
 0x14c   :  { %v391_v50 = vsel %vm383_vm5, %v379_v42, %v387_v46  ;;  %392 = vst.msk [vmem:[%s645_s5] sm:$0xff] %vm315_vm1, %v388_v47  ;;  %393 = vst.msk [vmem:[%s645_s5 + $0x8] sm:$0xff] %vm315_vm1, %v389_v48 }
 0x14d   :  { %394 = vst.msk [vmem:[%s645_s5 + $0x10] sm:$0xff] %vm315_vm1, %v390_v49  ;;  %395 = vst.msk [vmem:[%s645_s5 + $0x18] sm:$0xff] %vm315_vm1, %v391_v50 }

// kernel: convnet_aae_forward.12
= control target key start
LH: loop header
LB: loop body
LE: loop exit
PB: predicated region body
PF: predicated region fallthrough
CT: control target
= control target key end

     0   :  { %vm378_vm0 = vcmask 523264   ;;  %s994_s1 = inlined_call_operand.vmem [shape: bf16[576,64], index: 1, kind: input, shape index: {}]   ;;  %s995_s0 = inlined_call_operand.vmem [shape: bf16[32,576], index: 0, kind: input, shape index: {}]   ;;  %s996_s2 = inlined_call_operand.vmem [shape: f32[1,64], index: 2, kind: input, shape index: {}]   ;;  %s997_s3 = inlined_call_operand.vmem [shape: f32[1,64], index: 3, kind: input, shape index: {}]   ;;  %s998_s4 = inlined_call_operand.vmem [shape: f32[1,64], index: 4, kind: input, shape index: {}]   ;;  %s999_s5 = inlined_call_operand.vmem [shape: f32[32,64], index: 5, kind: output, shape index: {}]  }
   0x1   :  { %v739_v0 = vld [vmem:[%s994_s1 + $0x40] sm:$0xff]   ;;  %v743_v4 = vld [vmem:[%s994_s1 + $0x48] sm:$0xff]   ;;  %v747_v8 = vld [vmem:[%s994_s1 + $0x50] sm:$0xff]  }
   0x2   :  { %v740_v1 = vld [vmem:[%s994_s1] sm:$0xff]   ;;  %665 = vmatprep.subr.bf16.mxu0 %v739_v0  ;;  %v744_v5 = vld [vmem:[%s994_s1 + $0x8] sm:$0xff]   ;;  %v748_v9 = vld [vmem:[%s994_s1 + $0x10] sm:$0xff]  }
   0x3   :  { %v741_v2 = vld [vmem:[%s994_s1 + $0xc0] sm:$0xff]   ;;  %666 = vmatpush3.bf16.msra.mxu0 %v740_v1  ;;  %v745_v6 = vld [vmem:[%s994_s1 + $0xc8] sm:$0xff]   ;;  %v749_v10 = vld [vmem:[%s994_s1 + $0xd0] sm:$0xff]  }
   0x4   :  { %v742_v3 = vld [vmem:[%s994_s1 + $0x80] sm:$0xff]   ;;  %693 = vmatprep.subr.bf16.mxu1 %v741_v2  ;;  %667 = vmatprep.subr.bf16.mxu0 %v743_v4  ;;  %v746_v7 = vld [vmem:[%s994_s1 + $0x88] sm:$0xff]   ;;  %v750_v11 = vld [vmem:[%s994_s1 + $0x90] sm:$0xff]  }
   0x5   :  { %694 = vmatpush3.bf16.msra.mxu1 %v742_v3  ;;  %v751_v12 = vld [vmem:[%s994_s1 + $0x58] sm:$0xff]   ;;  %v755_v16 = vld [vmem:[%s994_s1 + $0x60] sm:$0xff]   ;;  %v759_v20 = vld [vmem:[%s994_s1 + $0x68] sm:$0xff]  }
   0x6   :  { %695 = vmatprep.subr.bf16.mxu1 %v745_v6  ;;  %v752_v13 = vld [vmem:[%s994_s1 + $0x18] sm:$0xff]   ;;  %v756_v17 = vld [vmem:[%s994_s1 + $0x20] sm:$0xff]   ;;  %v760_v21 = vld [vmem:[%s994_s1 + $0x28] sm:$0xff]  }
   0x7   :  { %668 = vmatpush3.bf16.msra.mxu0 %v744_v5  ;;  %v753_v14 = vld [vmem:[%s994_s1 + $0xd8] sm:$0xff]   ;;  %v757_v18 = vld [vmem:[%s994_s1 + $0xe0] sm:$0xff]   ;;  %v761_v22 = vld [vmem:[%s994_s1 + $0xe8] sm:$0xff]  }
   0x8   :  { %669 = vmatprep.subr.bf16.mxu0 %v747_v8  ;;  %v754_v15 = vld [vmem:[%s994_s1 + $0x98] sm:$0xff]   ;;  %v758_v19 = vld [vmem:[%s994_s1 + $0xa0] sm:$0xff]   ;;  %v762_v23 = vld [vmem:[%s994_s1 + $0xa8] sm:$0xff]  }
   0x9   :  { %696 = vmatpush3.bf16.msra.mxu1 %v746_v7  ;;  %v763_v24 = vld [vmem:[%s994_s1 + $0x70] sm:$0xff]   ;;  %v767_v28 = vld [vmem:[%s994_s1 + $0x78] sm:$0xff]   ;;  %v774_v34 = vld [vmem:[%s994_s1 + $0x100] sm:$0xff]  }
   0xa   :  { %697 = vmatprep.subr.bf16.mxu1 %v749_v10  ;;  %v764_v25 = vld [vmem:[%s994_s1 + $0x30] sm:$0xff]   ;;  %v768_v29 = vld [vmem:[%s994_s1 + $0x38] sm:$0xff]   ;;  %v777_v36 = vld [vmem:[%s995_s0 + $0xc] ss:$20 sps:$4 sm:$0xff]  }
   0xb   :  { %670 = vmatpush3.bf16.msra.mxu0 %v748_v9  ;;  %v765_v26 = vld [vmem:[%s994_s1 + $0xf0] sm:$0xff]   ;;  %v769_v30 = vld [vmem:[%s994_s1 + $0xf8] sm:$0xff]   ;;  %v778_v37 = vld [vmem:[%s994_s1 + $0x108] sm:$0xff]   ;;  %466 = vmatprep.mubr.bf16.mxu1 %v777_v36 }
   0xc   :  { %671 = vmatprep.subr.bf16.mxu0 %v751_v12  ;;  %v766_v27 = vld [vmem:[%s994_s1 + $0xb0] sm:$0xff]   ;;  %v772_v32 = vld [vmem:[%s995_s0 + $0x4] ss:$20 sps:$4 sm:$0xff]   ;;  %v775_v35 = vld [vmem:[%s995_s0 + $0x8] ss:$20 sps:$4 sm:$0xff]  }
   0xd   :  { %698 = vmatpush3.bf16.msra.mxu1 %v750_v11  ;;  %v770_v31 = vld [vmem:[%s995_s0] ss:$20 sps:$4 sm:$0xff]   ;;  %v773_v33 = vld [vmem:[%s994_s1 + $0xb8] sm:$0xff]   ;;  %417 = vmatprep.mubr.bf16.mxu0 %v772_v32  ;;  %v785_v42 = vld [vmem:[%s995_s0 + $0x30] ss:$20 sps:$4 sm:$0xff]  }
   0xe   :  { %699 = vmatprep.subr.bf16.mxu1 %v753_v14  ;;  %v779_v38 = vld [vmem:[%s995_s0 + $0x2c] ss:$20 sps:$4 sm:$0xff]   ;;  %v781_v39 = vld [vmem:[%s995_s0 + $0x28] ss:$20 sps:$4 sm:$0xff]   ;;  %v782_v40 = vld [vmem:[%s994_s1 + $0x110] sm:$0xff]  }
   0xf   :  { %672 = vmatpush3.bf16.msra.mxu0 %v752_v13  ;;  %v783_v41 = vld [vmem:[%s995_s0 + $0x34] ss:$20 sps:$4 sm:$0xff]   ;;  %v786_v43 = vld [vmem:[%s994_s1 + $0x118] sm:$0xff]   ;;  %v787_v44 = vld [vmem:[%s995_s0 + $0x10] ss:$20 sps:$4 sm:$0xff]  }
  0x10   :  { %673 = vmatprep.subr.bf16.mxu0 %v755_v16  ;;  %v788_v45 = vld [vmem:[%s995_s0 + $0x38] ss:$20 sps:$4 sm:$0xff]   ;;  %v616_v47 = vld [vmem:[%s996_s2] ss:$0 sm:$0xff] }
  0x11   :  { %700 = vmatpush3.bf16.msra.mxu1 %v754_v15 }
  0x12   :  { %701 = vmatprep.subr.bf16.mxu1 %v757_v18 }
  0x13   :  { %674 = vmatpush3.bf16.msra.mxu0 %v756_v17 }
  0x14   :  { %675 = vmatprep.subr.bf16.mxu0 %v759_v20 }
  0x15   :  { %702 = vmatpush3.bf16.msra.mxu1 %v758_v19 }
  0x16   :  { %703 = vmatprep.subr.bf16.mxu1 %v761_v22 }
  0x17   :  { %676 = vmatpush3.bf16.msra.mxu0 %v760_v21 }
  0x18   :  { %677 = vmatprep.subr.bf16.mxu0 %v763_v24 }
  0x19   :  { %704 = vmatpush3.bf16.msra.mxu1 %v762_v23 }
  0x1a   :  { %705 = vmatprep.subr.bf16.mxu1 %v765_v26 }
  0x1b   :  { %678 = vmatpush3.bf16.msra.mxu0 %v764_v25 }
  0x1c   :  { %679 = vmatprep.subr.bf16.mxu0 %v767_v28 }
  0x1d   :  { %706 = vmatpush3.bf16.msra.mxu1 %v766_v27 }
  0x1e   :  { %707 = vmatprep.subr.bf16.mxu1 %v769_v30 }
  0x1f   :  { %680 = vmatpush3.bf16.msra.mxu0 %v768_v29 }
  0x20   :  { %727 = vmatprep.subr.bf16.mxu0 %v774_v34 }
  0x21   :  { %708 = vmatpush3.bf16.msra.mxu1 %v773_v33 }
  0x22   :  { %418 = vmatmul.mubr.bf16.vlgmr.msra.gmra.mrb[0].mxu0 %v770_v31 }
  0x23   :  { %728 = vmatpush3.bf16.msra.mxu0 %v774_v34  ;;  %425 = vmatprep.mubr.bf16.mxu0 %v779_v38 }
  0x24   :  { %467 = vmatmul.mubr.bf16.vlgmr.msra.gmra.mrb[0].mxu1 %v775_v35  ;;  %729 = vmatprep.subr.bf16.mxu0 %v778_v37 }
  0x25   :  { %474 = vmatprep.mubr.bf16.mxu1 %v783_v41 }
  0x27   :  { %730 = vmatpush3.bf16.msra.mxu0 %v778_v37 }
  0x28   :  { %731 = vmatprep.subr.bf16.mxu0 %v782_v40 }
  0x2a   :  { %426 = vmatmul.mubr.bf16.gmra.mrb[4].mxu0 %v781_v39 }
  0x2b   :  { %735 = vmatprep.mubr.msk.bf16.mxu0 %vm378_vm0, %v787_v44  ;;  %732 = vmatpush3.bf16.msra.mxu0 %v782_v40 }
  0x2c   :  { %475 = vmatmul.mubr.bf16.gmra.mrb[4].mxu1 %v785_v42  ;;  %733 = vmatprep.subr.bf16.mxu0 %v786_v43 }
  0x2f   :  { %734 = vmatpush3.bf16.msra.mxu0 %v786_v43 }
  0x32   :  { %736 = vmatmul.mubr.msk.bf16.vlgmr.msra.gmra.mrb[8].mxu0 %vm378_vm0, %v788_v45 }
  0xf5   :  { %v681_v46 = vpop.f32.mrb[0].mxu0 }
  0xf6   :  { %v682_v48 = vpop.f32.mrb[1].mxu0 }
  0xf7   :  { %v683_v49 = vadd.f32 %v682_v48, %v681_v46  ;;  %v684_v50 = vpop.f32.mrb[2].mxu0  ;;  %v709_v51 = vpop.f32.mrb[0].mxu1 }
  0xf8   :  { %v685_v52 = vpop.f32.mrb[3].mxu0  ;;  %v710_v55 = vpop.f32.mrb[1].mxu1 }
  0xf9   :  { %v420_v53 = vadd.f32 %v683_v49, %v616_v47  ;;  %v686_v54 = vadd.f32 %v685_v52, %v684_v50  ;;  %v711_v56 = vadd.f32 %v710_v55, %v709_v51  ;;  %v712_v57 = vpop.f32.mrb[2].mxu1 }
  0xfa   :  { %v713_v59 = vpop.f32.mrb[3].mxu1 }
  0xfb   :  { %v423_v58 = vadd.f32 %v686_v54, %v616_v47  ;;  %v714_v60 = vadd.f32 %v713_v59, %v712_v57  ;;  %v469_v61 = vadd.f32 %v711_v56, %v420_v53 }
  0xfd   :  { %v687_v62 = vpop.f32.mrb[4].mxu0  ;;  %v472_v0 = vadd.f32 %v714_v60, %v423_v58  ;;  %v577_v60 = vlaneseq }
  0xfe   :  { %v688_v63 = vpop.f32.mrb[5].mxu0 }
  0xff   :  { %v689_v1 = vadd.f32 %v688_v63, %v687_v62  ;;  %v690_v2 = vpop.f32.mrb[6].mxu0  ;;  %v715_v3 = vpop.f32.mrb[4].mxu1  ;;  %v569_v62 = vld [vmem:[%s997_s3] sm:$0x1] }
 0x100   :  { %v691_v4 = vpop.f32.mrb[7].mxu0  ;;  %v716_v7 = vpop.f32.mrb[5].mxu1 }
 0x101   :  { %v428_v5 = vadd.f32 %v689_v1, %v616_v47  ;;  %v692_v6 = vadd.f32 %v691_v4, %v690_v2  ;;  %v717_v8 = vadd.f32 %v716_v7, %v715_v3  ;;  %v718_v9 = vpop.f32.mrb[6].mxu1  ;;  %v573_v2 = vld [vmem:[%s998_s4] sm:$0x1] }
 0x102   :  { %v719_v11 = vpop.f32.mrb[7].mxu1 }
 0x103   :  { %v431_v10 = vadd.f32 %v692_v6, %v616_v47  ;;  %v720_v12 = vadd.f32 %v719_v11, %v718_v9  ;;  %v477_v13 = vadd.f32 %v717_v8, %v428_v5 }
 0x105   :  { %v737_v14 = vpop.f32.mrb[8].mxu0  ;;  %v480_v15 = vadd.f32 %v720_v12, %v431_v10 }
 0x106   :  { %v526_v16 = vadd.f32 %v737_v14, %v477_v13  ;;  %v517_v17 = vpop.f32.mrb[9].mxu0 }
 0x107   :  { %v518_v18 = vadd.f32 %v517_v17, %v469_v61  ;;  %v738_v19 = vpop.f32.mrb[10].mxu0  ;;  %v578_v61 = vshrl.u32 %v577_v60, 7 }
 0x108   :  { %v529_v20 = vadd.f32 %v738_v19, %v480_v15  ;;  %v520_v21 = vpop.f32.mrb[11].mxu0  ;;  %v535_v26 = vsel %vm378_vm0, %v526_v16, 0.0 }
 0x109   :  { %v521_v22 = vadd.f32 %v520_v21, %v472_v0  ;;  %v532_v23 = vsel %vm378_vm0, %v518_v18, 0.0  ;;  %v579_v63 = vsub.s32 0, %v578_v61 }
 0x10a   :  { %v537_v28 = vsel %vm378_vm0, %v529_v20, 0.0 }
 0x10b   :  { %v533_v24 = vsel %vm378_vm0, %v521_v22, 0.0 }
 0x10c   :  { %v534_v25 = vadd.f32 %v533_v24, %v532_v23 }
 0x10e   :  { %v536_v27 = vadd.f32 %v535_v26, %v534_v25 }
 0x110   :  { %v538_v29 = vadd.f32 %v537_v28, %v536_v27 }
 0x112   :  { %v539_v30 = vrot.slane %v538_v29, 4 }
 0x114   :  { %v540_v31 = vadd.f32 %v539_v30, %v538_v29 }
 0x116   :  { %v541_v32 = vrot.slane %v540_v31, 2 }
 0x118   :  { %v542_v33 = vadd.f32 %v541_v32, %v540_v31 }
 0x11a   :  { %v543_v34 = vrot.slane %v542_v33, 1 }
 0x11c   :  { %v544_v35 = vadd.f32 %v543_v34, %v542_v33 }
 0x11e   :  { %v546_v36 = vmul.f32 0.03125, %v544_v35 }
 0x120   :  { %v547_v37 = vsub.f32 %v518_v18, %v546_v36  ;;  %v548_v38 = vsub.f32 %v521_v22, %v546_v36  ;;  %v549_v39 = vsub.f32 %v526_v16, %v546_v36  ;;  %v550_v40 = vsub.f32 %v529_v20, %v546_v36 }
 0x122   :  { %v551_v41 = vmul.f32 %v547_v37, %v547_v37  ;;  %v552_v42 = vmul.f32 %v548_v38, %v548_v38  ;;  %v553_v43 = vmul.f32 %v549_v39, %v549_v39  ;;  %v554_v44 = vmul.f32 %v550_v40, %v550_v40 }
 0x124   :  { %v555_v45 = vsel %vm378_vm0, %v551_v41, 0.0  ;;  %v556_v46 = vsel %vm378_vm0, %v552_v42, 0.0  ;;  %v558_v48 = vsel %vm378_vm0, %v553_v43, 0.0  ;;  %v560_v50 = vsel %vm378_vm0, %v554_v44, 0.0 }
 0x125   :  { %v557_v47 = vadd.f32 %v556_v46, %v555_v45 }
 0x127   :  { %v559_v49 = vadd.f32 %v558_v48, %v557_v47 }
 0x129   :  { %v561_v51 = vadd.f32 %v560_v50, %v559_v49 }
 0x12b   :  { %v562_v52 = vrot.slane %v561_v51, 4 }
 0x12d   :  { %v563_v53 = vadd.f32 %v562_v52, %v561_v51 }
 0x12f   :  { %v564_v54 = vrot.slane %v563_v53, 2 }
 0x131   :  { %v565_v55 = vadd.f32 %v564_v54, %v563_v53 }
 0x133   :  { %v566_v56 = vrot.slane %v565_v55, 1 }
 0x135   :  { %v567_v57 = vadd.f32 %v566_v56, %v565_v55 }
 0x137   :  { %v568_v58 = vmul.f32 0.03125, %v567_v57 }
 0x139   :  { %v570_v59 = vadd.f32 1e-05, %v568_v58 }
 0x13b   :  { %789 = vrsqrt.f32 %v570_v59 }
 0x145   :  { %v790_v0 = vpop.eup %789 }
 0x146   :  { %v572_v1 = vmul.f32 %v790_v0, %v569_v62 }
 0x148   :  { %v574_v3 = vmul.f32 %v572_v1, %v546_v36  ;;  %v580_v4 = vrot.slane %v572_v1, %v579_v63 }
 0x14a   :  { %v575_v5 = vsub.f32 %v573_v2, %v574_v3  ;;  %v583_v6 = vmul.f32 %v580_v4, %v521_v22  ;;  %v584_v7 = vmul.f32 %v580_v4, %v526_v16  ;;  %v585_v8 = vmul.f32 %v580_v4, %v529_v20 }
 0x14b   :  { %v582_v9 = vmul.f32 %v580_v4, %v518_v18 }
 0x14c   :  { %v590_v10 = vrot.slane %v575_v5, %v579_v63 }
 0x14e   :  { %v592_v11 = vadd.f32 %v590_v10, %v582_v9  ;;  %v593_v12 = vadd.f32 %v590_v10, %v583_v6  ;;  %v594_v13 = vadd.f32 %v590_v10, %v584_v7  ;;  %v595_v14 = vadd.f32 %v590_v10, %v585_v8 }
 0x150   :  { %vm596_vm1 = vcmp.ge.f32.partialorder %v592_v11, 0.0  ;;  %vm597_vm2 = vcmp.ge.f32.partialorder %v593_v12, 0.0  ;;  %vm598_vm3 = vcmp.ge.f32.partialorder %v594_v13, 0.0  ;;  %vm599_vm4 = vcmp.ge.f32.partialorder %v595_v14, 0.0 }
 0x151   :  { %v600_v15 = vmul.f32 0.2, %v592_v11  ;;  %v601_v17 = vmul.f32 0.2, %v593_v12  ;;  %v602_v19 = vmul.f32 0.2, %v594_v13 }
 0x152   :  { %v603_v21 = vmul.f32 0.2, %v595_v14 }
 0x153   :  { %v604_v23 = vsel %vm596_vm1, %v592_v11, %v600_v15  ;;  %v605_v24 = vsel %vm597_vm2, %v593_v12, %v601_v17  ;;  %v606_v25 = vsel %vm598_vm3, %v594_v13, %v602_v19 }
 0x154   :  { %v607_v22 = vsel %vm599_vm4, %v595_v14, %v603_v21  ;;  %608 = vst.msk [vmem:[%s999_s5] sm:$0xff] %vm378_vm0, %v604_v23  ;;  %609 = vst.msk [vmem:[%s999_s5 + $0x8] sm:$0xff] %vm378_vm0, %v605_v24 }
 0x155   :  { %610 = vst.msk [vmem:[%s999_s5 + $0x10] sm:$0xff] %vm378_vm0, %v606_v25  ;;  %611 = vst.msk [vmem:[%s999_s5 + $0x18] sm:$0xff] %vm378_vm0, %v607_v22 }

// kernel: convnet_aae_forward.13
= control target key start
LH: loop header
LB: loop body
LE: loop exit
PB: predicated region body
PF: predicated region fallthrough
CT: control target
= control target key end

     0   :  { %v655_v35 = vmov 0.0   ;;  %vm656_vm0 = vmmov 0   ;;  %vm336_vm1 = vcmask 523264   ;;  %s816_s1 = inlined_call_operand.vmem [shape: bf16[576,128], index: 1, kind: input, shape index: {}]   ;;  %s817_s0 = inlined_call_operand.vmem [shape: bf16[8,576], index: 0, kind: input, shape index: {}]   ;;  %s818_s2 = inlined_call_operand.vmem [shape: f32[1,128], index: 2, kind: input, shape index: {}]   ;;  %s819_s3 = inlined_call_operand.vmem [shape: f32[1,128], index: 3, kind: input, shape index: {}]   ;;  %s820_s4 = inlined_call_operand.vmem [shape: f32[1,128], index: 4, kind: input, shape index: {}]   ;;  %s821_s5 = inlined_call_operand.vmem [shape: f32[8,128], index: 5, kind: output, shape index: {}]  }
   0x1   :  { %v612_v0 = vld [vmem:[%s816_s1 + $0x40] sm:$0xff]   ;;  %v616_v4 = vld [vmem:[%s816_s1 + $0x48] sm:$0xff]   ;;  %v620_v8 = vld [vmem:[%s816_s1 + $0x50] sm:$0xff]  }
   0x2   :  { %v613_v1 = vld [vmem:[%s816_s1] sm:$0xff]   ;;  %549 = vmatprep.subr.bf16.mxu0 %v612_v0  ;;  %v617_v5 = vld [vmem:[%s816_s1 + $0x8] sm:$0xff]   ;;  %v621_v9 = vld [vmem:[%s816_s1 + $0x10] sm:$0xff]  }
   0x3   :  { %v614_v2 = vld [vmem:[%s816_s1 + $0xc0] sm:$0xff]   ;;  %550 = vmatpush3.bf16.msra.mxu0 %v613_v1  ;;  %v618_v6 = vld [vmem:[%s816_s1 + $0xc8] sm:$0xff]   ;;  %v622_v10 = vld [vmem:[%s816_s1 + $0xd0] sm:$0xff]  }
   0x4   :  { %v615_v3 = vld [vmem:[%s816_s1 + $0x80] sm:$0xff]   ;;  %571 = vmatprep.subr.bf16.mxu1 %v614_v2  ;;  %551 = vmatprep.subr.bf16.mxu0 %v616_v4  ;;  %v619_v7 = vld [vmem:[%s816_s1 + $0x88] sm:$0xff]   ;;  %v623_v11 = vld [vmem:[%s816_s1 + $0x90] sm:$0xff]  }
   0x5   :  { %572 = vmatpush3.bf16.msra.mxu1 %v615_v3  ;;  %v624_v12 = vld [vmem:[%s816_s1 + $0x58] sm:$0xff]   ;;  %v628_v16 = vld [vmem:[%s816_s1 + $0x60] sm:$0xff]   ;;  %v632_v20 = vld [vmem:[%s816_s1 + $0x68] sm:$0xff]  }
   0x6   :  { %573 = vmatprep.subr.bf16.mxu1 %v618_v6  ;;  %v625_v13 = vld [vmem:[%s816_s1 + $0x18] sm:$0xff]   ;;  %v629_v17 = vld [vmem:[%s816_s1 + $0x20] sm:$0xff]   ;;  %v633_v21 = vld [vmem:[%s816_s1 + $0x28] sm:$0xff]  }
   0x7   :  { %552 = vmatpush3.bf16.msra.mxu0 %v617_v5  ;;  %v626_v14 = vld [vmem:[%s816_s1 + $0xd8] sm:$0xff]   ;;  %v630_v18 = vld [vmem:[%s816_s1 + $0xe0] sm:$0xff]   ;;  %v634_v22 = vld [vmem:[%s816_s1 + $0xe8] sm:$0xff]  }
   0x8   :  { %553 = vmatprep.subr.bf16.mxu0 %v620_v8  ;;  %v627_v15 = vld [vmem:[%s816_s1 + $0x98] sm:$0xff]   ;;  %v631_v19 = vld [vmem:[%s816_s1 + $0xa0] sm:$0xff]   ;;  %v635_v23 = vld [vmem:[%s816_s1 + $0xa8] sm:$0xff]  }
   0x9   :  { %574 = vmatpush3.bf16.msra.mxu1 %v619_v7  ;;  %v636_v24 = vld [vmem:[%s816_s1 + $0x70] sm:$0xff]   ;;  %v640_v28 = vld [vmem:[%s816_s1 + $0x78] sm:$0xff]   ;;  %v21_v31 = vld [vmem:[%s817_s0] sm:$0xff] }
   0xa   :  { %575 = vmatprep.subr.bf16.mxu1 %v622_v10  ;;  %v637_v25 = vld [vmem:[%s816_s1 + $0x30] sm:$0xff]   ;;  %v641_v29 = vld [vmem:[%s816_s1 + $0x38] sm:$0xff]   ;;  %v507_v32 = vcombine.low %v21_v31, %v21_v31  ;;  %v508_v33 = vcombine.high %v21_v31, %v21_v31  ;;  %v22_v36 = vld [vmem:[%s817_s0 + $0x8] sm:$0xff] }
   0xb   :  { %554 = vmatpush3.bf16.msra.mxu0 %v621_v9  ;;  %v638_v26 = vld [vmem:[%s816_s1 + $0xf0] sm:$0xff]   ;;  %v642_v30 = vld [vmem:[%s816_s1 + $0xf8] sm:$0xff]   ;;  %v509_v37 = vcombine.low %v22_v36, %v22_v36  ;;  %v510_v38 = vcombine.high %v22_v36, %v22_v36  ;;  %v649_v39 = vld [vmem:[%s816_s1 + $0x100] sm:$0xff]  }
   0xc   :  { %555 = vmatprep.subr.bf16.mxu0 %v624_v12  ;;  %v639_v27 = vld [vmem:[%s816_s1 + $0xb0] sm:$0xff]   ;;  %v646_v34 = vld [vmem:[%s816_s1 + $0xb8] sm:$0xff]   ;;  %372 = vmatprep.mubr.bf16.mxu0 %v508_v33  ;;  %v650_v40 = vld [vmem:[%s816_s1 + $0x108] sm:$0xff]  }
   0xd   :  { %576 = vmatpush3.bf16.msra.mxu1 %v623_v11  ;;  %412 = vmatprep.mubr.bf16.mxu1 %v510_v38  ;;  %v651_v41 = vld [vmem:[%s816_s1 + $0x110] sm:$0xff]   ;;  %v652_v42 = vld [vmem:[%s816_s1 + $0x118] sm:$0xff]   ;;  %v506_v45 = vld [vmem:[%s818_s2] ss:$0 sm:$0xff] }
   0xe   :  { %577 = vmatprep.subr.bf16.mxu1 %v626_v14  ;;  %v645_v43 = vld [vmem:[%s817_s0 + $0x10] ss:$0 sps:$4 sm:$0xff]  }
   0xf   :  { %556 = vmatpush3.bf16.msra.mxu0 %v625_v13 }
  0x10   :  { %557 = vmatprep.subr.bf16.mxu0 %v628_v16 }
  0x11   :  { %578 = vmatpush3.bf16.msra.mxu1 %v627_v15  ;;  %v485_v15 = vlaneseq }
  0x12   :  { %579 = vmatprep.subr.bf16.mxu1 %v630_v18 }
  0x13   :  { %558 = vmatpush3.bf16.msra.mxu0 %v629_v17  ;;  %v486_v16 = vshrl.u32 %v485_v15, 7  ;;  %v477_v17 = vld [vmem:[%s819_s3] sm:$0x1] }
  0x14   :  { %559 = vmatprep.subr.bf16.mxu0 %v632_v20 }
  0x15   :  { %580 = vmatpush3.bf16.msra.mxu1 %v631_v19  ;;  %v487_v18 = vsub.s32 0, %v486_v16 }
  0x16   :  { %581 = vmatprep.subr.bf16.mxu1 %v634_v22 }
  0x17   :  { %560 = vmatpush3.bf16.msra.mxu0 %v633_v21  ;;  %v481_v21 = vld [vmem:[%s820_s4] sm:$0x1] }
  0x18   :  { %561 = vmatprep.subr.bf16.mxu0 %v636_v24 }
  0x19   :  { %582 = vmatpush3.bf16.msra.mxu1 %v635_v23 }
  0x1a   :  { %583 = vmatprep.subr.bf16.mxu1 %v638_v26 }
  0x1b   :  { %562 = vmatpush3.bf16.msra.mxu0 %v637_v25 }
  0x1c   :  { %563 = vmatprep.subr.bf16.mxu0 %v640_v28 }
  0x1d   :  { %584 = vmatpush3.bf16.msra.mxu1 %v639_v27 }
  0x1e   :  { %585 = vmatprep.subr.bf16.mxu1 %v642_v30 }
  0x1f   :  { %564 = vmatpush3.bf16.msra.mxu0 %v641_v29 }
  0x20   :  { %598 = vmatprep.subr.bf16.mxu0 %v655_v35 }
  0x21   :  { %586 = vmatpush3.bf16.msra.mxu1 %v646_v34 }
  0x22   :  { %373 = vmatmul.mubr.bf16.vlgmr.msra.gmra.mrb[0].mxu0 %v507_v32 }
  0x23   :  { %599 = vmatpush3.bf16.msra.mxu0 %v649_v39  ;;  %606 = vmatprep.mubr.msk.bf16.mxu0 %vm656_vm0, %v655_v35 }
  0x24   :  { %413 = vmatmul.mubr.bf16.vlgmr.msra.gmra.mrb[0].mxu1 %v509_v37  ;;  %600 = vmatprep.subr.bf16.mxu0 %v655_v35 }
  0x27   :  { %601 = vmatpush3.bf16.msra.mxu0 %v650_v40 }
  0x28   :  { %602 = vmatprep.subr.bf16.mxu0 %v655_v35 }
  0x2b   :  { %603 = vmatpush3.bf16.msra.mxu0 %v651_v41 }
  0x2c   :  { %604 = vmatprep.subr.bf16.mxu0 %v655_v35 }
  0x2f   :  { %605 = vmatpush3.bf16.msra.mxu0 %v652_v42 }
  0x32   :  { %607 = vmatmul.mubr.msk.bf16.vlgmr.msra.gmra.mrb[4].mxu0 %vm336_vm1, %v645_v43 }
  0xf5   :  { %v565_v44 = vpop.f32.mrb[0].mxu0 }
  0xf6   :  { %v566_v46 = vpop.f32.mrb[1].mxu0 }
  0xf7   :  { %v567_v47 = vadd.f32 %v566_v46, %v565_v44  ;;  %v568_v48 = vpop.f32.mrb[2].mxu0  ;;  %v587_v49 = vpop.f32.mrb[0].mxu1 }
  0xf8   :  { %v569_v50 = vpop.f32.mrb[3].mxu0  ;;  %v588_v51 = vpop.f32.mrb[1].mxu1 }
  0xf9   :  { %v375_v52 = vadd.f32 %v567_v47, %v506_v45  ;;  %v589_v53 = vadd.f32 %v588_v51, %v587_v49  ;;  %v590_v54 = vpop.f32.mrb[2].mxu1 }
  0xfa   :  { %v591_v55 = vpop.f32.mrb[3].mxu1 }
  0xfb   :  { %v415_v56 = vadd.f32 %v589_v53, %v375_v52 }
 0x105   :  { %v454_v57 = vpop.f32.mrb[4].mxu0 }
 0x106   :  { %v455_v58 = vadd.f32 %v454_v57, %v415_v56  ;;  %v608_v59 = vpop.f32.mrb[5].mxu0 }
 0x107   :  { %v457_v60 = vpop.f32.mrb[6].mxu0 }
 0x108   :  { %v460_v61 = vrot.slane %v455_v58, 4  ;;  %v609_v62 = vpop.f32.mrb[7].mxu0 }
 0x10a   :  { %v461_v63 = vadd.f32 %v460_v61, %v455_v58 }
 0x10c   :  { %v462_v0 = vrot.slane %v461_v63, 2 }
 0x10e   :  { %v463_v1 = vadd.f32 %v462_v0, %v461_v63 }
 0x110   :  { %v464_v2 = vrot.slane %v463_v1, 1 }
 0x112   :  { %v465_v3 = vadd.f32 %v464_v2, %v463_v1 }
 0x114   :  { %v467_v4 = vmul.f32 0.125, %v465_v3 }
 0x116   :  { %v468_v5 = vsub.f32 %v455_v58, %v467_v4 }
 0x118   :  { %v469_v6 = vmul.f32 %v468_v5, %v468_v5 }
 0x11a   :  { %v470_v7 = vrot.slane %v469_v6, 4 }
 0x11c   :  { %v471_v8 = vadd.f32 %v470_v7, %v469_v6 }
 0x11e   :  { %v472_v9 = vrot.slane %v471_v8, 2 }
 0x120   :  { %v473_v10 = vadd.f32 %v472_v9, %v471_v8 }
 0x122   :  { %v474_v11 = vrot.slane %v473_v10, 1 }
 0x124   :  { %v475_v12 = vadd.f32 %v474_v11, %v473_v10 }
 0x126   :  { %v476_v13 = vmul.f32 0.125, %v475_v12 }
 0x128   :  { %v478_v14 = vadd.f32 1e-05, %v476_v13 }
 0x12a   :  { %653 = vrsqrt.f32 %v478_v14 }
 0x134   :  { %v654_v19 = vpop.eup %653 }
 0x135   :  { %v480_v20 = vmul.f32 %v654_v19, %v477_v17 }
 0x137   :  { %v482_v22 = vmul.f32 %v480_v20, %v467_v4  ;;  %v488_v23 = vrot.slane %v480_v20, %v487_v18 }
 0x139   :  { %v483_v24 = vsub.f32 %v481_v21, %v482_v22  ;;  %v490_v25 = vmul.f32 %v488_v23, %v455_v58 }
 0x13b   :  { %v495_v26 = vrot.slane %v483_v24, %v487_v18 }
 0x13d   :  { %v497_v27 = vadd.f32 %v495_v26, %v490_v25 }
 0x13f   :  { %vm498_vm2 = vcmp.ge.f32.partialorder %v497_v27, 0.0  ;;  %v499_v28 = vmul.f32 0.2, %v497_v27 }
 0x141   :  { %v500_v29 = vsel %vm498_vm2, %v497_v27, %v499_v28 }
 0x142   :  { %501 = vst [vmem:[%s821_s5] sm:$0xff] %v500_v29 }

// kernel: convnet_aae_forward.14
= control target key start
LH: loop header
LB: loop body
LE: loop exit
PB: predicated region body
PF: predicated region fallthrough
CT: control target
= control target key end

     0   :  { %vm1172_vm0 = vmmov 0   ;;  %s1446_s1 = inlined_call_operand.vmem [shape: bf16[1152,128], index: 1, kind: input, shape index: {}]   ;;  %s1447_s0 = inlined_call_operand.vmem [shape: bf16[8,1152], index: 0, kind: input, shape index: {}]   ;;  %s1448_s2 = inlined_call_operand.vmem [shape: f32[1,128], index: 2, kind: input, shape index: {}]   ;;  %s1449_s3 = inlined_call_operand.vmem [shape: f32[1,128], index: 3, kind: input, shape index: {}]   ;;  %s1450_s4 = inlined_call_operand.vmem [shape: f32[1,128], index: 4, kind: input, shape index: {}]   ;;  %s1451_s5 = inlined_call_operand.vmem [shape: f32[8,128], index: 5, kind: output, shape index: {}]  }
   0x1   :  { %v1088_v0 = vld [vmem:[%s1446_s1 + $0x40] sm:$0xff]   ;;  %v1092_v4 = vld [vmem:[%s1446_s1 + $0x48] sm:$0xff]   ;;  %v1096_v8 = vld [vmem:[%s1446_s1 + $0x50] sm:$0xff]  }
   0x2   :  { %v1089_v1 = vld [vmem:[%s1446_s1] sm:$0xff]   ;;  %969 = vmatprep.subr.bf16.mxu0 %v1088_v0  ;;  %v1093_v5 = vld [vmem:[%s1446_s1 + $0x8] sm:$0xff]   ;;  %v1097_v9 = vld [vmem:[%s1446_s1 + $0x10] sm:$0xff]  }
   0x3   :  { %v1090_v2 = vld [vmem:[%s1446_s1 + $0xc0] sm:$0xff]   ;;  %970 = vmatpush3.bf16.msra.mxu0 %v1089_v1  ;;  %v1094_v6 = vld [vmem:[%s1446_s1 + $0xc8] sm:$0xff]   ;;  %v1098_v10 = vld [vmem:[%s1446_s1 + $0xd0] sm:$0xff]  }
   0x4   :  { %v1091_v3 = vld [vmem:[%s1446_s1 + $0x80] sm:$0xff]   ;;  %991 = vmatprep.subr.bf16.mxu1 %v1090_v2  ;;  %971 = vmatprep.subr.bf16.mxu0 %v1092_v4  ;;  %v1095_v7 = vld [vmem:[%s1446_s1 + $0x88] sm:$0xff]   ;;  %v1099_v11 = vld [vmem:[%s1446_s1 + $0x90] sm:$0xff]  }
   0x5   :  { %992 = vmatpush3.bf16.msra.mxu1 %v1091_v3  ;;  %v1100_v12 = vld [vmem:[%s1446_s1 + $0x58] sm:$0xff]   ;;  %v1104_v16 = vld [vmem:[%s1446_s1 + $0x60] sm:$0xff]   ;;  %v1108_v20 = vld [vmem:[%s1446_s1 + $0x68] sm:$0xff]  }
   0x6   :  { %993 = vmatprep.subr.bf16.mxu1 %v1094_v6  ;;  %v1101_v13 = vld [vmem:[%s1446_s1 + $0x18] sm:$0xff]   ;;  %v1105_v17 = vld [vmem:[%s1446_s1 + $0x20] sm:$0xff]   ;;  %v1109_v21 = vld [vmem:[%s1446_s1 + $0x28] sm:$0xff]  }
   0x7   :  { %972 = vmatpush3.bf16.msra.mxu0 %v1093_v5  ;;  %v1102_v14 = vld [vmem:[%s1446_s1 + $0xd8] sm:$0xff]   ;;  %v1106_v18 = vld [vmem:[%s1446_s1 + $0xe0] sm:$0xff]   ;;  %v1110_v22 = vld [vmem:[%s1446_s1 + $0xe8] sm:$0xff]  }
   0x8   :  { %973 = vmatprep.subr.bf16.mxu0 %v1096_v8  ;;  %v1103_v15 = vld [vmem:[%s1446_s1 + $0x98] sm:$0xff]   ;;  %v1107_v19 = vld [vmem:[%s1446_s1 + $0xa0] sm:$0xff]   ;;  %v1111_v23 = vld [vmem:[%s1446_s1 + $0xa8] sm:$0xff]  }
   0x9   :  { %994 = vmatpush3.bf16.msra.mxu1 %v1095_v7  ;;  %v1112_v24 = vld [vmem:[%s1446_s1 + $0x70] sm:$0xff]   ;;  %v1116_v28 = vld [vmem:[%s1446_s1 + $0x78] sm:$0xff]   ;;  %v21_v31 = vld [vmem:[%s1447_s0] sm:$0xff] }
   0xa   :  { %995 = vmatprep.subr.bf16.mxu1 %v1098_v10  ;;  %v1113_v25 = vld [vmem:[%s1446_s1 + $0x30] sm:$0xff]   ;;  %v1117_v29 = vld [vmem:[%s1446_s1 + $0x38] sm:$0xff]   ;;  %v888_v32 = vcombine.low %v21_v31, %v21_v31  ;;  %v889_v33 = vcombine.high %v21_v31, %v21_v31  ;;  %v1122_v35 = vld [vmem:[%s1446_s1 + $0x140] sm:$0xff]  }
   0xb   :  { %974 = vmatpush3.bf16.msra.mxu0 %v1097_v9  ;;  %v1114_v26 = vld [vmem:[%s1446_s1 + $0xf0] sm:$0xff]   ;;  %v1118_v30 = vld [vmem:[%s1446_s1 + $0xf8] sm:$0xff]   ;;  %v22_v36 = vld [vmem:[%s1447_s0 + $0x8] sm:$0xff]  ;;  %v1171_v9 = vmov 0.0  }
   0xc   :  { %975 = vmatprep.subr.bf16.mxu0 %v1100_v12  ;;  %v1115_v27 = vld [vmem:[%s1446_s1 + $0xb0] sm:$0xff]   ;;  %v1121_v34 = vld [vmem:[%s1446_s1 + $0xb8] sm:$0xff]   ;;  %673 = vmatprep.mubr.bf16.mxu0 %v889_v33  ;;  %v890_v37 = vcombine.low %v22_v36, %v22_v36  ;;  %v891_v38 = vcombine.high %v22_v36, %v22_v36  ;;  %v1125_v39 = vld [vmem:[%s1446_s1 + $0x100] sm:$0xff]  }
   0xd   :  { %996 = vmatpush3.bf16.msra.mxu1 %v1099_v11  ;;  %v1126_v40 = vld [vmem:[%s1446_s1 + $0x1c0] sm:$0xff]   ;;  %v1128_v42 = vld [vmem:[%s1446_s1 + $0x148] sm:$0xff]   ;;  %v1132_v46 = vld [vmem:[%s1446_s1 + $0x150] sm:$0xff]  }
   0xe   :  { %997 = vmatprep.subr.bf16.mxu1 %v1102_v14  ;;  %713 = vmatprep.mubr.bf16.mxu1 %v891_v38  ;;  %v1127_v41 = vld [vmem:[%s1446_s1 + $0x180] sm:$0xff]   ;;  %v1129_v43 = vld [vmem:[%s1446_s1 + $0x108] sm:$0xff]   ;;  %v1133_v47 = vld [vmem:[%s1446_s1 + $0x110] sm:$0xff]  }
   0xf   :  { %976 = vmatpush3.bf16.msra.mxu0 %v1101_v13  ;;  %v1130_v44 = vld [vmem:[%s1446_s1 + $0x1c8] sm:$0xff]   ;;  %v1134_v48 = vld [vmem:[%s1446_s1 + $0x1d0] sm:$0xff]   ;;  %v1136_v50 = vld [vmem:[%s1446_s1 + $0x158] sm:$0xff]  }
  0x10   :  { %977 = vmatprep.subr.bf16.mxu0 %v1104_v16  ;;  %v1131_v45 = vld [vmem:[%s1446_s1 + $0x188] sm:$0xff]   ;;  %v1135_v49 = vld [vmem:[%s1446_s1 + $0x190] sm:$0xff]   ;;  %v1137_v51 = vld [vmem:[%s1446_s1 + $0x118] sm:$0xff]  }
  0x11   :  { %998 = vmatpush3.bf16.msra.mxu1 %v1103_v15  ;;  %v1138_v52 = vld [vmem:[%s1446_s1 + $0x1d8] sm:$0xff]   ;;  %v1140_v54 = vld [vmem:[%s1446_s1 + $0x160] sm:$0xff]   ;;  %v1144_v58 = vld [vmem:[%s1446_s1 + $0x168] sm:$0xff]  }
  0x12   :  { %999 = vmatprep.subr.bf16.mxu1 %v1106_v18  ;;  %v1139_v53 = vld [vmem:[%s1446_s1 + $0x198] sm:$0xff]   ;;  %v1141_v55 = vld [vmem:[%s1446_s1 + $0x120] sm:$0xff]   ;;  %v1145_v59 = vld [vmem:[%s1446_s1 + $0x128] sm:$0xff]  }
  0x13   :  { %978 = vmatpush3.bf16.msra.mxu0 %v1105_v17  ;;  %v1142_v56 = vld [vmem:[%s1446_s1 + $0x1e0] sm:$0xff]   ;;  %v1146_v60 = vld [vmem:[%s1446_s1 + $0x1e8] sm:$0xff]   ;;  %v1148_v62 = vld [vmem:[%s1446_s1 + $0x170] sm:$0xff]  }
  0x14   :  { %979 = vmatprep.subr.bf16.mxu0 %v1108_v20  ;;  %v1143_v57 = vld [vmem:[%s1446_s1 + $0x1a0] sm:$0xff]   ;;  %v1147_v61 = vld [vmem:[%s1446_s1 + $0x1a8] sm:$0xff]   ;;  %v1149_v63 = vld [vmem:[%s1446_s1 + $0x130] sm:$0xff]  }
  0x15   :  { %1000 = vmatpush3.bf16.msra.mxu1 %v1107_v19  ;;  %v1150_v0 = vld [vmem:[%s1446_s1 + $0x1f0] sm:$0xff]   ;;  %v1152_v2 = vld [vmem:[%s1446_s1 + $0x178] sm:$0xff]   ;;  %v1160_v13 = vld [vmem:[%s1446_s1 + $0x200] sm:$0xff]  }
  0x16   :  { %1001 = vmatprep.subr.bf16.mxu1 %v1110_v22  ;;  %v1151_v1 = vld [vmem:[%s1446_s1 + $0x1b0] sm:$0xff]   ;;  %v1153_v3 = vld [vmem:[%s1446_s1 + $0x138] sm:$0xff]   ;;  %v1161_v14 = vld [vmem:[%s1446_s1 + $0x208] sm:$0xff]  }
  0x17   :  { %980 = vmatpush3.bf16.msra.mxu0 %v1109_v21  ;;  %v1154_v4 = vld [vmem:[%s1446_s1 + $0x1f8] sm:$0xff]   ;;  %v23_v5 = vld [vmem:[%s1447_s0 + $0x10] sm:$0xff]  ;;  %v1164_v17 = vld [vmem:[%s1446_s1 + $0x220] sm:$0xff]  }
  0x18   :  { %981 = vmatprep.subr.bf16.mxu0 %v1112_v24  ;;  %v892_v6 = vcombine.low %v23_v5, %v23_v5  ;;  %v893_v7 = vcombine.high %v23_v5, %v23_v5  ;;  %v1157_v8 = vld [vmem:[%s1446_s1 + $0x1b8] sm:$0xff]   ;;  %v1162_v15 = vld [vmem:[%s1446_s1 + $0x210] sm:$0xff]   ;;  %v1165_v18 = vld [vmem:[%s1446_s1 + $0x228] sm:$0xff]   ;;  %v866_v5 = vlaneseq }
  0x19   :  { %1002 = vmatpush3.bf16.msra.mxu1 %v1111_v23  ;;  %v24_v10 = vld [vmem:[%s1447_s0 + $0x18] sm:$0xff]  ;;  %v1166_v19 = vld [vmem:[%s1446_s1 + $0x230] sm:$0xff]   ;;  %v1168_v21 = vld [vmem:[%s1447_s0 + $0x20] ss:$0 sps:$4 sm:$0xff]  }
  0x1a   :  { %1003 = vmatprep.subr.bf16.mxu1 %v1114_v26  ;;  %v894_v11 = vcombine.low %v24_v10, %v24_v10  ;;  %v895_v12 = vcombine.high %v24_v10, %v24_v10  ;;  %v1163_v16 = vld [vmem:[%s1446_s1 + $0x218] sm:$0xff]   ;;  %v887_v23 = vld [vmem:[%s1448_s2] ss:$0 sm:$0xff] }
  0x1b   :  { %982 = vmatpush3.bf16.msra.mxu0 %v1113_v25  ;;  %v1167_v20 = vld [vmem:[%s1446_s1 + $0x238] sm:$0xff]  }
  0x1c   :  { %983 = vmatprep.subr.bf16.mxu0 %v1116_v28 }
  0x1d   :  { %1004 = vmatpush3.bf16.msra.mxu1 %v1115_v27 }
  0x1e   :  { %1005 = vmatprep.subr.bf16.mxu1 %v1118_v30 }
  0x1f   :  { %984 = vmatpush3.bf16.msra.mxu0 %v1117_v29 }
  0x20   :  { %1013 = vmatprep.subr.bf16.mxu0 %v1122_v35 }
  0x21   :  { %1006 = vmatpush3.bf16.msra.mxu1 %v1121_v34 }
  0x22   :  { %674 = vmatmul.mubr.bf16.vlgmr.msra.gmra.mrb[0].mxu0 %v888_v32  ;;  %1035 = vmatprep.subr.bf16.mxu1 %v1126_v40 }
  0x23   :  { %1014 = vmatpush3.bf16.msra.mxu0 %v1125_v39  ;;  %753 = vmatprep.mubr.bf16.mxu0 %v893_v7  ;;  %v858_v7 = vld [vmem:[%s1449_s3] sm:$0x1] }
  0x24   :  { %714 = vmatmul.mubr.bf16.vlgmr.msra.gmra.mrb[0].mxu1 %v890_v37  ;;  %1015 = vmatprep.subr.bf16.mxu0 %v1128_v42 }
  0x25   :  { %1036 = vmatpush3.bf16.msra.mxu1 %v1127_v41  ;;  %793 = vmatprep.mubr.bf16.mxu1 %v895_v12 }
  0x26   :  { %1037 = vmatprep.subr.bf16.mxu1 %v1130_v44 }
  0x27   :  { %1016 = vmatpush3.bf16.msra.mxu0 %v1129_v43 }
  0x28   :  { %1017 = vmatprep.subr.bf16.mxu0 %v1132_v46 }
  0x29   :  { %1038 = vmatpush3.bf16.msra.mxu1 %v1131_v45 }
  0x2a   :  { %1039 = vmatprep.subr.bf16.mxu1 %v1134_v48 }
  0x2b   :  { %1018 = vmatpush3.bf16.msra.mxu0 %v1133_v47 }
  0x2c   :  { %1019 = vmatprep.subr.bf16.mxu0 %v1136_v50 }
  0x2d   :  { %1040 = vmatpush3.bf16.msra.mxu1 %v1135_v49 }
  0x2e   :  { %1041 = vmatprep.subr.bf16.mxu1 %v1138_v52 }
  0x2f   :  { %1020 = vmatpush3.bf16.msra.mxu0 %v1137_v51 }
  0x30   :  { %1021 = vmatprep.subr.bf16.mxu0 %v1140_v54 }
  0x31   :  { %1042 = vmatpush3.bf16.msra.mxu1 %v1139_v53 }
  0x32   :  { %1043 = vmatprep.subr.bf16.mxu1 %v1142_v56 }
  0x33   :  { %1022 = vmatpush3.bf16.msra.mxu0 %v1141_v55 }
  0x34   :  { %1023 = vmatprep.subr.bf16.mxu0 %v1144_v58 }
  0x35   :  { %1044 = vmatpush3.bf16.msra.mxu1 %v1143_v57 }
  0x36   :  { %1045 = vmatprep.subr.bf16.mxu1 %v1146_v60 }
  0x37   :  { %1024 = vmatpush3.bf16.msra.mxu0 %v1145_v59 }
  0x38   :  { %1025 = vmatprep.subr.bf16.mxu0 %v1148_v62 }
  0x39   :  { %1046 = vmatpush3.bf16.msra.mxu1 %v1147_v61 }
  0x3a   :  { %1047 = vmatprep.subr.bf16.mxu1 %v1150_v0 }
  0x3b   :  { %1026 = vmatpush3.bf16.msra.mxu0 %v1149_v63 }
  0x3c   :  { %1027 = vmatprep.subr.bf16.mxu0 %v1152_v2 }
  0x3d   :  { %1048 = vmatpush3.bf16.msra.mxu1 %v1151_v1 }
  0x3e   :  { %1049 = vmatprep.subr.bf16.mxu1 %v1154_v4 }
  0x3f   :  { %1028 = vmatpush3.bf16.msra.mxu0 %v1153_v3 }
  0x40   :  { %1066 = vmatprep.subr.bf16.mxu0 %v1171_v9 }
  0x41   :  { %1050 = vmatpush3.bf16.msra.mxu1 %v1157_v8 }
  0x42   :  { %754 = vmatmul.mubr.bf16.vlgmr.msra.gmra.mrb[4].mxu0 %v892_v6  ;;  %v867_v6 = vshrl.u32 %v866_v5, 7 }
  0x43   :  { %1067 = vmatpush3.bf16.msra.mxu0 %v1160_v13  ;;  %1082 = vmatprep.mubr.msk.bf16.mxu0 %vm1172_vm0, %v1171_v9 }
  0x44   :  { %794 = vmatmul.mubr.bf16.vlgmr.msra.gmra.mrb[4].mxu1 %v894_v11  ;;  %1068 = vmatprep.subr.bf16.mxu0 %v1171_v9  ;;  %v868_v8 = vsub.s32 0, %v867_v6  ;;  %v862_v11 = vld [vmem:[%s1450_s4] sm:$0x1] }
  0x47   :  { %1069 = vmatpush3.bf16.msra.mxu0 %v1161_v14 }
  0x48   :  { %1070 = vmatprep.subr.bf16.mxu0 %v1171_v9 }
  0x4b   :  { %1071 = vmatpush3.bf16.msra.mxu0 %v1162_v15 }
  0x4c   :  { %1072 = vmatprep.subr.bf16.mxu0 %v1171_v9 }
  0x4f   :  { %1073 = vmatpush3.bf16.msra.mxu0 %v1163_v16 }
  0x50   :  { %1074 = vmatprep.subr.bf16.mxu0 %v1171_v9 }
  0x53   :  { %1075 = vmatpush3.bf16.msra.mxu0 %v1164_v17 }
  0x54   :  { %1076 = vmatprep.subr.bf16.mxu0 %v1171_v9 }
  0x57   :  { %1077 = vmatpush3.bf16.msra.mxu0 %v1165_v18 }
  0x58   :  { %1078 = vmatprep.subr.bf16.mxu0 %v1171_v9 }
  0x5b   :  { %1079 = vmatpush3.bf16.msra.mxu0 %v1166_v19 }
  0x5c   :  { %1080 = vmatprep.subr.bf16.mxu0 %v1171_v9 }
  0x5f   :  { %1081 = vmatpush3.bf16.msra.mxu0 %v1167_v20 }
  0x62   :  { %1083 = vmatmul.mubr.bf16.vlgmr.msra.gmra.mrb[8].mxu0 %v1168_v21 }
  0xf5   :  { %v985_v22 = vpop.f32.mrb[0].mxu0 }
  0xf6   :  { %v986_v24 = vpop.f32.mrb[1].mxu0 }
  0xf7   :  { %v987_v25 = vadd.f32 %v986_v24, %v985_v22  ;;  %v988_v26 = vpop.f32.mrb[2].mxu0  ;;  %v1007_v27 = vpop.f32.mrb[0].mxu1 }
  0xf8   :  { %v989_v28 = vpop.f32.mrb[3].mxu0  ;;  %v1008_v29 = vpop.f32.mrb[1].mxu1 }
  0xf9   :  { %v676_v30 = vadd.f32 %v987_v25, %v887_v23  ;;  %v1009_v31 = vadd.f32 %v1008_v29, %v1007_v27  ;;  %v1010_v32 = vpop.f32.mrb[2].mxu1 }
  0xfa   :  { %v1011_v33 = vpop.f32.mrb[3].mxu1 }
  0xfb   :  { %v716_v34 = vadd.f32 %v1009_v31, %v676_v30 }
 0x115   :  { %v1029_v35 = vpop.f32.mrb[4].mxu0 }
 0x116   :  { %v1030_v36 = vpop.f32.mrb[5].mxu0 }
 0x117   :  { %v1031_v37 = vadd.f32 %v1030_v36, %v1029_v35  ;;  %v1032_v38 = vpop.f32.mrb[6].mxu0  ;;  %v1051_v39 = vpop.f32.mrb[4].mxu1 }
 0x118   :  { %v1033_v40 = vpop.f32.mrb[7].mxu0  ;;  %v1052_v41 = vpop.f32.mrb[5].mxu1 }
 0x119   :  { %v756_v42 = vadd.f32 %v1031_v37, %v716_v34  ;;  %v1053_v43 = vadd.f32 %v1052_v41, %v1051_v39  ;;  %v1054_v44 = vpop.f32.mrb[6].mxu1 }
 0x11a   :  { %v1055_v45 = vpop.f32.mrb[7].mxu1 }
 0x11b   :  { %v796_v46 = vadd.f32 %v1053_v43, %v756_v42 }
 0x135   :  { %v835_v47 = vpop.f32.mrb[8].mxu0 }
 0x136   :  { %v836_v48 = vadd.f32 %v835_v47, %v796_v46  ;;  %v1084_v49 = vpop.f32.mrb[9].mxu0 }
 0x137   :  { %v838_v50 = vpop.f32.mrb[10].mxu0 }
 0x138   :  { %v841_v51 = vrot.slane %v836_v48, 4  ;;  %v1085_v52 = vpop.f32.mrb[11].mxu0 }
 0x13a   :  { %v842_v53 = vadd.f32 %v841_v51, %v836_v48 }
 0x13c   :  { %v843_v54 = vrot.slane %v842_v53, 2 }
 0x13e   :  { %v844_v55 = vadd.f32 %v843_v54, %v842_v53 }
 0x140   :  { %v845_v56 = vrot.slane %v844_v55, 1 }
 0x142   :  { %v846_v57 = vadd.f32 %v845_v56, %v844_v55 }
 0x144   :  { %v848_v58 = vmul.f32 0.125, %v846_v57 }
 0x146   :  { %v849_v59 = vsub.f32 %v836_v48, %v848_v58 }
 0x148   :  { %v850_v60 = vmul.f32 %v849_v59, %v849_v59 }
 0x14a   :  { %v851_v61 = vrot.slane %v850_v60, 4 }
 0x14c   :  { %v852_v62 = vadd.f32 %v851_v61, %v850_v60 }
 0x14e   :  { %v853_v63 = vrot.slane %v852_v62, 2 }
 0x150   :  { %v854_v0 = vadd.f32 %v853_v63, %v852_v62 }
 0x152   :  { %v855_v1 = vrot.slane %v854_v0, 1 }
 0x154   :  { %v856_v2 = vadd.f32 %v855_v1, %v854_v0 }
 0x156   :  { %v857_v3 = vmul.f32 0.125, %v856_v2 }
 0x158   :  { %v859_v4 = vadd.f32 1e-05, %v857_v3 }
 0x15a   :  { %1169 = vrsqrt.f32 %v859_v4 }
 0x164   :  { %v1170_v9 = vpop.eup %1169 }
 0x165   :  { %v861_v10 = vmul.f32 %v1170_v9, %v858_v7 }
 0x167   :  { %v863_v12 = vmul.f32 %v861_v10, %v848_v58  ;;  %v869_v13 = vrot.slane %v861_v10, %v868_v8 }
 0x169   :  { %v864_v14 = vsub.f32 %v862_v11, %v863_v12  ;;  %v871_v15 = vmul.f32 %v869_v13, %v836_v48 }
 0x16b   :  { %v876_v16 = vrot.slane %v864_v14, %v868_v8 }
 0x16d   :  { %v878_v17 = vadd.f32 %v876_v16, %v871_v15 }
 0x16f   :  { %vm879_vm1 = vcmp.ge.f32.partialorder %v878_v17, 0.0  ;;  %v880_v18 = vmul.f32 0.2, %v878_v17 }
 0x171   :  { %v881_v19 = vsel %vm879_vm1, %v878_v17, %v880_v18 }
 0x172   :  { %882 = vst [vmem:[%s1451_s5] sm:$0xff] %v881_v19 }

// kernel: convnet_aae_forward.15
= control target key start
LH: loop header
LB: loop body
LE: loop exit
PB: predicated region body
PF: predicated region fallthrough
CT: control target
= control target key end

     0   :  { %14 = vsyncpa [#allocation3], 0  ;;  %s2696_s0 = inlined_call_operand.vmem [shape: bf16[8,1152], index: 0, kind: input, shape index: {}]   ;;  %s2697_s1 = inlined_call_operand.vmem [shape: bf16[1152,256], index: 1, kind: input, shape index: {}]   ;;  %s2698_s2 = inlined_call_operand.vmem [shape: f32[1,256], index: 2, kind: input, shape index: {}]   ;;  %s2699_s3 = inlined_call_operand.vmem [shape: f32[2,8], index: 3, kind: input, shape index: {}]   ;;  %s2700_s4 = inlined_call_operand.vmem [shape: f32[256,256], index: 4, kind: input, shape index: {}]   ;;  %s2701_s5 = inlined_call_operand.vmem [shape: f32[1,256], index: 5, kind: input, shape index: {}]   ;;  %s2702_s6 = inlined_call_operand.vmem [shape: f32[8,256], index: 6, kind: output, shape index: {0}]   ;;  %s2703_s7 = inlined_call_operand.hbm [shape: f32[2,256], index: 7, kind: output, shape index: {1}]   ;;  %s2704_s8 = inlined_call_operand.hbm [shape: f32[2,256], index: 8, kind: output, shape index: {2}]  }
   0x1   :  { %v1666_v0 = vld [vmem:[%s2697_s1 + $0x104] ss:$8 sps:$4 sm:$0xff]   ;;  %v1668_v1 = vld [vmem:[%s2697_s1 + $0x100] ss:$8 sps:$4 sm:$0xff]   ;;  %v1669_v2 = vld [vmem:[%s2697_s1 + $0x114] ss:$8 sps:$4 sm:$0xff]  }
   0x2   :  { %983 = vmatprep.subr.bf16.mxu0 %v1666_v0  ;;  %v1671_v3 = vld [vmem:[%s2697_s1 + $0x110] ss:$8 sps:$4 sm:$0xff]   ;;  %v1672_v4 = vld [vmem:[%s2697_s1 + $0x124] ss:$8 sps:$4 sm:$0xff]   ;;  %v1674_v5 = vld [vmem:[%s2697_s1 + $0x120] ss:$8 sps:$4 sm:$0xff]  }
   0x3   :  { %984 = vmatpush1.bf16.msra.mxu0 %v1668_v1  ;;  %v1675_v6 = vld [vmem:[%s2697_s1 + $0x134] ss:$8 sps:$4 sm:$0xff]   ;;  %v1677_v7 = vld [vmem:[%s2697_s1 + $0x130] ss:$8 sps:$4 sm:$0xff]   ;;  %v1678_v8 = vld [vmem:[%s2697_s1 + $0x144] ss:$8 sps:$4 sm:$0xff]  }
   0x4   :  { %985 = vmatprep.subr.bf16.mxu0 %v1669_v2  ;;  %v1680_v9 = vld [vmem:[%s2697_s1 + $0x140] ss:$8 sps:$4 sm:$0xff]   ;;  %v1681_v10 = vld [vmem:[%s2697_s1 + $0x154] ss:$8 sps:$4 sm:$0xff]   ;;  %v1683_v11 = vld [vmem:[%s2697_s1 + $0x150] ss:$8 sps:$4 sm:$0xff]  }
   0x5   :  { %v1684_v12 = vld [vmem:[%s2697_s1 + $0x164] ss:$8 sps:$4 sm:$0xff]   ;;  %v1686_v15 = vld [vmem:[%s2697_s1 + $0x160] ss:$8 sps:$4 sm:$0xff]   ;;  %v1687_v16 = vld [vmem:[%s2697_s1 + $0x174] ss:$8 sps:$4 sm:$0xff]  }
   0x6   :  { %v2030_v13 = vld [vmem:[%s2696_s0 + $0x8] sm:$0xff]  ;;  %v1689_v17 = vld [vmem:[%s2697_s1 + $0x170] ss:$8 sps:$4 sm:$0xff]   ;;  %v1693_v20 = vld [vmem:[%s2697_s1 + $0x194] ss:$8 sps:$4 sm:$0xff]  }
   0x7   :  { %986 = vmatpush1.bf16.msra.mxu0 %v1671_v3  ;;  %v1431_v14 = vcombine.high %v2030_v13, %v2030_v13  ;;  %v1690_v18 = vld [vmem:[%s2697_s1 + $0x184] ss:$8 sps:$4 sm:$0xff]   ;;  %v1692_v19 = vld [vmem:[%s2697_s1 + $0x180] ss:$8 sps:$4 sm:$0xff]   ;;  %v1695_v23 = vld [vmem:[%s2697_s1 + $0x190] ss:$8 sps:$4 sm:$0xff]   ;;  %v1430_v53 = vcombine.low %v2030_v13, %v2030_v13 }
   0x8   :  { %987 = vmatprep.subr.bf16.mxu0 %v1672_v4  ;;  %v1740_v21 = vld [vmem:[%s2697_s1 + $0x4] ss:$8 sps:$4 sm:$0xff]   ;;  %v1742_v22 = vld [vmem:[%s2697_s1] ss:$8 sps:$4 sm:$0xff]   ;;  %v1746_v25 = vld [vmem:[%s2697_s1 + $0x14] ss:$8 sps:$4 sm:$0xff]  }
   0x9   :  { %1015 = vmatprep.mubr.bf16.mxu0 %v1431_v14  ;;  %v1696_v24 = vld [vmem:[%s2697_s1 + $0x1a4] ss:$8 sps:$4 sm:$0xff]   ;;  %942 = vmatprep.subr.bf16.mxu1 %v1740_v21  ;;  %v1748_v26 = vld [vmem:[%s2697_s1 + $0x10] ss:$8 sps:$4 sm:$0xff]   ;;  %v1698_v27 = vld [vmem:[%s2697_s1 + $0x1a0] ss:$8 sps:$4 sm:$0xff]  }
   0xa   :  { %943 = vmatpush1.bf16.msra.mxu1 %v1742_v22  ;;  %v1752_v28 = vld [vmem:[%s2697_s1 + $0x24] ss:$8 sps:$4 sm:$0xff]   ;;  %v1699_v29 = vld [vmem:[%s2697_s1 + $0x1b4] ss:$8 sps:$4 sm:$0xff]   ;;  %v1754_v30 = vld [vmem:[%s2697_s1 + $0x20] ss:$8 sps:$4 sm:$0xff]  }
   0xb   :  { %988 = vmatpush1.bf16.msra.mxu0 %v1674_v5  ;;  %944 = vmatprep.subr.bf16.mxu1 %v1746_v25  ;;  %v1758_v31 = vld [vmem:[%s2697_s1 + $0x34] ss:$8 sps:$4 sm:$0xff]   ;;  %v1701_v32 = vld [vmem:[%s2697_s1 + $0x1b0] ss:$8 sps:$4 sm:$0xff]   ;;  %v1702_v33 = vld [vmem:[%s2697_s1 + $0x1c4] ss:$8 sps:$4 sm:$0xff]  }
   0xc   :  { %989 = vmatprep.subr.bf16.mxu0 %v1675_v6  ;;  %v1760_v34 = vld [vmem:[%s2697_s1 + $0x30] ss:$8 sps:$4 sm:$0xff]   ;;  %v1764_v35 = vld [vmem:[%s2697_s1 + $0x44] ss:$8 sps:$4 sm:$0xff]   ;;  %v1704_v36 = vld [vmem:[%s2697_s1 + $0x1c0] ss:$8 sps:$4 sm:$0xff]  }
   0xd   :  { %v1705_v37 = vld [vmem:[%s2697_s1 + $0x1d4] ss:$8 sps:$4 sm:$0xff]   ;;  %v1766_v38 = vld [vmem:[%s2697_s1 + $0x40] ss:$8 sps:$4 sm:$0xff]   ;;  %v1707_v40 = vld [vmem:[%s2697_s1 + $0x1d0] ss:$8 sps:$4 sm:$0xff]  }
   0xe   :  { %945 = vmatpush1.bf16.msra.mxu1 %v1748_v26  ;;  %v1770_v39 = vld [vmem:[%s2697_s1 + $0x54] ss:$8 sps:$4 sm:$0xff]   ;;  %v1708_v41 = vld [vmem:[%s2697_s1 + $0x1e4] ss:$8 sps:$4 sm:$0xff]   ;;  %v1772_v42 = vld [vmem:[%s2697_s1 + $0x50] ss:$8 sps:$4 sm:$0xff]  }
   0xf   :  { %990 = vmatpush1.bf16.msra.mxu0 %v1677_v7  ;;  %946 = vmatprep.subr.bf16.mxu1 %v1752_v28  ;;  %v1776_v43 = vld [vmem:[%s2697_s1 + $0x64] ss:$8 sps:$4 sm:$0xff]   ;;  %v1710_v44 = vld [vmem:[%s2697_s1 + $0x1e0] ss:$8 sps:$4 sm:$0xff]   ;;  %v1711_v45 = vld [vmem:[%s2697_s1 + $0x1f4] ss:$8 sps:$4 sm:$0xff]  }
  0x10   :  { %991 = vmatprep.subr.bf16.mxu0 %v1678_v8  ;;  %v1778_v46 = vld [vmem:[%s2697_s1 + $0x60] ss:$8 sps:$4 sm:$0xff]   ;;  %v1782_v47 = vld [vmem:[%s2697_s1 + $0x74] ss:$8 sps:$4 sm:$0xff]   ;;  %v1713_v48 = vld [vmem:[%s2697_s1 + $0x1f0] ss:$8 sps:$4 sm:$0xff]  }
  0x11   :  { %v1718_v49 = vld [vmem:[%s2697_s1 + $0x204] ss:$8 sps:$4 sm:$0xff]   ;;  %v1784_v50 = vld [vmem:[%s2697_s1 + $0x70] ss:$8 sps:$4 sm:$0xff]   ;;  %v1716_v54 = vld [vmem:[%s2697_s1 + $0x200] ss:$8 sps:$4 sm:$0xff]  }
  0x12   :  { %947 = vmatpush1.bf16.msra.mxu1 %v1754_v30  ;;  %v2145_v51 = vld [vmem:[%s2696_s0 + $0x10] sm:$0xff]  ;;  %v1788_v52 = vld [vmem:[%s2697_s1 + $0x84] ss:$8 sps:$4 sm:$0xff]   ;;  %v1790_v57 = vld [vmem:[%s2697_s1 + $0x80] ss:$8 sps:$4 sm:$0xff]  }
  0x13   :  { %992 = vmatpush1.bf16.msra.mxu0 %v1680_v9  ;;  %948 = vmatprep.subr.bf16.mxu1 %v1758_v31  ;;  %v1433_v55 = vcombine.high %v2145_v51, %v2145_v51  ;;  %v1721_v56 = vld [vmem:[%s2697_s1 + $0x214] ss:$8 sps:$4 sm:$0xff]   ;;  %v1719_v59 = vld [vmem:[%s2697_s1 + $0x210] ss:$8 sps:$4 sm:$0xff]   ;;  %v1724_v60 = vld [vmem:[%s2697_s1 + $0x224] ss:$8 sps:$4 sm:$0xff]  }
  0x14   :  { %993 = vmatprep.subr.bf16.mxu0 %v1681_v10  ;;  %v1796_v58 = vld [vmem:[%s2697_s1 + $0x94] ss:$8 sps:$4 sm:$0xff]   ;;  %v1798_v61 = vld [vmem:[%s2697_s1 + $0x90] ss:$8 sps:$4 sm:$0xff]   ;;  %v1802_v62 = vld [vmem:[%s2697_s1 + $0xa4] ss:$8 sps:$4 sm:$0xff]  }
  0x15   :  { %v1722_v63 = vld [vmem:[%s2697_s1 + $0x220] ss:$8 sps:$4 sm:$0xff]   ;;  %v1727_v0 = vld [vmem:[%s2697_s1 + $0x234] ss:$8 sps:$4 sm:$0xff]   ;;  %v1725_v3 = vld [vmem:[%s2697_s1 + $0x230] ss:$8 sps:$4 sm:$0xff]  }
  0x16   :  { %949 = vmatpush1.bf16.msra.mxu1 %v1760_v34  ;;  %v1804_v1 = vld [vmem:[%s2697_s1 + $0xa0] ss:$8 sps:$4 sm:$0xff]   ;;  %v1808_v2 = vld [vmem:[%s2697_s1 + $0xb4] ss:$8 sps:$4 sm:$0xff]   ;;  %v1730_v5 = vld [vmem:[%s2697_s1 + $0x244] ss:$8 sps:$4 sm:$0xff]  }
  0x17   :  { %994 = vmatpush1.bf16.msra.mxu0 %v1683_v11  ;;  %950 = vmatprep.subr.bf16.mxu1 %v1764_v35  ;;  %v29_v4 = vld [vmem:[%s2696_s0] sm:$0xff]  ;;  %v1810_v6 = vld [vmem:[%s2697_s1 + $0xb0] ss:$8 sps:$4 sm:$0xff]   ;;  %v1733_v10 = vld [vmem:[%s2697_s1 + $0x254] ss:$8 sps:$4 sm:$0xff]  }
  0x18   :  { %995 = vmatprep.subr.bf16.mxu0 %v1684_v12  ;;  %v1429_v7 = vcombine.high %v29_v4, %v29_v4  ;;  %v1814_v8 = vld [vmem:[%s2697_s1 + $0xc4] ss:$8 sps:$4 sm:$0xff]   ;;  %v1728_v9 = vld [vmem:[%s2697_s1 + $0x240] ss:$8 sps:$4 sm:$0xff]   ;;  %v1820_v12 = vld [vmem:[%s2697_s1 + $0xd4] ss:$8 sps:$4 sm:$0xff]   ;;  %v1428_v26 = vcombine.low %v29_v4, %v29_v4 }
  0x19   :  { %v1816_v11 = vld [vmem:[%s2697_s1 + $0xc0] ss:$8 sps:$4 sm:$0xff]   ;;  %v1731_v13 = vld [vmem:[%s2697_s1 + $0x250] ss:$8 sps:$4 sm:$0xff]   ;;  %v1736_v14 = vld [vmem:[%s2697_s1 + $0x264] ss:$8 sps:$4 sm:$0xff]  }
  0x1a   :  { %951 = vmatpush1.bf16.msra.mxu1 %v1766_v38  ;;  %974 = vmatprep.mubr.bf16.mxu1 %v1429_v7  ;;  %v1737_v21 = vld [vmem:[%s2697_s1 + $0x270] ss:$8 sps:$4 sm:$0xff]   ;;  %v1745_v22 = vld [vmem:[%s2697_s1 + $0x284] ss:$8 sps:$4 sm:$0xff]   ;;  %v1743_v25 = vld [vmem:[%s2697_s1 + $0x280] ss:$8 sps:$4 sm:$0xff]  }
  0x1b   :  { %996 = vmatpush1.bf16.msra.mxu0 %v1686_v15  ;;  %952 = vmatprep.subr.bf16.mxu1 %v1770_v39  ;;  %v1822_v15 = vld [vmem:[%s2697_s1 + $0xd0] ss:$8 sps:$4 sm:$0xff]   ;;  %v1840_v28 = vld [vmem:[%s2697_s1 + $0x400] ss:$8 sps:$4 sm:$0xff]  }
  0x1c   :  { %997 = vmatprep.subr.bf16.mxu0 %v1687_v16  ;;  %v1826_v16 = vld [vmem:[%s2697_s1 + $0xe4] ss:$8 sps:$4 sm:$0xff]  }
  0x1e   :  { %953 = vmatpush1.bf16.msra.mxu1 %v1772_v42 }
  0x1f   :  { %998 = vmatpush1.bf16.msra.mxu0 %v1689_v17  ;;  %954 = vmatprep.subr.bf16.mxu1 %v1776_v43  ;;  %v1734_v17 = vld [vmem:[%s2697_s1 + $0x260] ss:$8 sps:$4 sm:$0xff]  }
  0x20   :  { %999 = vmatprep.subr.bf16.mxu0 %v1690_v18  ;;  %v1739_v18 = vld [vmem:[%s2697_s1 + $0x274] ss:$8 sps:$4 sm:$0xff]  }
  0x22   :  { %955 = vmatpush1.bf16.msra.mxu1 %v1778_v46 }
  0x23   :  { %1000 = vmatpush1.bf16.msra.mxu0 %v1692_v19  ;;  %956 = vmatprep.subr.bf16.mxu1 %v1782_v47  ;;  %v1828_v19 = vld [vmem:[%s2697_s1 + $0xe0] ss:$8 sps:$4 sm:$0xff]  }
  0x24   :  { %1001 = vmatprep.subr.bf16.mxu0 %v1693_v20  ;;  %v1832_v20 = vld [vmem:[%s2697_s1 + $0xf4] ss:$8 sps:$4 sm:$0xff]  }
  0x26   :  { %957 = vmatpush1.bf16.msra.mxu1 %v1784_v50 }
  0x27   :  { %1002 = vmatpush1.bf16.msra.mxu0 %v1695_v23  ;;  %958 = vmatprep.subr.bf16.mxu1 %v1788_v52  ;;  %v1834_v23 = vld [vmem:[%s2697_s1 + $0xf0] ss:$8 sps:$4 sm:$0xff]  }
  0x28   :  { %1003 = vmatprep.subr.bf16.mxu0 %v1696_v24  ;;  %v1842_v24 = vld [vmem:[%s2697_s1 + $0x404] ss:$8 sps:$4 sm:$0xff]  }
  0x2a   :  { %959 = vmatpush1.bf16.msra.mxu1 %v1790_v57 }
  0x2b   :  { %1004 = vmatpush1.bf16.msra.mxu0 %v1698_v27  ;;  %960 = vmatprep.subr.bf16.mxu1 %v1796_v58  ;;  %v1751_v27 = vld [vmem:[%s2697_s1 + $0x294] ss:$8 sps:$4 sm:$0xff]  }
  0x2c   :  { %1005 = vmatprep.subr.bf16.mxu0 %v1699_v29  ;;  %v1848_v29 = vld [vmem:[%s2697_s1 + $0x414] ss:$8 sps:$4 sm:$0xff]  }
  0x2e   :  { %961 = vmatpush1.bf16.msra.mxu1 %v1798_v61 }
  0x2f   :  { %1006 = vmatpush1.bf16.msra.mxu0 %v1701_v32  ;;  %962 = vmatprep.subr.bf16.mxu1 %v1802_v62 }
  0x30   :  { %1007 = vmatprep.subr.bf16.mxu0 %v1702_v33 }
  0x32   :  { %963 = vmatpush1.bf16.msra.mxu1 %v1804_v1 }
  0x33   :  { %1008 = vmatpush1.bf16.msra.mxu0 %v1704_v36  ;;  %964 = vmatprep.subr.bf16.mxu1 %v1808_v2 }
  0x34   :  { %1009 = vmatprep.subr.bf16.mxu0 %v1705_v37 }
  0x36   :  { %965 = vmatpush1.bf16.msra.mxu1 %v1810_v6 }
  0x37   :  { %1010 = vmatpush1.bf16.msra.mxu0 %v1707_v40  ;;  %966 = vmatprep.subr.bf16.mxu1 %v1814_v8 }
  0x38   :  { %1011 = vmatprep.subr.bf16.mxu0 %v1708_v41 }
  0x3a   :  { %967 = vmatpush1.bf16.msra.mxu1 %v1816_v11 }
  0x3b   :  { %1012 = vmatpush1.bf16.msra.mxu0 %v1710_v44  ;;  %968 = vmatprep.subr.bf16.mxu1 %v1820_v12 }
  0x3c   :  { %1013 = vmatprep.subr.bf16.mxu0 %v1711_v45 }
  0x3e   :  { %969 = vmatpush1.bf16.msra.mxu1 %v1822_v15 }
  0x3f   :  { %1014 = vmatpush1.bf16.msra.mxu0 %v1713_v48  ;;  %970 = vmatprep.subr.bf16.mxu1 %v1826_v16 }
  0x40   :  { %1024 = vmatprep.subr.bf16.mxu0 %v1718_v49 }
  0x42   :  { %1016 = vmatmul.mubr.bf16.vlgmr.msra.gmra.mrb[0].mxu0 %v1430_v53  ;;  %971 = vmatpush1.bf16.msra.mxu1 %v1828_v19 }
  0x43   :  { %1025 = vmatpush1.bf16.msra.mxu0 %v1716_v54  ;;  %1056 = vmatprep.mubr.bf16.mxu0 %v1433_v55 }
  0x44   :  { %1026 = vmatprep.subr.bf16.mxu0 %v1721_v56  ;;  %972 = vmatprep.subr.bf16.mxu1 %v1832_v20 }
  0x46   :  { %973 = vmatpush1.bf16.msra.mxu1 %v1834_v23 }
  0x47   :  { %1027 = vmatpush1.bf16.msra.mxu0 %v1719_v59  ;;  %1106 = vmatprep.subr.bf16.mxu1 %v1842_v24 }
  0x48   :  { %1028 = vmatprep.subr.bf16.mxu0 %v1724_v60 }
  0x4b   :  { %1029 = vmatpush1.bf16.msra.mxu0 %v1722_v63 }
  0x4c   :  { %1030 = vmatprep.subr.bf16.mxu0 %v1727_v0 }
  0x4f   :  { %1031 = vmatpush1.bf16.msra.mxu0 %v1725_v3 }
  0x50   :  { %1032 = vmatprep.subr.bf16.mxu0 %v1730_v5 }
  0x53   :  { %1033 = vmatpush1.bf16.msra.mxu0 %v1728_v9 }
  0x54   :  { %1034 = vmatprep.subr.bf16.mxu0 %v1733_v10 }
  0x57   :  { %1035 = vmatpush1.bf16.msra.mxu0 %v1731_v13 }
  0x58   :  { %1036 = vmatprep.subr.bf16.mxu0 %v1736_v14 }
  0x5b   :  { %1037 = vmatpush1.bf16.msra.mxu0 %v1734_v17 }
  0x5c   :  { %1038 = vmatprep.subr.bf16.mxu0 %v1739_v18 }
  0x5f   :  { %1039 = vmatpush1.bf16.msra.mxu0 %v1737_v21 }
  0x60   :  { %1040 = vmatprep.subr.bf16.mxu0 %v1745_v22 }
  0x61   :  { %15 = vsyncpa [#allocation5], 0  ;;  %v1749_v30 = vld [vmem:[%s2697_s1 + $0x290] ss:$8 sps:$4 sm:$0xff]   ;;  %975 = vmatmul.mubr.bf16.vlgmr.msra.gmra.mrb[0].mxu1 %v1428_v26  ;;  %v1757_v31 = vld [vmem:[%s2697_s1 + $0x2a4] ss:$8 sps:$4 sm:$0xff]   ;;  %v1432_v60 = vcombine.low %v2145_v51, %v2145_v51 }
  0x62   :  { %1107 = vmatpush1.bf16.msra.mxu1 %v1840_v28  ;;  %v1846_v32 = vld [vmem:[%s2697_s1 + $0x410] ss:$8 sps:$4 sm:$0xff]   ;;  %v1854_v33 = vld [vmem:[%s2697_s1 + $0x424] ss:$8 sps:$4 sm:$0xff]   ;;  %v1939_v34 = vmov 0   ;;  %vm1150_vm0 = vcmask 64512  }
  0x63   :  { %1041 = vmatpush1.bf16.msra.mxu0 %v1743_v25  ;;  %1108 = vmatprep.subr.bf16.mxu1 %v1848_v29  ;;  %v1755_v35 = vld [vmem:[%s2697_s1 + $0x2a0] ss:$8 sps:$4 sm:$0xff]   ;;  %v1763_v36 = vld [vmem:[%s2697_s1 + $0x2b4] ss:$8 sps:$4 sm:$0xff]   ;;  %v1761_v39 = vld [vmem:[%s2697_s1 + $0x2b0] ss:$8 sps:$4 sm:$0xff]  }
  0x64   :  { %1042 = vmatprep.subr.bf16.mxu0 %v1751_v27  ;;  %1138 = vmatprep.mubr.bf16.mxu1 %v1939_v34  ;;  %v1852_v37 = vld [vmem:[%s2697_s1 + $0x420] ss:$8 sps:$4 sm:$0xff]   ;;  %v1860_v38 = vld [vmem:[%s2697_s1 + $0x434] ss:$8 sps:$4 sm:$0xff]   ;;  %v1769_v40 = vld [vmem:[%s2697_s1 + $0x2c4] ss:$8 sps:$4 sm:$0xff]  }
  0x65   :  { %v1858_v41 = vld [vmem:[%s2697_s1 + $0x430] ss:$8 sps:$4 sm:$0xff]   ;;  %v1866_v42 = vld [vmem:[%s2697_s1 + $0x444] ss:$8 sps:$4 sm:$0xff]   ;;  %v1767_v43 = vld [vmem:[%s2697_s1 + $0x2c0] ss:$8 sps:$4 sm:$0xff]  }
  0x66   :  { %1109 = vmatpush1.bf16.msra.mxu1 %v1846_v32  ;;  %v1775_v44 = vld [vmem:[%s2697_s1 + $0x2d4] ss:$8 sps:$4 sm:$0xff]   ;;  %v1864_v45 = vld [vmem:[%s2697_s1 + $0x440] ss:$8 sps:$4 sm:$0xff]   ;;  %v1773_v47 = vld [vmem:[%s2697_s1 + $0x2d0] ss:$8 sps:$4 sm:$0xff]  }
  0x67   :  { %1043 = vmatpush1.bf16.msra.mxu0 %v1749_v30  ;;  %1110 = vmatprep.subr.bf16.mxu1 %v1854_v33  ;;  %v1872_v46 = vld [vmem:[%s2697_s1 + $0x454] ss:$8 sps:$4 sm:$0xff]   ;;  %v1781_v48 = vld [vmem:[%s2697_s1 + $0x2e4] ss:$8 sps:$4 sm:$0xff]   ;;  %v1870_v49 = vld [vmem:[%s2697_s1 + $0x450] ss:$8 sps:$4 sm:$0xff]  }
  0x68   :  { %1044 = vmatprep.subr.bf16.mxu0 %v1757_v31  ;;  %v1878_v50 = vld [vmem:[%s2697_s1 + $0x464] ss:$8 sps:$4 sm:$0xff]   ;;  %v1779_v52 = vld [vmem:[%s2697_s1 + $0x2e0] ss:$8 sps:$4 sm:$0xff]   ;;  %v1787_v53 = vld [vmem:[%s2697_s1 + $0x2f4] ss:$8 sps:$4 sm:$0xff]  }
  0x69   :  { %v1876_v54 = vld [vmem:[%s2697_s1 + $0x460] ss:$8 sps:$4 sm:$0xff]   ;;  %v1884_v55 = vld [vmem:[%s2697_s1 + $0x474] ss:$8 sps:$4 sm:$0xff]   ;;  %v1785_v56 = vld [vmem:[%s2697_s1 + $0x2f0] ss:$8 sps:$4 sm:$0xff]  }
  0x6a   :  { %1111 = vmatpush1.bf16.msra.mxu1 %v1852_v37  ;;  %v1795_v57 = vld [vmem:[%s2697_s1 + $0x304] ss:$8 sps:$4 sm:$0xff]   ;;  %v1882_v58 = vld [vmem:[%s2697_s1 + $0x470] ss:$8 sps:$4 sm:$0xff]   ;;  %v1793_v61 = vld [vmem:[%s2697_s1 + $0x300] ss:$8 sps:$4 sm:$0xff]  }
  0x6b   :  { %1045 = vmatpush1.bf16.msra.mxu0 %v1755_v35  ;;  %1112 = vmatprep.subr.bf16.mxu1 %v1860_v38  ;;  %v2349_v59 = vld [vmem:[%s2696_s0 + $0x18] sm:$0xff]  ;;  %v1890_v0 = vld [vmem:[%s2696_s0 + $0x20] ss:$0 sps:$4 sm:$0xff]   ;;  %v1807_v1 = vld [vmem:[%s2697_s1 + $0x324] ss:$8 sps:$4 sm:$0xff]   ;;  %v1940_v30 = vmov 0.0  }
  0x6c   :  { %1046 = vmatprep.subr.bf16.mxu0 %v1763_v36  ;;  %v1435_v62 = vcombine.high %v2349_v59, %v2349_v59  ;;  %v1801_v63 = vld [vmem:[%s2697_s1 + $0x314] ss:$8 sps:$4 sm:$0xff]   ;;  %v1799_v51 = vld [vmem:[%s2697_s1 + $0x310] ss:$8 sps:$4 sm:$0xff]   ;;  %v1805_v2 = vld [vmem:[%s2697_s1 + $0x320] ss:$8 sps:$4 sm:$0xff]   ;;  %v1434_v29 = vcombine.low %v2349_v59, %v2349_v59 }
  0x6d   :  { %v1813_v3 = vld [vmem:[%s2697_s1 + $0x334] ss:$8 sps:$4 sm:$0xff]   ;;  %v1811_v4 = vld [vmem:[%s2697_s1 + $0x330] ss:$8 sps:$4 sm:$0xff]   ;;  %v1819_v5 = vld [vmem:[%s2697_s1 + $0x344] ss:$8 sps:$4 sm:$0xff]  }
  0x6e   :  { %1113 = vmatpush1.bf16.msra.mxu1 %v1858_v41  ;;  %v1817_v6 = vld [vmem:[%s2697_s1 + $0x340] ss:$8 sps:$4 sm:$0xff]   ;;  %v1825_v7 = vld [vmem:[%s2697_s1 + $0x354] ss:$8 sps:$4 sm:$0xff]   ;;  %v1823_v8 = vld [vmem:[%s2697_s1 + $0x350] ss:$8 sps:$4 sm:$0xff]  }
  0x6f   :  { %1047 = vmatpush1.bf16.msra.mxu0 %v1761_v39  ;;  %1114 = vmatprep.subr.bf16.mxu1 %v1866_v42  ;;  %v1831_v9 = vld [vmem:[%s2697_s1 + $0x364] ss:$8 sps:$4 sm:$0xff]   ;;  %v1829_v10 = vld [vmem:[%s2697_s1 + $0x360] ss:$8 sps:$4 sm:$0xff]   ;;  %v1837_v11 = vld [vmem:[%s2697_s1 + $0x374] ss:$8 sps:$4 sm:$0xff]   ;;  %v180_v39 = vlaneseq }
  0x70   :  { %1048 = vmatprep.subr.bf16.mxu0 %v1769_v40  ;;  %v1835_v12 = vld [vmem:[%s2697_s1 + $0x370] ss:$8 sps:$4 sm:$0xff]   ;;  %v1845_v13 = vld [vmem:[%s2697_s1 + $0x384] ss:$8 sps:$4 sm:$0xff]   ;;  %v1843_v14 = vld [vmem:[%s2697_s1 + $0x380] ss:$8 sps:$4 sm:$0xff]  }
  0x71   :  { %v1851_v15 = vld [vmem:[%s2697_s1 + $0x394] ss:$8 sps:$4 sm:$0xff]   ;;  %v1849_v16 = vld [vmem:[%s2697_s1 + $0x390] ss:$8 sps:$4 sm:$0xff]   ;;  %v1857_v17 = vld [vmem:[%s2697_s1 + $0x3a4] ss:$8 sps:$4 sm:$0xff]  }
  0x72   :  { %1115 = vmatpush1.bf16.msra.mxu1 %v1864_v45  ;;  %v1855_v18 = vld [vmem:[%s2697_s1 + $0x3a0] ss:$8 sps:$4 sm:$0xff]   ;;  %v1863_v19 = vld [vmem:[%s2697_s1 + $0x3b4] ss:$8 sps:$4 sm:$0xff]   ;;  %v1861_v20 = vld [vmem:[%s2697_s1 + $0x3b0] ss:$8 sps:$4 sm:$0xff]  }
  0x73   :  { %1049 = vmatpush1.bf16.msra.mxu0 %v1767_v43  ;;  %1116 = vmatprep.subr.bf16.mxu1 %v1872_v46  ;;  %v1869_v21 = vld [vmem:[%s2697_s1 + $0x3c4] ss:$8 sps:$4 sm:$0xff]   ;;  %v1867_v22 = vld [vmem:[%s2697_s1 + $0x3c0] ss:$8 sps:$4 sm:$0xff]   ;;  %v1875_v23 = vld [vmem:[%s2697_s1 + $0x3d4] ss:$8 sps:$4 sm:$0xff]  }
  0x74   :  { %1050 = vmatprep.subr.bf16.mxu0 %v1775_v44  ;;  %v1873_v24 = vld [vmem:[%s2697_s1 + $0x3d0] ss:$8 sps:$4 sm:$0xff]   ;;  %v1881_v25 = vld [vmem:[%s2697_s1 + $0x3e4] ss:$8 sps:$4 sm:$0xff]   ;;  %v1879_v26 = vld [vmem:[%s2697_s1 + $0x3e0] ss:$8 sps:$4 sm:$0xff]  }
  0x75   :  { %v1887_v27 = vld [vmem:[%s2697_s1 + $0x3f4] ss:$8 sps:$4 sm:$0xff]   ;;  %v1885_v28 = vld [vmem:[%s2697_s1 + $0x3f0] ss:$8 sps:$4 sm:$0xff]   ;;  %v2453_v40 = vshrl.u32 %v180_v39, 7 }
  0x76   :  { %1117 = vmatpush1.bf16.msra.mxu1 %v1870_v49  ;;  %v178_v42 = vld [vmem:[%s2698_s2] sm:$0x3]  ;;  %v1267_v39 = vld [vmem:[%s2700_s4 + $0xf0] sm:$0xff] }
  0x77   :  { %1051 = vmatpush1.bf16.msra.mxu0 %v1773_v47  ;;  %1118 = vmatprep.subr.bf16.mxu1 %v1878_v50  ;;  %v182_v41 = vsub.s32 0, %v2453_v40  ;;  %v186_v43 = vsub.s32 1, %v2453_v40 }
  0x78   :  { %1052 = vmatprep.subr.bf16.mxu0 %v1781_v48 }
  0x79   :  { %v183_v44 = vrot.slane %v178_v42, %v182_v41  ;;  %v187_v45 = vrot.slane %v178_v42, %v186_v43  ;;  %v1270_v42 = vld [vmem:[%s2700_s4 + $0x108] sm:$0xff] }
  0x7a   :  { %1119 = vmatpush1.bf16.msra.mxu1 %v1876_v54 }
  0x7b   :  { %1053 = vmatpush1.bf16.msra.mxu0 %v1779_v52  ;;  %1120 = vmatprep.subr.bf16.mxu1 %v1884_v55  ;;  %v1238_v52 = vld [vmem:[%s2700_s4 + $0x8] sm:$0xff] }
  0x7c   :  { %1054 = vmatprep.subr.bf16.mxu0 %v1787_v53  ;;  %v1240_v53 = vld [vmem:[%s2700_s4 + $0x18] sm:$0xff] }
  0x7e   :  { %1121 = vmatpush1.bf16.msra.mxu1 %v1882_v58 }
  0x7f   :  { %1055 = vmatpush1.bf16.msra.mxu0 %v1785_v56  ;;  %v1237_v56 = vld [vmem:[%s2700_s4] sm:$0xff] }
  0x80   :  { %1065 = vmatprep.subr.bf16.mxu0 %v1795_v57  ;;  %v1239_v57 = vld [vmem:[%s2700_s4 + $0x10] sm:$0xff] }
  0x81   :  { %1139 = vmatmul.mubr.bf16.vlgmr.msra.gmra.mrb[4].mxu1 %v1890_v0  ;;  %v1149_v0 = vld [vmem:[%s2699_s3] sm:$0x3] }
  0x82   :  { %1057 = vmatmul.mubr.bf16.vlgmr.msra.gmra.mrb[0].mxu0 %v1432_v60  ;;  %1218 = vmatprep.mubr.f32.mxu1 %v1940_v30  ;;  %v1242_v60 = vld [vmem:[%s2700_s4 + $0x28] sm:$0xff] }
  0x83   :  { %1066 = vmatpush1.bf16.msra.mxu0 %v1793_v61  ;;  %1097 = vmatprep.mubr.bf16.mxu0 %v1435_v62  ;;  %v1244_v61 = vld [vmem:[%s2700_s4 + $0x38] sm:$0xff] }
  0x84   :  { %1067 = vmatprep.subr.bf16.mxu0 %v1801_v63  ;;  %v1584_v63 = vpack.c.bf16 %v1240_v53, %v1238_v52 }
  0x87   :  { %1068 = vmatpush1.bf16.msra.mxu0 %v1799_v51  ;;  %v1586_v51 = vpack.c.bf16 %v1239_v57, %v1237_v56  ;;  %v1278_v56 = vld [vmem:[%s2700_s4 + $0x148] sm:$0xff]  ;;  %v1280_v57 = vld [vmem:[%s2700_s4 + $0x158] sm:$0xff] }
  0x88   :  { %1069 = vmatprep.subr.bf16.mxu0 %v1807_v1  ;;  %v1588_v1 = vpack.c.bf16 %v1244_v61, %v1242_v60  ;;  %v1277_v60 = vld [vmem:[%s2700_s4 + $0x140] sm:$0xff]  ;;  %v1279_v61 = vld [vmem:[%s2700_s4 + $0x150] sm:$0xff] }
  0x8b   :  { %1070 = vmatpush1.bf16.msra.mxu0 %v1805_v2  ;;  %v1241_v2 = vld [vmem:[%s2700_s4 + $0x20] sm:$0xff] }
  0x8c   :  { %1071 = vmatprep.subr.bf16.mxu0 %v1813_v3  ;;  %v1243_v3 = vld [vmem:[%s2700_s4 + $0x30] sm:$0xff] }
  0x8f   :  { %1072 = vmatpush1.bf16.msra.mxu0 %v1811_v4  ;;  %v1246_v4 = vld [vmem:[%s2700_s4 + $0x48] sm:$0xff] }
  0x90   :  { %1073 = vmatprep.subr.bf16.mxu0 %v1819_v5  ;;  %v1248_v5 = vld [vmem:[%s2700_s4 + $0x58] sm:$0xff] }
  0x93   :  { %1074 = vmatpush1.bf16.msra.mxu0 %v1817_v6  ;;  %v1590_v6 = vpack.c.bf16 %v1243_v3, %v1241_v2  ;;  %v1283_v2 = vld [vmem:[%s2700_s4 + $0x170] sm:$0xff]  ;;  %v1286_v3 = vld [vmem:[%s2700_s4 + $0x188] sm:$0xff] }
  0x94   :  { %1075 = vmatprep.subr.bf16.mxu0 %v1825_v7  ;;  %v1592_v7 = vpack.c.bf16 %v1248_v5, %v1246_v4  ;;  %v1288_v4 = vld [vmem:[%s2700_s4 + $0x198] sm:$0xff] }
  0x97   :  { %1076 = vmatpush1.bf16.msra.mxu0 %v1823_v8  ;;  %v1245_v8 = vld [vmem:[%s2700_s4 + $0x40] sm:$0xff] }
  0x98   :  { %1077 = vmatprep.subr.bf16.mxu0 %v1831_v9  ;;  %v1247_v9 = vld [vmem:[%s2700_s4 + $0x50] sm:$0xff] }
  0x9b   :  { %1078 = vmatpush1.bf16.msra.mxu0 %v1829_v10  ;;  %v1250_v10 = vld [vmem:[%s2700_s4 + $0x68] sm:$0xff] }
  0x9c   :  { %1079 = vmatprep.subr.bf16.mxu0 %v1837_v11  ;;  %v1252_v11 = vld [vmem:[%s2700_s4 + $0x78] sm:$0xff] }
  0x9f   :  { %1080 = vmatpush1.bf16.msra.mxu0 %v1835_v12  ;;  %v1594_v12 = vpack.c.bf16 %v1247_v9, %v1245_v8  ;;  %v1287_v8 = vld [vmem:[%s2700_s4 + $0x190] sm:$0xff]  ;;  %v1290_v9 = vld [vmem:[%s2700_s4 + $0x1a8] sm:$0xff] }
  0xa0   :  { %1081 = vmatprep.subr.bf16.mxu0 %v1845_v13  ;;  %v1596_v13 = vpack.c.bf16 %v1252_v11, %v1250_v10  ;;  %v1292_v10 = vld [vmem:[%s2700_s4 + $0x1b8] sm:$0xff] }
  0xa3   :  { %1082 = vmatpush1.bf16.msra.mxu0 %v1843_v14  ;;  %v1249_v14 = vld [vmem:[%s2700_s4 + $0x60] sm:$0xff] }
  0xa4   :  { %1083 = vmatprep.subr.bf16.mxu0 %v1851_v15  ;;  %v1251_v15 = vld [vmem:[%s2700_s4 + $0x70] sm:$0xff] }
  0xa7   :  { %1084 = vmatpush1.bf16.msra.mxu0 %v1849_v16  ;;  %v1254_v16 = vld [vmem:[%s2700_s4 + $0x88] sm:$0xff] }
  0xa8   :  { %1085 = vmatprep.subr.bf16.mxu0 %v1857_v17  ;;  %v1256_v17 = vld [vmem:[%s2700_s4 + $0x98] sm:$0xff] }
  0xab   :  { %1086 = vmatpush1.bf16.msra.mxu0 %v1855_v18  ;;  %v1598_v18 = vpack.c.bf16 %v1251_v15, %v1249_v14  ;;  %v1291_v14 = vld [vmem:[%s2700_s4 + $0x1b0] sm:$0xff]  ;;  %v1294_v15 = vld [vmem:[%s2700_s4 + $0x1c8] sm:$0xff] }
  0xac   :  { %1087 = vmatprep.subr.bf16.mxu0 %v1863_v19  ;;  %v1600_v19 = vpack.c.bf16 %v1256_v17, %v1254_v16  ;;  %v1296_v16 = vld [vmem:[%s2700_s4 + $0x1d8] sm:$0xff] }
  0xaf   :  { %1088 = vmatpush1.bf16.msra.mxu0 %v1861_v20  ;;  %v1253_v20 = vld [vmem:[%s2700_s4 + $0x80] sm:$0xff] }
  0xb0   :  { %1089 = vmatprep.subr.bf16.mxu0 %v1869_v21  ;;  %v1255_v21 = vld [vmem:[%s2700_s4 + $0x90] sm:$0xff] }
  0xb3   :  { %1090 = vmatpush1.bf16.msra.mxu0 %v1867_v22  ;;  %v1258_v22 = vld [vmem:[%s2700_s4 + $0xa8] sm:$0xff] }
  0xb4   :  { %1091 = vmatprep.subr.bf16.mxu0 %v1875_v23  ;;  %v1260_v23 = vld [vmem:[%s2700_s4 + $0xb8] sm:$0xff] }
  0xb7   :  { %1092 = vmatpush1.bf16.msra.mxu0 %v1873_v24  ;;  %v1602_v24 = vpack.c.bf16 %v1255_v21, %v1253_v20  ;;  %v1295_v20 = vld [vmem:[%s2700_s4 + $0x1d0] sm:$0xff]  ;;  %v1298_v21 = vld [vmem:[%s2700_s4 + $0x1e8] sm:$0xff] }
  0xb8   :  { %1093 = vmatprep.subr.bf16.mxu0 %v1881_v25  ;;  %v1604_v25 = vpack.c.bf16 %v1260_v23, %v1258_v22  ;;  %v1300_v22 = vld [vmem:[%s2700_s4 + $0x1f8] sm:$0xff] }
  0xbb   :  { %1094 = vmatpush1.bf16.msra.mxu0 %v1879_v26  ;;  %v1257_v26 = vld [vmem:[%s2700_s4 + $0xa0] sm:$0xff] }
  0xbc   :  { %1095 = vmatprep.subr.bf16.mxu0 %v1887_v27  ;;  %v1259_v27 = vld [vmem:[%s2700_s4 + $0xb0] sm:$0xff] }
  0xbd   :  { %v1606_v30 = vpack.c.bf16 %v1259_v27, %v1257_v26  ;;  %v1299_v26 = vld [vmem:[%s2700_s4 + $0x1f0] sm:$0xff] }
  0xbf   :  { %1096 = vmatpush1.bf16.msra.mxu0 %v1885_v28  ;;  %v1262_v28 = vld [vmem:[%s2700_s4 + $0xc8] sm:$0xff] }
  0xc2   :  { %1098 = vmatmul.mubr.bf16.vlgmr.msra.gmra.mrb[0].mxu0 %v1434_v29  ;;  %v1264_v29 = vld [vmem:[%s2700_s4 + $0xd8] sm:$0xff] }
 0x134   :  { %v976_v31 = vpop.f32.mrb[0].mxu1 }
 0x135   :  { %v978_v32 = vpop.f32.mrb[1].mxu1  ;;  %v977_v46 = vadd.f32 %v976_v31, %v183_v44  ;;  %v1608_v31 = vpack.c.bf16 %v1264_v29, %v1262_v28  ;;  %v1272_v44 = vld [vmem:[%s2700_s4 + $0x118] sm:$0xff] }
 0x136   :  { %v980_v33 = vpop.f32.mrb[2].mxu1  ;;  %v979_v47 = vadd.f32 %v978_v32, %v187_v45  ;;  %v1261_v32 = vld [vmem:[%s2700_s4 + $0xc0] sm:$0xff] }
 0x137   :  { %v981_v34 = vpop.f32.mrb[3].mxu1  ;;  %v1263_v33 = vld [vmem:[%s2700_s4 + $0xd0] sm:$0xff] }
 0x138   :  { %v1266_v34 = vld [vmem:[%s2700_s4 + $0xe8] sm:$0xff] }
 0x154   :  { %v1140_v35 = vpop.f32.mrb[4].mxu1 }
 0x155   :  { %v1142_v36 = vpop.f32.mrb[5].mxu1 }
 0x156   :  { %v1144_v37 = vpop.f32.mrb[6].mxu1 }
 0x157   :  { %v1145_v38 = vpop.f32.mrb[7].mxu1 }
 0x158   :  { %v1265_v38 = vld [vmem:[%s2700_s4 + $0xe0] sm:$0xff] }
 0x159   :  { %v1614_v45 = vpack.c.bf16 %v1267_v39, %v1265_v38 }
 0x195   :  { %v1099_v48 = vpop.f32.mrb[0].mxu0 }
 0x196   :  { %v1649_v49 = vadd.f32 %v1099_v48, %v977_v46  ;;  %v1101_v50 = vpop.f32.mrb[1].mxu0  ;;  %v1616_v46 = vpack.c.bf16 %v1272_v44, %v1270_v42  ;;  %v1271_v48 = vld [vmem:[%s2700_s4 + $0x110] sm:$0xff] }
 0x197   :  { %v1652_v54 = vadd.f32 %v1101_v50, %v979_v47  ;;  %v1103_v55 = vpop.f32.mrb[2].mxu0  ;;  %v1269_v47 = vld [vmem:[%s2700_s4 + $0x100] sm:$0xff]  ;;  %v1276_v50 = vld [vmem:[%s2700_s4 + $0x138] sm:$0xff] }
 0x198   :  { %v1650_v58 = vadd.f32 %v1649_v49, %v1140_v35  ;;  %v1104_v59 = vpop.f32.mrb[3].mxu0  ;;  %v1268_v35 = vld [vmem:[%s2700_s4 + $0xf8] sm:$0xff]  ;;  %v1274_v49 = vld [vmem:[%s2700_s4 + $0x128] sm:$0xff]  ;;  %v1618_v52 = vpack.c.bf16 %v1271_v48, %v1269_v47  ;;  %v1275_v55 = vld [vmem:[%s2700_s4 + $0x130] sm:$0xff] }
 0x199   :  { %v1653_v62 = vadd.f32 %v1652_v54, %v1142_v36  ;;  %v1610_v36 = vpack.c.bf16 %v1263_v33, %v1261_v32  ;;  %v1612_v37 = vpack.c.bf16 %v1268_v35, %v1266_v34  ;;  %v1620_v53 = vpack.c.bf16 %v1276_v50, %v1274_v49  ;;  %v1273_v54 = vld [vmem:[%s2700_s4 + $0x120] sm:$0xff] }
 0x19a   :  { %1147 = vst [vmem:[%s2702_s6] sm:$0xff] %v1650_v58  ;;  %v1624_v59 = vpack.c.bf16 %v1280_v57, %v1278_v56 }
 0x19b   :  { %1148 = vst [vmem:[%s2702_s6 + $0x8] sm:$0xff] %v1653_v62  ;;  %1154 = vmatprep.subr.mxu1 %v1653_v62  ;;  %v1282_v62 = vld [vmem:[%s2700_s4 + $0x168] sm:$0xff]  ;;  %s1941_s6 = smov [#allocation2]  }
 0x19c   :  { %1155 = vmatpush1.msra.mxu1 %v1650_v58  ;;  %v1622_v58 = vpack.c.bf16 %v1275_v55, %v1273_v54  ;;  %s1404_s15 = sshll.u32 %s1941_s6, 4  ;;  %s1405_s15 = int_to_ptr.vmem [resolvable:$true] %s1404_s15 }
 0x19d   :  { %1581 = vmatmul.mubr.msk.f32.vlgmr.msra.gmra.mrb[8].mxu1 %vm1150_vm0, %v1149_v0  ;;  %1585 = vmatprep.subr.bf16.mxu1 %v1584_v63  ;;  %v1284_v63 = vld [vmem:[%s2700_s4 + $0x178] sm:$0xff]  ;;  %v1626_v0 = vpack.c.bf16 %v1279_v61, %v1277_v60  ;;  %s1891_s16 = scalar_lea.vmem %s1405_s15, 64  ;;  %p1896_p1 = scmp.lt.s32.totalorder %s1405_s15, %s1405_s15 }
 0x19e   :  { %1587 = vmatpush1.bf16.msra.mxu1 %v1586_v51  ;;  %v1628_v51 = vpack.c.bf16 %v1284_v63, %v1282_v62  ;;  %p1892_p0 = scmp.ne.s32.totalorder %s1405_s15, %s1891_s16  ;;  %p1897_p2 = scmp.lt.s32.totalorder %s1891_s16, %s1891_s16 }
 0x19f   :  { %1589 = vmatprep.subr.bf16.mxu1 %v1588_v1  ;;  %v1281_v1 = vld [vmem:[%s2700_s4 + $0x160] sm:$0xff] }
 0x1a0   :  { %v1630_v5 = vpack.c.bf16 %v1283_v2, %v1281_v1  ;;  %p1898_p3 = por %p1897_p2, %p1896_p1 }
 0x1a2   :  { %1591 = vmatpush1.bf16.msra.mxu1 %v1590_v6  ;;  %v1632_v6 = vpack.c.bf16 %v1288_v4, %v1286_v3  ;;  %p1899_p4 = pnand %p1898_p3, %p1892_p0 }
 0x1a3   :  { %1593 = vmatprep.subr.bf16.mxu1 %v1592_v7  ;;  %v1285_v7 = vld [vmem:[%s2700_s4 + $0x180] sm:$0xff] }
 0x1a4   :  { %v1634_v11 = vpack.c.bf16 %v1287_v8, %v1285_v7 }
 0x1a6   :  { %1595 = vmatpush1.bf16.msra.mxu1 %v1594_v12  ;;  %v1636_v12 = vpack.c.bf16 %v1292_v10, %v1290_v9 }
 0x1a7   :  { %1597 = vmatprep.subr.bf16.mxu1 %v1596_v13  ;;  %v1289_v13 = vld [vmem:[%s2700_s4 + $0x1a0] sm:$0xff] }
 0x1a8   :  { %v1638_v17 = vpack.c.bf16 %v1291_v14, %v1289_v13 }
 0x1aa   :  { %1599 = vmatpush1.bf16.msra.mxu1 %v1598_v18  ;;  %v1640_v18 = vpack.c.bf16 %v1296_v16, %v1294_v15 }
 0x1ab   :  { %1601 = vmatprep.subr.bf16.mxu1 %v1600_v19  ;;  %v1293_v19 = vld [vmem:[%s2700_s4 + $0x1c0] sm:$0xff] }
 0x1ac   :  { %v1642_v23 = vpack.c.bf16 %v1295_v20, %v1293_v19 }
 0x1ae   :  { %1603 = vmatpush1.bf16.msra.mxu1 %v1602_v24  ;;  %v1644_v24 = vpack.c.bf16 %v1300_v22, %v1298_v21 }
 0x1af   :  { %1605 = vmatprep.subr.bf16.mxu1 %v1604_v25  ;;  %v1297_v25 = vld [vmem:[%s2700_s4 + $0x1e0] sm:$0xff] }
 0x1b0   :  { %v1646_v27 = vpack.c.bf16 %v1299_v26, %v1297_v25 }
 0x1b2   :  { %1607 = vmatpush1.bf16.msra.mxu1 %v1606_v30 }
 0x1b3   :  { %1609 = vmatprep.subr.bf16.mxu1 %v1608_v31 }
 0x1b6   :  { %1611 = vmatpush1.bf16.msra.mxu1 %v1610_v36 }
 0x1b7   :  { %1613 = vmatprep.subr.bf16.mxu1 %v1612_v37 }
 0x1ba   :  { %1615 = vmatpush1.bf16.msra.mxu1 %v1614_v45 }
 0x1bb   :  { %1617 = vmatprep.subr.bf16.mxu1 %v1616_v46 }
 0x1be   :  { %1619 = vmatpush1.bf16.msra.mxu1 %v1618_v52 }
 0x1bf   :  { %1621 = vmatprep.subr.bf16.mxu1 %v1620_v53 }
 0x1c2   :  { %1623 = vmatpush1.bf16.msra.mxu1 %v1622_v58 }
 0x1c3   :  { %1625 = vmatprep.subr.bf16.mxu1 %v1624_v59 }
 0x1c6   :  { %1627 = vmatpush1.bf16.msra.mxu1 %v1626_v0 }
 0x1c7   :  { %1629 = vmatprep.subr.bf16.mxu1 %v1628_v51 }
 0x1ca   :  { %1631 = vmatpush1.bf16.msra.mxu1 %v1630_v5 }
 0x1cb   :  { %1633 = vmatprep.subr.bf16.mxu1 %v1632_v6 }
 0x1ce   :  { %1635 = vmatpush1.bf16.msra.mxu1 %v1634_v11 }
 0x1cf   :  { %1637 = vmatprep.subr.bf16.mxu1 %v1636_v12 }
 0x1d2   :  { %1639 = vmatpush1.bf16.msra.mxu1 %v1638_v17 }
 0x1d3   :  { %1641 = vmatprep.subr.bf16.mxu1 %v1640_v18 }
 0x1d6   :  { %1643 = vmatpush1.bf16.msra.mxu1 %v1642_v23 }
 0x1d7   :  { %1645 = vmatprep.subr.bf16.mxu1 %v1644_v24 }
 0x1da   :  { %1647 = vmatpush1.bf16.msra.mxu1 %v1646_v27 }
 0x270   :  { %v1220_v28 = vpop.f32.mrb[8].mxu1 }
 0x271   :  { %v1222_v29 = vpop.f32.mrb[9].mxu1 }
 0x272   :  { %1377 = vmatprep.mubr.f32.mxu1 %v1222_v29  ;;  %v1227_v30 = vcombine.low %v1220_v28, %v1222_v29 }
 0x273   :  { %1378 = vmatmul.mubr.f32.vlgmr.msra.gmra.mrb[10].mxu1 %v1220_v28 }
 0x274   :  { %1582 = vst.sshfl [vmem:[#allocation2] sm:$0x33 pattern:$0x76325410] %v1227_v30 }
 0x275   :  { %1902 = shalt.err (!%p1899_p4)
}
 0x276   :  { %s1903_s18 = scalar_lea.hbm %s2703_s7, 64 }
 0x277   :  { %p1904_p5 = scmp.ne.s32.totalorder %s2703_s7, %s1903_s18  ;;  %p1907_p6 = scmp.lt.u32.totalorder %s1903_s18, %s2703_s7 }
 0x279   :  { %p1909_p7 = pnand %p1907_p6, %p1904_p5 }
 0x27b   :  { %1912 = shalt.err (!%p1909_p7)
}
 0x27c   :  { %1407 = dma.vmem_to_hbm [thread:$0]  %s1405_s15, 64, %s2703_s7, [#allocation3]   ;;  %v1301_v31 = vld [vmem:[%s2701_s5] sm:$0x3] }
 0x27d   :  { %v1306_v32 = vrot.slane %v1301_v31, %v182_v41  ;;  %v1310_v33 = vrot.slane %v1301_v31, %v186_v43  ;;  %s1942_s26 = smov [#allocation4]  }
 0x27e   :  { %s1414_s27 = sshll.u32 %s1942_s26, 4  ;;  %s1415_s27 = int_to_ptr.vmem [resolvable:$true] %s1414_s27 }
 0x27f   :  { %s1913_s7 = scalar_lea.vmem %s1415_s27, 64  ;;  %p1918_p9 = scmp.lt.s32.totalorder %s1415_s27, %s1415_s27 }
 0x280   :  { %p1914_p8 = scmp.ne.s32.totalorder %s1415_s27, %s1913_s7  ;;  %p1919_p10 = scmp.lt.s32.totalorder %s1913_s7, %s1913_s7 }
 0x282   :  { %p1920_p11 = por %p1919_p10, %p1918_p9 }
 0x284   :  { %p1921_p12 = pnand %p1920_p11, %p1914_p8 }
 0x346   :  { %v1379_v34 = vpop.f32.mrb[10].mxu1 }
 0x347   :  { %v1380_v35 = vadd.f32 %v1379_v34, %v1306_v32  ;;  %v1381_v36 = vpop.f32.mrb[11].mxu1 }
 0x348   :  { %v1382_v37 = vadd.f32 %v1381_v36, %v1310_v33 }
 0x34a   :  { %v1386_v38 = vcombine.low %v1380_v35, %v1382_v37 }
 0x34c   :  { %1583 = vst.sshfl [vmem:[#allocation4] sm:$0x33 pattern:$0x76325410] %v1386_v38 }
 0x34d   :  { %1924 = shalt.err (!%p1921_p12)
}
 0x34e   :  { %s1925_s29 = scalar_lea.hbm %s2704_s8, 64 }
 0x34f   :  { %p1926_p13 = scmp.ne.s32.totalorder %s2704_s8, %s1925_s29  ;;  %p1929_p0 = scmp.lt.u32.totalorder %s1925_s29, %s2704_s8 }
 0x351   :  { %p1931_p1 = pnand %p1929_p0, %p1926_p13 }
 0x353   :  { %1934 = shalt.err (!%p1931_p1)
}
 0x354   :  { %1417 = dma.vmem_to_hbm [thread:$0]  %s1415_s27, 64, %s2704_s8, [#allocation5]  }
 0x355   :  { %1935 = dma.done.wait [#allocation3], 64  }
 0x356   :  { %1936 = vsyncadd [#allocation3], 4294967232 }
 0x357   :  { %1937 = dma.done.wait [#allocation5], 64  }
 0x358   :  { %1938 = vsyncadd [#allocation5], 4294967232 }
 0x359   :  { %1426 = vsyncpa [#allocation3], 1 }
 0x35a   :  { %1427 = vsyncpa [#allocation5], 1 }

</bundles_post_ra>
